<compile_context>
chip_gen: v7x
topology: tpu7x:2x2x1
jax: 0.10.0
libtpu: 0.0.40
codegen_flags: <defaults>
</compile_context>

<pallas_src>
import functools

import jax
import jax.numpy as jnp
from jax.experimental import pallas as pl
from jax.experimental.pallas import tpu as pltpu

# ----------------------------------------------------------------------------
# Small hyper-parameters consistent with ErbDecoder's constraints:
#   nb_erb % 8 == 0, (emb_hidden_dim // 2) % fix_lin_groups == 0,
#   emb_out_dim = conv_ch * nb_erb // 4 divisible by fix_lin_groups.
# ----------------------------------------------------------------------------
B = 2            # batch
T = 8            # time frames
C = 4            # conv_ch
NB_ERB = 16      # erb bins (divisible by 8)
H = 32           # emb_hidden_dim
G = 8            # fix_lin_groups
F4 = NB_ERB // 4
F2 = NB_ERB // 2
F0 = NB_ERB
EMB_OUT = C * NB_ERB // 4     # = C * F4
BN_EPS = 1e-5

_WEIGHT_ORDER = ('wih1', 'whh1', 'bih1', 'bhh1',
                 'wih2', 'whh2', 'bih2', 'bhh2',
                 'wgl',
                 'm3p', 'b3p', 'mt3', 'bt3',
                 'm2p', 'b2p', 'mt2', 'bt2',
                 'm1p', 'b1p', 'mt1', 'bt1',
                 'm0p', 'b0p', 'm0o', 'b0o')


def _sigmoid(x):
    # Stable sigmoid via tanh (EUP slot); no exp overflow.
    return 0.5 * (jnp.tanh(0.5 * x) + 1.0)


# ----------------------------------------------------------------------------
# Fused kernel: one invocation = whole batch.
#   emb_ref : (T*B, H)       GRU input, time-major rows (row = t*B + b)
#   e*_ref  : (T*B, C*F)     channel-major frequency slabs, time-major rows
#   out_ref : (T*B, NB_ERB)  sigmoid mask
# ----------------------------------------------------------------------------
def erb_decoder_kernel(
    Bb, Tt,
    emb_ref, e3_ref, e2_ref, e1_ref, e0_ref,
    wih1_ref, whh1_ref, bih1_ref, bhh1_ref,
    wih2_ref, whh2_ref, bih2_ref, bhh2_ref,
    wgl_ref,
    m3p_ref, b3p_ref, mt3_ref, bt3_ref,
    m2p_ref, b2p_ref, mt2_ref, bt2_ref,
    m1p_ref, b1p_ref, mt1_ref, bt1_ref,
    m0p_ref, b0p_ref, m0o_ref, b0o_ref,
    out_ref, gl_scr,
):
    H1 = whh1_ref.shape[0]
    H2 = whh2_ref.shape[0]

    # GRU1 input projection hoisted off the serial dependency chain: one matmul
    # covering every (t, b) row at once.
    gi1 = jnp.dot(emb_ref[...], wih1_ref[...],
                  preferred_element_type=jnp.float32) + bih1_ref[...]      # (T*B, 3H1)

    whh1 = whh1_ref[...]; bhh1 = bhh1_ref[...]
    wih2 = wih2_ref[...]; bih2 = bih2_ref[...]
    whh2 = whh2_ref[...]; bhh2 = bhh2_ref[...]
    wgl = wgl_ref[...]

    def gru_step(g, gh, h, Hh):
        # PyTorch gate order r|z|n;  n = tanh(Win x + bin + r*(Whn h + bhn)).
        r = _sigmoid(g[:, 0:Hh] + gh[:, 0:Hh])
        z = _sigmoid(g[:, Hh:2 * Hh] + gh[:, Hh:2 * Hh])
        n = jnp.tanh(g[:, 2 * Hh:3 * Hh] + r * gh[:, 2 * Hh:3 * Hh])
        return (1.0 - z) * n + z * h

    # --- fused GRU1 + GRU2 + GroupedLinear recurrence (batched over B, unrolled T) ---
    h1 = jnp.zeros((Bb, H1), jnp.float32)
    h2 = jnp.zeros((Bb, H2), jnp.float32)
    for t in range(Tt):
        lo = t * Bb
        gh1 = jnp.dot(h1, whh1, preferred_element_type=jnp.float32) + bhh1
        h1 = gru_step(gi1[lo:lo + Bb, :], gh1, h1, H1)
        g2 = jnp.dot(h1, wih2, preferred_element_type=jnp.float32) + bih2
        gh2 = jnp.dot(h2, whh2, preferred_element_type=jnp.float32) + bhh2
        h2 = gru_step(g2, gh2, h2, H2)
        # GroupedLinear (block-diag folded host-side, emb.view/permute folded in).
        gl_scr[lo:lo + Bb, :] = jnp.dot(h2, wgl, preferred_element_type=jnp.float32)

    emb_gl = gl_scr[...]                                    # (T*B, C*F4)

    # --- Conv decoder: each stage = one matmul vs a host-folded matrix + bias ---
    def stage(x, m_ref, b_ref):
        y = jnp.dot(x, m_ref[...], preferred_element_type=jnp.float32) + b_ref[...]
        return jnp.maximum(y, 0.0)

    x = stage(e3_ref[...], m3p_ref, b3p_ref) + emb_gl       # conv3p(e3) + emb
    x = stage(x, mt3_ref, bt3_ref)                          # convt3            (C*F4)
    x = stage(e2_ref[...], m2p_ref, b2p_ref) + x            # conv2p(e2) + .
    x = stage(x, mt2_ref, bt2_ref)                          # convt2  F/4 -> F/2 (C*F2)
    x = stage(e1_ref[...], m1p_ref, b1p_ref) + x            # conv1p(e1) + .
    x = stage(x, mt1_ref, bt1_ref)                          # convt1  F/2 -> F   (C*F0)
    x = stage(e0_ref[...], m0p_ref, b0p_ref) + x            # conv0p(e0) + .
    m = jnp.dot(x, m0o_ref[...], preferred_element_type=jnp.float32) + b0o_ref[...]
    out_ref[...] = _sigmoid(m)                              # conv0_out mask (T*B, F0)


# ----------------------------------------------------------------------------
# Parameters (deterministic, synthetic) — same layout as the reference module.
# ----------------------------------------------------------------------------
def init_params(key):
    keys = iter(jax.random.split(key, 64))

    def u(shape, scale=0.3):
        return jax.random.uniform(next(keys), shape, jnp.float32, -scale, scale)

    def bn(n):
        gamma = jax.random.uniform(next(keys), (n,), jnp.float32, 0.8, 1.2)
        beta = u((n,), 0.1)
        mean = u((n,), 0.1)
        var = jax.random.uniform(next(keys), (n,), jnp.float32, 0.5, 1.5)
        a = gamma / jnp.sqrt(var + BN_EPS)
        return jnp.concatenate([a, beta - mean * a])   # (2n,) = [scale | shift]

    p = {}
    p['gru1'] = dict(w_ih=u((3 * H, H)), w_hh=u((3 * H, H)),
                     b_ih=u((3 * H,)), b_hh=u((3 * H,)))
    H2 = H // 2
    p['gru2'] = dict(w_ih=u((3 * H2, H)), w_hh=u((3 * H2, H2)),
                     b_ih=u((3 * H2,)), b_hh=u((3 * H2,)))
    p['gl_w'] = u((G, H2 // G, EMB_OUT // G))
    p['w3p'] = u((C * C,)); p['b3p'] = u((C,)); p['bn3p'] = bn(C)
    p['dw3'] = u((C * 3,)); p['pw3'] = u((C * C,)); p['bnt3'] = bn(C)
    p['w2p'] = u((C * C,)); p['bn2p'] = bn(C)
    p['w1p'] = u((C * C,)); p['bn1p'] = bn(C)
    p['w0p'] = u((C * C,)); p['bn0p'] = bn(C)
    p['tw2'] = u((C * 3,)); p['pw2'] = u((C * C,)); p['bnt2'] = bn(C)
    p['tw1'] = u((C * 3,)); p['pw1'] = u((C * C,)); p['bnt1'] = bn(C)
    p['w0o'] = u((C * 3,)); p['bn0o'] = bn(1)
    return p


# ----------------------------------------------------------------------------
# Host-side folding: build per-stage (C*F_in, C*F_out) matrices with depthwise
# band conv + pointwise 1x1 + eval-mode BN folded in, plus bias rows.
# ----------------------------------------------------------------------------
def prepare_params(p):
    fp = {
        'wih1': p['gru1']['w_ih'].T, 'whh1': p['gru1']['w_hh'].T,
        'bih1': p['gru1']['b_ih'].reshape(1, -1), 'bhh1': p['gru1']['b_hh'].reshape(1, -1),
        'wih2': p['gru2']['w_ih'].T, 'whh2': p['gru2']['w_hh'].T,
        'bih2': p['gru2']['b_ih'].reshape(1, -1), 'bhh2': p['gru2']['b_hh'].reshape(1, -1),
    }
    # GroupedLinear block-diag; fold emb.view(b,t,f,-1).permute(0,3,1,2) so columns
    # come out channel-major (c*F4 + f), matching the conv slabs.
    w_bd = jax.scipy.linalg.block_diag(*[p['gl_w'][g] for g in range(G)])   # (H/2, C*F4)
    perm = (jnp.arange(F4)[None, :] * C + jnp.arange(C)[:, None]).reshape(-1)
    fp['wgl'] = w_bd[:, perm]

    def bn_split(v, n):
        return v[:n], v[n:]

    def pw_mat(w_flat, scale, F):
        # pointwise 1x1 conv (C->C) with per-out-channel BN scale folded in.
        W = w_flat.reshape(C, C) * scale[:, None]                 # W[o, c] * a[o]
        return jnp.kron(W.T, jnp.eye(F, dtype=jnp.float32))       # (C*F, C*F)

    def band_same(t3, F):
        # (F, F): (x @ M)[f] = x[f-1]*w0 + x[f]*w1 + x[f+1]*w2  ("same" padding)
        g = jnp.arange(F)[:, None]; o = jnp.arange(F)[None, :]
        return ((o == g + 1) * t3[0] + (o == g) * t3[1] + (o == g - 1) * t3[2]
                ).astype(jnp.float32)

    def band_tconv(t3, F):
        # (F, 2F): ConvTranspose1d(k=3, stride=2, pad=1, out_pad=1): out[2i+k-1] += x[i]*w[k]
        g = jnp.arange(F)[:, None]; o = jnp.arange(2 * F)[None, :]
        return ((o == 2 * g - 1) * t3[0] + (o == 2 * g) * t3[1] + (o == 2 * g + 1) * t3[2]
                ).astype(jnp.float32)

    def bd(mats):
        return jax.scipy.linalg.block_diag(*mats)

    # conv3p: Conv2d(C,C,1,bias=True) + BN + ReLU
    a, bb = bn_split(p['bn3p'], C)
    fp['m3p'] = pw_mat(p['w3p'], a, F4)
    fp['b3p'] = jnp.repeat(a * p['b3p'] + bb, F4)[None, :]
    # convt3: separable (1,3) conv (depthwise band @ pointwise) + BN + ReLU
    a, bb = bn_split(p['bnt3'], C)
    fp['mt3'] = bd([band_same(p['dw3'][3 * c:3 * c + 3], F4) for c in range(C)]) @ \
        pw_mat(p['pw3'], a, F4)
    fp['bt3'] = jnp.repeat(bb, F4)[None, :]
    # conv2p / conv1p / conv0p: Conv2d(C,C,1,bias=False) + BN + ReLU
    for name, wname, bnname, F in (('m2p', 'w2p', 'bn2p', F4),
                                   ('m1p', 'w1p', 'bn1p', F2),
                                   ('m0p', 'w0p', 'bn0p', F0)):
        a, bb = bn_split(p[bnname], C)
        fp[name] = pw_mat(p[wname], a, F)
        fp['b' + name[1:]] = jnp.repeat(bb, F)[None, :]
    # convt2 / convt1: separable ConvTranspose2d(C,C,(1,3),fstride=2) + BN + ReLU
    for name, twname, pwname, bnname, Fin in (('mt2', 'tw2', 'pw2', 'bnt2', F4),
                                              ('mt1', 'tw1', 'pw1', 'bnt1', F2)):
        a, bb = bn_split(p[bnname], C)
        Fout = 2 * Fin
        fp[name] = bd([band_tconv(p[twname][3 * c:3 * c + 3], Fin) for c in range(C)]) @ \
            pw_mat(p[pwname], a, Fout)
        fp['b' + name[1:]] = jnp.repeat(bb, Fout)[None, :]
    # conv0_out: Conv2d(C,1,(1,3),bias=False) + BN(1) + Sigmoid
    a, bb = p['bn0o'][0], p['bn0o'][1]
    fp['m0o'] = jnp.concatenate([band_same(p['w0o'][3 * c:3 * c + 3], F0)
                                 for c in range(C)], axis=0) * a            # (C*F0, F0)
    fp['b0o'] = jnp.full((1, F0), bb, jnp.float32)
    return fp


# ----------------------------------------------------------------------------
# Full ErbDecoder forward: one fused pallas_call, whole batch in one invocation.
# ----------------------------------------------------------------------------
def erb_decoder_forward(fp, emb, e3, e2, e1, e0):
    Bb, Tt, Hh = emb.shape
    Cc = e3.shape[1]
    Ff4, Ff2, Ff0 = e3.shape[3], e1.shape[3], e0.shape[3]

    # Layout plumbing (wrapper-side, fused into surrounding XLA):
    #   emb -> (T*B, H) time-major rows;  feature maps -> (T*B, C*F) slabs.
    embs = jnp.transpose(emb, (1, 0, 2)).reshape(Tt * Bb, Hh)

    def slab(x):   # (B, C, T, F) -> (T*B, C*F)  time-major rows, channel-major cols
        Bx, Cx, Tx, Fx = x.shape
        return jnp.transpose(x, (2, 0, 1, 3)).reshape(Tx * Bx, Cx * Fx)

    e3s, e2s, e1s, e0s = slab(e3), slab(e2), slab(e1), slab(e0)
    data = [embs, e3s, e2s, e1s, e0s]
    weights = [fp[k] for k in _WEIGHT_ORDER]

    def full_spec(shape):   # whole-array block (exempt from (8,128) tiling rule)
        return pl.BlockSpec(shape, lambda i, _nd=len(shape): (0,) * _nd)

    kern = functools.partial(erb_decoder_kernel, Bb, Tt)
    m = pl.pallas_call(
        kern,
        out_shape=jax.ShapeDtypeStruct((Tt * Bb, Ff0), jnp.float32),
        grid=(1,),
        in_specs=[full_spec(a.shape) for a in data + weights],
        out_specs=full_spec((Tt * Bb, Ff0)),
        scratch_shapes=[pltpu.VMEM((Tt * Bb, Cc * Ff4), jnp.float32)],   # GroupedLinear rows
        compiler_params=pltpu.CompilerParams(
            dimension_semantics=("arbitrary",)),
    )(*data, *weights)
    m = m.reshape(Tt, Bb, Ff0).transpose(1, 0, 2)
    return m[:, None, :, :]                        # (B, 1, T, NB_ERB)


# ----------------------------------------------------------------------------
# Pure-JAX reference (same folded params, same math) for a correctness check.
# ----------------------------------------------------------------------------
def erb_decoder_reference(fp, emb, e3, e2, e1, e0):
    Bb = emb.shape[0]

    def gru(x, wih, whh, bih, bhh):
        Hh = whh.shape[0]
        gi = x @ wih + bih                                   # (B, T, 3H)

        def step(h, g):
            gh = h @ whh + bhh
            r = jax.nn.sigmoid(g[:, :Hh] + gh[:, :Hh])
            z = jax.nn.sigmoid(g[:, Hh:2 * Hh] + gh[:, Hh:2 * Hh])
            n = jnp.tanh(g[:, 2 * Hh:] + r * gh[:, 2 * Hh:])
            h = (1.0 - z) * n + z * h
            return h, h

        h0 = jnp.zeros((Bb, Hh), jnp.float32)
        _, hs = jax.lax.scan(step, h0, jnp.transpose(gi, (1, 0, 2)))
        return jnp.transpose(hs, (1, 0, 2))

    h1 = gru(emb, fp['wih1'], fp['whh1'], fp['bih1'], fp['bhh1'])
    h2 = gru(h1, fp['wih2'], fp['whh2'], fp['bih2'], fp['bhh2'])
    emb_gl = h2 @ fp['wgl']                                  # (B, T, C*F4)

    def slab(x):
        Bx, Cx, Tx, Fx = x.shape
        return jnp.transpose(x, (0, 2, 1, 3)).reshape(Bx, Tx, Cx * Fx)

    def stage(x, mk, bk):
        return jnp.maximum(x @ fp[mk] + fp[bk], 0.0)

    x = stage(slab(e3), 'm3p', 'b3p') + emb_gl
    x = stage(x, 'mt3', 'bt3')
    x = stage(slab(e2), 'm2p', 'b2p') + x
    x = stage(x, 'mt2', 'bt2')
    x = stage(slab(e1), 'm1p', 'b1p') + x
    x = stage(x, 'mt1', 'bt1')
    x = stage(slab(e0), 'm0p', 'b0p') + x
    m = jax.nn.sigmoid(x @ fp['m0o'] + fp['b0o'])
    return m[:, None, :, :]


if __name__ == "__main__":
    key = jax.random.PRNGKey(0)
    kp, ke, k3, k2, k1, k0 = jax.random.split(key, 6)
    params = init_params(kp)
    fparams = prepare_params(params)   # host-side folding (band/pointwise/BN/GroupedLinear)

    emb = jax.random.normal(ke, (B, T, H), jnp.float32)
    e3 = jax.random.normal(k3, (B, C, T, F4), jnp.float32)
    e2 = jax.random.normal(k2, (B, C, T, F4), jnp.float32)
    e1 = jax.random.normal(k1, (B, C, T, F2), jnp.float32)
    e0 = jax.random.normal(k0, (B, C, T, NB_ERB), jnp.float32)

    m = jax.jit(erb_decoder_forward)(fparams, emb, e3, e2, e1, e0)
    m = jax.block_until_ready(m)

    assert m.shape == (B, 1, T, NB_ERB), m.shape
    assert bool(jnp.all(jnp.isfinite(m)))
    assert bool(jnp.all((m >= 0.0) & (m <= 1.0)))   # sigmoid mask

    m_ref = jax.jit(erb_decoder_reference)(fparams, emb, e3, e2, e1, e0)
    max_diff = float(jnp.max(jnp.abs(m - m_ref)))
    assert max_diff < 2e-2, f"kernel/reference mismatch: {max_diff}"

    print("KERNEL_OK")
</pallas_src>

<mosaic_0001>
module attributes {stable_mosaic.version = 11 : i64} {
  func.func @erb_decoder_kernel(%arg0: i32, %arg1: memref<16x32xf32, #tpu.memory_space<vmem>>, %arg2: memref<16x16xf32, #tpu.memory_space<vmem>>, %arg3: memref<16x16xf32, #tpu.memory_space<vmem>>, %arg4: memref<16x32xf32, #tpu.memory_space<vmem>>, %arg5: memref<16x64xf32, #tpu.memory_space<vmem>>, %arg6: memref<32x96xf32, #tpu.memory_space<vmem>>, %arg7: memref<32x96xf32, #tpu.memory_space<vmem>>, %arg8: memref<1x96xf32, #tpu.memory_space<vmem>>, %arg9: memref<1x96xf32, #tpu.memory_space<vmem>>, %arg10: memref<32x48xf32, #tpu.memory_space<vmem>>, %arg11: memref<16x48xf32, #tpu.memory_space<vmem>>, %arg12: memref<1x48xf32, #tpu.memory_space<vmem>>, %arg13: memref<1x48xf32, #tpu.memory_space<vmem>>, %arg14: memref<16x16xf32, #tpu.memory_space<vmem>>, %arg15: memref<16x16xf32, #tpu.memory_space<vmem>>, %arg16: memref<1x16xf32, #tpu.memory_space<vmem>>, %arg17: memref<16x16xf32, #tpu.memory_space<vmem>>, %arg18: memref<1x16xf32, #tpu.memory_space<vmem>>, %arg19: memref<16x16xf32, #tpu.memory_space<vmem>>, %arg20: memref<1x16xf32, #tpu.memory_space<vmem>>, %arg21: memref<16x32xf32, #tpu.memory_space<vmem>>, %arg22: memref<1x32xf32, #tpu.memory_space<vmem>>, %arg23: memref<32x32xf32, #tpu.memory_space<vmem>>, %arg24: memref<1x32xf32, #tpu.memory_space<vmem>>, %arg25: memref<32x64xf32, #tpu.memory_space<vmem>>, %arg26: memref<1x64xf32, #tpu.memory_space<vmem>>, %arg27: memref<64x64xf32, #tpu.memory_space<vmem>>, %arg28: memref<1x64xf32, #tpu.memory_space<vmem>>, %arg29: memref<64x16xf32, #tpu.memory_space<vmem>>, %arg30: memref<1x16xf32, #tpu.memory_space<vmem>>, %arg31: memref<16x16xf32, #tpu.memory_space<vmem>>, %arg32: memref<16x16xf32, #tpu.memory_space<vmem>>) attributes {dimension_semantics = [#tpu.dimension_semantics<arbitrary>], iteration_bounds = array<i64: 1>, scalar_prefetch = 0 : i64, scratch_operands = 1 : i64, tpu.core_type = #tpu.core_type<tc>, window_params = [{pipeline_mode = #tpu.pipeline_mode<synchronous>, transform_indices = @transform_0, window_bounds = array<i64: 16, 32>}, {pipeline_mode = #tpu.pipeline_mode<synchronous>, transform_indices = @transform_1, window_bounds = array<i64: 16, 16>}, {pipeline_mode = #tpu.pipeline_mode<synchronous>, transform_indices = @transform_2, window_bounds = array<i64: 16, 16>}, {pipeline_mode = #tpu.pipeline_mode<synchronous>, transform_indices = @transform_3, window_bounds = array<i64: 16, 32>}, {pipeline_mode = #tpu.pipeline_mode<synchronous>, transform_indices = @transform_4, window_bounds = array<i64: 16, 64>}, {pipeline_mode = #tpu.pipeline_mode<synchronous>, transform_indices = @transform_5, window_bounds = array<i64: 32, 96>}, {pipeline_mode = #tpu.pipeline_mode<synchronous>, transform_indices = @transform_6, window_bounds = array<i64: 32, 96>}, {pipeline_mode = #tpu.pipeline_mode<synchronous>, transform_indices = @transform_7, window_bounds = array<i64: 1, 96>}, {pipeline_mode = #tpu.pipeline_mode<synchronous>, transform_indices = @transform_8, window_bounds = array<i64: 1, 96>}, {pipeline_mode = #tpu.pipeline_mode<synchronous>, transform_indices = @transform_9, window_bounds = array<i64: 32, 48>}, {pipeline_mode = #tpu.pipeline_mode<synchronous>, transform_indices = @transform_10, window_bounds = array<i64: 16, 48>}, {pipeline_mode = #tpu.pipeline_mode<synchronous>, transform_indices = @transform_11, window_bounds = array<i64: 1, 48>}, {pipeline_mode = #tpu.pipeline_mode<synchronous>, transform_indices = @transform_12, window_bounds = array<i64: 1, 48>}, {pipeline_mode = #tpu.pipeline_mode<synchronous>, transform_indices = @transform_13, window_bounds = array<i64: 16, 16>}, {pipeline_mode = #tpu.pipeline_mode<synchronous>, transform_indices = @transform_14, window_bounds = array<i64: 16, 16>}, {pipeline_mode = #tpu.pipeline_mode<synchronous>, transform_indices = @transform_15, window_bounds = array<i64: 1, 16>}, {pipeline_mode = #tpu.pipeline_mode<synchronous>, transform_indices = @transform_16, window_bounds = array<i64: 16, 16>}, {pipeline_mode = #tpu.pipeline_mode<synchronous>, transform_indices = @transform_17, window_bounds = array<i64: 1, 16>}, {pipeline_mode = #tpu.pipeline_mode<synchronous>, transform_indices = @transform_18, window_bounds = array<i64: 16, 16>}, {pipeline_mode = #tpu.pipeline_mode<synchronous>, transform_indices = @transform_19, window_bounds = array<i64: 1, 16>}, {pipeline_mode = #tpu.pipeline_mode<synchronous>, transform_indices = @transform_20, window_bounds = array<i64: 16, 32>}, {pipeline_mode = #tpu.pipeline_mode<synchronous>, transform_indices = @transform_21, window_bounds = array<i64: 1, 32>}, {pipeline_mode = #tpu.pipeline_mode<synchronous>, transform_indices = @transform_22, window_bounds = array<i64: 32, 32>}, {pipeline_mode = #tpu.pipeline_mode<synchronous>, transform_indices = @transform_23, window_bounds = array<i64: 1, 32>}, {pipeline_mode = #tpu.pipeline_mode<synchronous>, transform_indices = @transform_24, window_bounds = array<i64: 32, 64>}, {pipeline_mode = #tpu.pipeline_mode<synchronous>, transform_indices = @transform_25, window_bounds = array<i64: 1, 64>}, {pipeline_mode = #tpu.pipeline_mode<synchronous>, transform_indices = @transform_26, window_bounds = array<i64: 64, 64>}, {pipeline_mode = #tpu.pipeline_mode<synchronous>, transform_indices = @transform_27, window_bounds = array<i64: 1, 64>}, {pipeline_mode = #tpu.pipeline_mode<synchronous>, transform_indices = @transform_28, window_bounds = array<i64: 64, 16>}, {pipeline_mode = #tpu.pipeline_mode<synchronous>, transform_indices = @transform_29, window_bounds = array<i64: 1, 16>}, {pipeline_mode = #tpu.pipeline_mode<synchronous>, transform_indices = @transform_30, window_bounds = array<i64: 16, 16>}]} {
    %c0 = arith.constant 0 : index
    %c0_0 = arith.constant 0 : index
    %0 = vector.load %arg1[%c0, %c0_0] : memref<16x32xf32, #tpu.memory_space<vmem>>, vector<16x32xf32>
    %c0_1 = arith.constant 0 : index
    %c0_2 = arith.constant 0 : index
    %1 = vector.load %arg6[%c0_1, %c0_2] : memref<32x96xf32, #tpu.memory_space<vmem>>, vector<32x96xf32>
    %cst = arith.constant dense<0.000000e+00> : vector<16x96xf32>
    %2 = tpu.matmul %0, %1, %cst {dimension_numbers = #tpu.dot_dimension_numbers<[1], [0], [0], [1], [0, 0, 1, 1], [], []>} : vector<16x32xf32>, vector<32x96xf32>, vector<16x96xf32> -> vector<16x96xf32>
    %c0_3 = arith.constant 0 : index
    %c0_4 = arith.constant 0 : index
    %3 = vector.load %arg8[%c0_3, %c0_4] : memref<1x96xf32, #tpu.memory_space<vmem>>, vector<1x96xf32>
    %4 = vector.broadcast %3 : vector<1x96xf32> to vector<16x96xf32>
    %5 = arith.addf %2, %4 : vector<16x96xf32>
    %c0_5 = arith.constant 0 : index
    %c0_6 = arith.constant 0 : index
    %6 = vector.load %arg7[%c0_5, %c0_6] : memref<32x96xf32, #tpu.memory_space<vmem>>, vector<32x96xf32>
    %c0_7 = arith.constant 0 : index
    %c0_8 = arith.constant 0 : index
    %7 = vector.load %arg9[%c0_7, %c0_8] : memref<1x96xf32, #tpu.memory_space<vmem>>, vector<1x96xf32>
    %c0_9 = arith.constant 0 : index
    %c0_10 = arith.constant 0 : index
    %8 = vector.load %arg10[%c0_9, %c0_10] : memref<32x48xf32, #tpu.memory_space<vmem>>, vector<32x48xf32>
    %c0_11 = arith.constant 0 : index
    %c0_12 = arith.constant 0 : index
    %9 = vector.load %arg12[%c0_11, %c0_12] : memref<1x48xf32, #tpu.memory_space<vmem>>, vector<1x48xf32>
    %c0_13 = arith.constant 0 : index
    %c0_14 = arith.constant 0 : index
    %10 = vector.load %arg11[%c0_13, %c0_14] : memref<16x48xf32, #tpu.memory_space<vmem>>, vector<16x48xf32>
    %c0_15 = arith.constant 0 : index
    %c0_16 = arith.constant 0 : index
    %11 = vector.load %arg13[%c0_15, %c0_16] : memref<1x48xf32, #tpu.memory_space<vmem>>, vector<1x48xf32>
    %c0_17 = arith.constant 0 : index
    %c0_18 = arith.constant 0 : index
    %12 = vector.load %arg14[%c0_17, %c0_18] : memref<16x16xf32, #tpu.memory_space<vmem>>, vector<16x16xf32>
    %cst_19 = arith.constant 0.000000e+00 : f32
    %13 = vector.broadcast %cst_19 : f32 to vector<2x32xf32>
    %cst_20 = arith.constant 0.000000e+00 : f32
    %14 = vector.broadcast %cst_20 : f32 to vector<2x16xf32>
    %cst_21 = arith.constant dense<0.000000e+00> : vector<2x96xf32>
    %15 = tpu.matmul %13, %6, %cst_21 {dimension_numbers = #tpu.dot_dimension_numbers<[1], [0], [0], [1], [0, 0, 1, 1], [], []>} : vector<2x32xf32>, vector<32x96xf32>, vector<2x96xf32> -> vector<2x96xf32>
    %16 = vector.broadcast %7 : vector<1x96xf32> to vector<2x96xf32>
    %17 = arith.addf %15, %16 : vector<2x96xf32>
    %18 = vector.extract_strided_slice %5 {offsets = [0, 0], sizes = [2, 96], strides = [1, 1]} : vector<16x96xf32> to vector<2x96xf32>
    %19 = vector.extract_strided_slice %18 {offsets = [0, 0], sizes = [2, 32], strides = [1, 1]} : vector<2x96xf32> to vector<2x32xf32>
    %20 = vector.extract_strided_slice %17 {offsets = [0, 0], sizes = [2, 32], strides = [1, 1]} : vector<2x96xf32> to vector<2x32xf32>
    %21 = arith.addf %19, %20 : vector<2x32xf32>
    %cst_22 = arith.constant 5.000000e-01 : f32
    %22 = vector.broadcast %cst_22 : f32 to vector<2x32xf32>
    %23 = arith.mulf %22, %21 : vector<2x32xf32>
    %24 = math.tanh %23 : vector<2x32xf32>
    %cst_23 = arith.constant 1.000000e+00 : f32
    %25 = vector.broadcast %cst_23 : f32 to vector<2x32xf32>
    %26 = arith.addf %24, %25 : vector<2x32xf32>
    %cst_24 = arith.constant 5.000000e-01 : f32
    %27 = vector.broadcast %cst_24 : f32 to vector<2x32xf32>
    %28 = arith.mulf %27, %26 : vector<2x32xf32>
    %29 = vector.extract_strided_slice %18 {offsets = [0, 32], sizes = [2, 32], strides = [1, 1]} : vector<2x96xf32> to vector<2x32xf32>
    %30 = vector.extract_strided_slice %17 {offsets = [0, 32], sizes = [2, 32], strides = [1, 1]} : vector<2x96xf32> to vector<2x32xf32>
    %31 = arith.addf %29, %30 : vector<2x32xf32>
    %cst_25 = arith.constant 5.000000e-01 : f32
    %32 = vector.broadcast %cst_25 : f32 to vector<2x32xf32>
    %33 = arith.mulf %32, %31 : vector<2x32xf32>
    %34 = math.tanh %33 : vector<2x32xf32>
    %cst_26 = arith.constant 1.000000e+00 : f32
    %35 = vector.broadcast %cst_26 : f32 to vector<2x32xf32>
    %36 = arith.addf %34, %35 : vector<2x32xf32>
    %cst_27 = arith.constant 5.000000e-01 : f32
    %37 = vector.broadcast %cst_27 : f32 to vector<2x32xf32>
    %38 = arith.mulf %37, %36 : vector<2x32xf32>
    %39 = vector.extract_strided_slice %18 {offsets = [0, 64], sizes = [2, 32], strides = [1, 1]} : vector<2x96xf32> to vector<2x32xf32>
    %40 = vector.extract_strided_slice %17 {offsets = [0, 64], sizes = [2, 32], strides = [1, 1]} : vector<2x96xf32> to vector<2x32xf32>
    %41 = arith.mulf %28, %40 : vector<2x32xf32>
    %42 = arith.addf %39, %41 : vector<2x32xf32>
    %43 = math.tanh %42 : vector<2x32xf32>
    %cst_28 = arith.constant 1.000000e+00 : f32
    %44 = vector.broadcast %cst_28 : f32 to vector<2x32xf32>
    %45 = arith.subf %44, %38 : vector<2x32xf32>
    %46 = arith.mulf %45, %43 : vector<2x32xf32>
    %47 = arith.mulf %38, %13 : vector<2x32xf32>
    %48 = arith.addf %46, %47 : vector<2x32xf32>
    %cst_29 = arith.constant dense<0.000000e+00> : vector<2x48xf32>
    %49 = tpu.matmul %48, %8, %cst_29 {dimension_numbers = #tpu.dot_dimension_numbers<[1], [0], [0], [1], [0, 0, 1, 1], [], []>} : vector<2x32xf32>, vector<32x48xf32>, vector<2x48xf32> -> vector<2x48xf32>
    %50 = vector.broadcast %9 : vector<1x48xf32> to vector<2x48xf32>
    %51 = arith.addf %49, %50 : vector<2x48xf32>
    %cst_30 = arith.constant dense<0.000000e+00> : vector<2x48xf32>
    %52 = tpu.matmul %14, %10, %cst_30 {dimension_numbers = #tpu.dot_dimension_numbers<[1], [0], [0], [1], [0, 0, 1, 1], [], []>} : vector<2x16xf32>, vector<16x48xf32>, vector<2x48xf32> -> vector<2x48xf32>
    %53 = vector.broadcast %11 : vector<1x48xf32> to vector<2x48xf32>
    %54 = arith.addf %52, %53 : vector<2x48xf32>
    %55 = vector.extract_strided_slice %51 {offsets = [0, 0], sizes = [2, 16], strides = [1, 1]} : vector<2x48xf32> to vector<2x16xf32>
    %56 = vector.extract_strided_slice %54 {offsets = [0, 0], sizes = [2, 16], strides = [1, 1]} : vector<2x48xf32> to vector<2x16xf32>
    %57 = arith.addf %55, %56 : vector<2x16xf32>
    %cst_31 = arith.constant 5.000000e-01 : f32
    %58 = vector.broadcast %cst_31 : f32 to vector<2x16xf32>
    %59 = arith.mulf %58, %57 : vector<2x16xf32>
    %60 = math.tanh %59 : vector<2x16xf32>
    %cst_32 = arith.constant 1.000000e+00 : f32
    %61 = vector.broadcast %cst_32 : f32 to vector<2x16xf32>
    %62 = arith.addf %60, %61 : vector<2x16xf32>
    %cst_33 = arith.constant 5.000000e-01 : f32
    %63 = vector.broadcast %cst_33 : f32 to vector<2x16xf32>
    %64 = arith.mulf %63, %62 : vector<2x16xf32>
    %65 = vector.extract_strided_slice %51 {offsets = [0, 16], sizes = [2, 16], strides = [1, 1]} : vector<2x48xf32> to vector<2x16xf32>
    %66 = vector.extract_strided_slice %54 {offsets = [0, 16], sizes = [2, 16], strides = [1, 1]} : vector<2x48xf32> to vector<2x16xf32>
    %67 = arith.addf %65, %66 : vector<2x16xf32>
    %cst_34 = arith.constant 5.000000e-01 : f32
    %68 = vector.broadcast %cst_34 : f32 to vector<2x16xf32>
    %69 = arith.mulf %68, %67 : vector<2x16xf32>
    %70 = math.tanh %69 : vector<2x16xf32>
    %cst_35 = arith.constant 1.000000e+00 : f32
    %71 = vector.broadcast %cst_35 : f32 to vector<2x16xf32>
    %72 = arith.addf %70, %71 : vector<2x16xf32>
    %cst_36 = arith.constant 5.000000e-01 : f32
    %73 = vector.broadcast %cst_36 : f32 to vector<2x16xf32>
    %74 = arith.mulf %73, %72 : vector<2x16xf32>
    %75 = vector.extract_strided_slice %51 {offsets = [0, 32], sizes = [2, 16], strides = [1, 1]} : vector<2x48xf32> to vector<2x16xf32>
    %76 = vector.extract_strided_slice %54 {offsets = [0, 32], sizes = [2, 16], strides = [1, 1]} : vector<2x48xf32> to vector<2x16xf32>
    %77 = arith.mulf %64, %76 : vector<2x16xf32>
    %78 = arith.addf %75, %77 : vector<2x16xf32>
    %79 = math.tanh %78 : vector<2x16xf32>
    %cst_37 = arith.constant 1.000000e+00 : f32
    %80 = vector.broadcast %cst_37 : f32 to vector<2x16xf32>
    %81 = arith.subf %80, %74 : vector<2x16xf32>
    %82 = arith.mulf %81, %79 : vector<2x16xf32>
    %83 = arith.mulf %74, %14 : vector<2x16xf32>
    %84 = arith.addf %82, %83 : vector<2x16xf32>
    %cst_38 = arith.constant dense<0.000000e+00> : vector<2x16xf32>
    %85 = tpu.matmul %84, %12, %cst_38 {dimension_numbers = #tpu.dot_dimension_numbers<[1], [0], [0], [1], [0, 0, 1, 1], [], []>} : vector<2x16xf32>, vector<16x16xf32>, vector<2x16xf32> -> vector<2x16xf32>
    %c0_39 = arith.constant 0 : index
    %c0_40 = arith.constant 0 : index
    %86 = vector.load %arg32[%c0_39, %c0_40] : memref<16x16xf32, #tpu.memory_space<vmem>>, vector<2x16xf32>
    tpu.vector_store %arg32[%c0_39, %c0_40], %85 {strides = array<i32>} : memref<16x16xf32, #tpu.memory_space<vmem>>, vector<2x16xf32>,
    %cst_41 = arith.constant dense<0.000000e+00> : vector<2x96xf32>
    %87 = tpu.matmul %48, %6, %cst_41 {dimension_numbers = #tpu.dot_dimension_numbers<[1], [0], [0], [1], [0, 0, 1, 1], [], []>} : vector<2x32xf32>, vector<32x96xf32>, vector<2x96xf32> -> vector<2x96xf32>
    %88 = vector.broadcast %7 : vector<1x96xf32> to vector<2x96xf32>
    %89 = arith.addf %87, %88 : vector<2x96xf32>
    %90 = vector.extract_strided_slice %5 {offsets = [2, 0], sizes = [2, 96], strides = [1, 1]} : vector<16x96xf32> to vector<2x96xf32>
    %91 = vector.extract_strided_slice %90 {offsets = [0, 0], sizes = [2, 32], strides = [1, 1]} : vector<2x96xf32> to vector<2x32xf32>
    %92 = vector.extract_strided_slice %89 {offsets = [0, 0], sizes = [2, 32], strides = [1, 1]} : vector<2x96xf32> to vector<2x32xf32>
    %93 = arith.addf %91, %92 : vector<2x32xf32>
    %cst_42 = arith.constant 5.000000e-01 : f32
    %94 = vector.broadcast %cst_42 : f32 to vector<2x32xf32>
    %95 = arith.mulf %94, %93 : vector<2x32xf32>
    %96 = math.tanh %95 : vector<2x32xf32>
    %cst_43 = arith.constant 1.000000e+00 : f32
    %97 = vector.broadcast %cst_43 : f32 to vector<2x32xf32>
    %98 = arith.addf %96, %97 : vector<2x32xf32>
    %cst_44 = arith.constant 5.000000e-01 : f32
    %99 = vector.broadcast %cst_44 : f32 to vector<2x32xf32>
    %100 = arith.mulf %99, %98 : vector<2x32xf32>
    %101 = vector.extract_strided_slice %90 {offsets = [0, 32], sizes = [2, 32], strides = [1, 1]} : vector<2x96xf32> to vector<2x32xf32>
    %102 = vector.extract_strided_slice %89 {offsets = [0, 32], sizes = [2, 32], strides = [1, 1]} : vector<2x96xf32> to vector<2x32xf32>
    %103 = arith.addf %101, %102 : vector<2x32xf32>
    %cst_45 = arith.constant 5.000000e-01 : f32
    %104 = vector.broadcast %cst_45 : f32 to vector<2x32xf32>
    %105 = arith.mulf %104, %103 : vector<2x32xf32>
    %106 = math.tanh %105 : vector<2x32xf32>
    %cst_46 = arith.constant 1.000000e+00 : f32
    %107 = vector.broadcast %cst_46 : f32 to vector<2x32xf32>
    %108 = arith.addf %106, %107 : vector<2x32xf32>
    %cst_47 = arith.constant 5.000000e-01 : f32
    %109 = vector.broadcast %cst_47 : f32 to vector<2x32xf32>
    %110 = arith.mulf %109, %108 : vector<2x32xf32>
    %111 = vector.extract_strided_slice %90 {offsets = [0, 64], sizes = [2, 32], strides = [1, 1]} : vector<2x96xf32> to vector<2x32xf32>
    %112 = vector.extract_strided_slice %89 {offsets = [0, 64], sizes = [2, 32], strides = [1, 1]} : vector<2x96xf32> to vector<2x32xf32>
    %113 = arith.mulf %100, %112 : vector<2x32xf32>
    %114 = arith.addf %111, %113 : vector<2x32xf32>
    %115 = math.tanh %114 : vector<2x32xf32>
    %cst_48 = arith.constant 1.000000e+00 : f32
    %116 = vector.broadcast %cst_48 : f32 to vector<2x32xf32>
    %117 = arith.subf %116, %110 : vector<2x32xf32>
    %118 = arith.mulf %117, %115 : vector<2x32xf32>
    %119 = arith.mulf %110, %48 : vector<2x32xf32>
    %120 = arith.addf %118, %119 : vector<2x32xf32>
    %cst_49 = arith.constant dense<0.000000e+00> : vector<2x48xf32>
    %121 = tpu.matmul %120, %8, %cst_49 {dimension_numbers = #tpu.dot_dimension_numbers<[1], [0], [0], [1], [0, 0, 1, 1], [], []>} : vector<2x32xf32>, vector<32x48xf32>, vector<2x48xf32> -> vector<2x48xf32>
    %122 = vector.broadcast %9 : vector<1x48xf32> to vector<2x48xf32>
    %123 = arith.addf %121, %122 : vector<2x48xf32>
    %cst_50 = arith.constant dense<0.000000e+00> : vector<2x48xf32>
    %124 = tpu.matmul %84, %10, %cst_50 {dimension_numbers = #tpu.dot_dimension_numbers<[1], [0], [0], [1], [0, 0, 1, 1], [], []>} : vector<2x16xf32>, vector<16x48xf32>, vector<2x48xf32> -> vector<2x48xf32>
    %125 = vector.broadcast %11 : vector<1x48xf32> to vector<2x48xf32>
    %126 = arith.addf %124, %125 : vector<2x48xf32>
    %127 = vector.extract_strided_slice %123 {offsets = [0, 0], sizes = [2, 16], strides = [1, 1]} : vector<2x48xf32> to vector<2x16xf32>
    %128 = vector.extract_strided_slice %126 {offsets = [0, 0], sizes = [2, 16], strides = [1, 1]} : vector<2x48xf32> to vector<2x16xf32>
    %129 = arith.addf %127, %128 : vector<2x16xf32>
    %cst_51 = arith.constant 5.000000e-01 : f32
    %130 = vector.broadcast %cst_51 : f32 to vector<2x16xf32>
    %131 = arith.mulf %130, %129 : vector<2x16xf32>
    %132 = math.tanh %131 : vector<2x16xf32>
    %cst_52 = arith.constant 1.000000e+00 : f32
    %133 = vector.broadcast %cst_52 : f32 to vector<2x16xf32>
    %134 = arith.addf %132, %133 : vector<2x16xf32>
    %cst_53 = arith.constant 5.000000e-01 : f32
    %135 = vector.broadcast %cst_53 : f32 to vector<2x16xf32>
    %136 = arith.mulf %135, %134 : vector<2x16xf32>
    %137 = vector.extract_strided_slice %123 {offsets = [0, 16], sizes = [2, 16], strides = [1, 1]} : vector<2x48xf32> to vector<2x16xf32>
    %138 = vector.extract_strided_slice %126 {offsets = [0, 16], sizes = [2, 16], strides = [1, 1]} : vector<2x48xf32> to vector<2x16xf32>
    %139 = arith.addf %137, %138 : vector<2x16xf32>
    %cst_54 = arith.constant 5.000000e-01 : f32
    %140 = vector.broadcast %cst_54 : f32 to vector<2x16xf32>
    %141 = arith.mulf %140, %139 : vector<2x16xf32>
    %142 = math.tanh %141 : vector<2x16xf32>
    %cst_55 = arith.constant 1.000000e+00 : f32
    %143 = vector.broadcast %cst_55 : f32 to vector<2x16xf32>
    %144 = arith.addf %142, %143 : vector<2x16xf32>
    %cst_56 = arith.constant 5.000000e-01 : f32
    %145 = vector.broadcast %cst_56 : f32 to vector<2x16xf32>
    %146 = arith.mulf %145, %144 : vector<2x16xf32>
    %147 = vector.extract_strided_slice %123 {offsets = [0, 32], sizes = [2, 16], strides = [1, 1]} : vector<2x48xf32> to vector<2x16xf32>
    %148 = vector.extract_strided_slice %126 {offsets = [0, 32], sizes = [2, 16], strides = [1, 1]} : vector<2x48xf32> to vector<2x16xf32>
    %149 = arith.mulf %136, %148 : vector<2x16xf32>
    %150 = arith.addf %147, %149 : vector<2x16xf32>
    %151 = math.tanh %150 : vector<2x16xf32>
    %cst_57 = arith.constant 1.000000e+00 : f32
    %152 = vector.broadcast %cst_57 : f32 to vector<2x16xf32>
    %153 = arith.subf %152, %146 : vector<2x16xf32>
    %154 = arith.mulf %153, %151 : vector<2x16xf32>
    %155 = arith.mulf %146, %84 : vector<2x16xf32>
    %156 = arith.addf %154, %155 : vector<2x16xf32>
    %cst_58 = arith.constant dense<0.000000e+00> : vector<2x16xf32>
    %157 = tpu.matmul %156, %12, %cst_58 {dimension_numbers = #tpu.dot_dimension_numbers<[1], [0], [0], [1], [0, 0, 1, 1], [], []>} : vector<2x16xf32>, vector<16x16xf32>, vector<2x16xf32> -> vector<2x16xf32>
    %c2 = arith.constant 2 : index
    %c0_59 = arith.constant 0 : index
    %158 = vector.load %arg32[%c2, %c0_59] : memref<16x16xf32, #tpu.memory_space<vmem>>, vector<2x16xf32>
    tpu.vector_store %arg32[%c2, %c0_59], %157 {strides = array<i32>} : memref<16x16xf32, #tpu.memory_space<vmem>>, vector<2x16xf32>,
    %cst_60 = arith.constant dense<0.000000e+00> : vector<2x96xf32>
    %159 = tpu.matmul %120, %6, %cst_60 {dimension_numbers = #tpu.dot_dimension_numbers<[1], [0], [0], [1], [0, 0, 1, 1], [], []>} : vector<2x32xf32>, vector<32x96xf32>, vector<2x96xf32> -> vector<2x96xf32>
    %160 = vector.broadcast %7 : vector<1x96xf32> to vector<2x96xf32>
    %161 = arith.addf %159, %160 : vector<2x96xf32>
    %162 = vector.extract_strided_slice %5 {offsets = [4, 0], sizes = [2, 96], strides = [1, 1]} : vector<16x96xf32> to vector<2x96xf32>
    %163 = vector.extract_strided_slice %162 {offsets = [0, 0], sizes = [2, 32], strides = [1, 1]} : vector<2x96xf32> to vector<2x32xf32>
    %164 = vector.extract_strided_slice %161 {offsets = [0, 0], sizes = [2, 32], strides = [1, 1]} : vector<2x96xf32> to vector<2x32xf32>
    %165 = arith.addf %163, %164 : vector<2x32xf32>
    %cst_61 = arith.constant 5.000000e-01 : f32
    %166 = vector.broadcast %cst_61 : f32 to vector<2x32xf32>
    %167 = arith.mulf %166, %165 : vector<2x32xf32>
    %168 = math.tanh %167 : vector<2x32xf32>
    %cst_62 = arith.constant 1.000000e+00 : f32
    %169 = vector.broadcast %cst_62 : f32 to vector<2x32xf32>
    %170 = arith.addf %168, %169 : vector<2x32xf32>
    %cst_63 = arith.constant 5.000000e-01 : f32
    %171 = vector.broadcast %cst_63 : f32 to vector<2x32xf32>
    %172 = arith.mulf %171, %170 : vector<2x32xf32>
    %173 = vector.extract_strided_slice %162 {offsets = [0, 32], sizes = [2, 32], strides = [1, 1]} : vector<2x96xf32> to vector<2x32xf32>
    %174 = vector.extract_strided_slice %161 {offsets = [0, 32], sizes = [2, 32], strides = [1, 1]} : vector<2x96xf32> to vector<2x32xf32>
    %175 = arith.addf %173, %174 : vector<2x32xf32>
    %cst_64 = arith.constant 5.000000e-01 : f32
    %176 = vector.broadcast %cst_64 : f32 to vector<2x32xf32>
    %177 = arith.mulf %176, %175 : vector<2x32xf32>
    %178 = math.tanh %177 : vector<2x32xf32>
    %cst_65 = arith.constant 1.000000e+00 : f32
    %179 = vector.broadcast %cst_65 : f32 to vector<2x32xf32>
    %180 = arith.addf %178, %179 : vector<2x32xf32>
    %cst_66 = arith.constant 5.000000e-01 : f32
    %181 = vector.broadcast %cst_66 : f32 to vector<2x32xf32>
    %182 = arith.mulf %181, %180 : vector<2x32xf32>
    %183 = vector.extract_strided_slice %162 {offsets = [0, 64], sizes = [2, 32], strides = [1, 1]} : vector<2x96xf32> to vector<2x32xf32>
    %184 = vector.extract_strided_slice %161 {offsets = [0, 64], sizes = [2, 32], strides = [1, 1]} : vector<2x96xf32> to vector<2x32xf32>
    %185 = arith.mulf %172, %184 : vector<2x32xf32>
    %186 = arith.addf %183, %185 : vector<2x32xf32>
    %187 = math.tanh %186 : vector<2x32xf32>
    %cst_67 = arith.constant 1.000000e+00 : f32
    %188 = vector.broadcast %cst_67 : f32 to vector<2x32xf32>
    %189 = arith.subf %188, %182 : vector<2x32xf32>
    %190 = arith.mulf %189, %187 : vector<2x32xf32>
    %191 = arith.mulf %182, %120 : vector<2x32xf32>
    %192 = arith.addf %190, %191 : vector<2x32xf32>
    %cst_68 = arith.constant dense<0.000000e+00> : vector<2x48xf32>
    %193 = tpu.matmul %192, %8, %cst_68 {dimension_numbers = #tpu.dot_dimension_numbers<[1], [0], [0], [1], [0, 0, 1, 1], [], []>} : vector<2x32xf32>, vector<32x48xf32>, vector<2x48xf32> -> vector<2x48xf32>
    %194 = vector.broadcast %9 : vector<1x48xf32> to vector<2x48xf32>
    %195 = arith.addf %193, %194 : vector<2x48xf32>
    %cst_69 = arith.constant dense<0.000000e+00> : vector<2x48xf32>
    %196 = tpu.matmul %156, %10, %cst_69 {dimension_numbers = #tpu.dot_dimension_numbers<[1], [0], [0], [1], [0, 0, 1, 1], [], []>} : vector<2x16xf32>, vector<16x48xf32>, vector<2x48xf32> -> vector<2x48xf32>
    %197 = vector.broadcast %11 : vector<1x48xf32> to vector<2x48xf32>
    %198 = arith.addf %196, %197 : vector<2x48xf32>
    %199 = vector.extract_strided_slice %195 {offsets = [0, 0], sizes = [2, 16], strides = [1, 1]} : vector<2x48xf32> to vector<2x16xf32>
    %200 = vector.extract_strided_slice %198 {offsets = [0, 0], sizes = [2, 16], strides = [1, 1]} : vector<2x48xf32> to vector<2x16xf32>
    %201 = arith.addf %199, %200 : vector<2x16xf32>
    %cst_70 = arith.constant 5.000000e-01 : f32
    %202 = vector.broadcast %cst_70 : f32 to vector<2x16xf32>
    %203 = arith.mulf %202, %201 : vector<2x16xf32>
    %204 = math.tanh %203 : vector<2x16xf32>
    %cst_71 = arith.constant 1.000000e+00 : f32
    %205 = vector.broadcast %cst_71 : f32 to vector<2x16xf32>
    %206 = arith.addf %204, %205 : vector<2x16xf32>
    %cst_72 = arith.constant 5.000000e-01 : f32
    %207 = vector.broadcast %cst_72 : f32 to vector<2x16xf32>
    %208 = arith.mulf %207, %206 : vector<2x16xf32>
    %209 = vector.extract_strided_slice %195 {offsets = [0, 16], sizes = [2, 16], strides = [1, 1]} : vector<2x48xf32> to vector<2x16xf32>
    %210 = vector.extract_strided_slice %198 {offsets = [0, 16], sizes = [2, 16], strides = [1, 1]} : vector<2x48xf32> to vector<2x16xf32>
    %211 = arith.addf %209, %210 : vector<2x16xf32>
    %cst_73 = arith.constant 5.000000e-01 : f32
    %212 = vector.broadcast %cst_73 : f32 to vector<2x16xf32>
    %213 = arith.mulf %212, %211 : vector<2x16xf32>
    %214 = math.tanh %213 : vector<2x16xf32>
    %cst_74 = arith.constant 1.000000e+00 : f32
    %215 = vector.broadcast %cst_74 : f32 to vector<2x16xf32>
    %216 = arith.addf %214, %215 : vector<2x16xf32>
    %cst_75 = arith.constant 5.000000e-01 : f32
    %217 = vector.broadcast %cst_75 : f32 to vector<2x16xf32>
    %218 = arith.mulf %217, %216 : vector<2x16xf32>
    %219 = vector.extract_strided_slice %195 {offsets = [0, 32], sizes = [2, 16], strides = [1, 1]} : vector<2x48xf32> to vector<2x16xf32>
    %220 = vector.extract_strided_slice %198 {offsets = [0, 32], sizes = [2, 16], strides = [1, 1]} : vector<2x48xf32> to vector<2x16xf32>
    %221 = arith.mulf %208, %220 : vector<2x16xf32>
    %222 = arith.addf %219, %221 : vector<2x16xf32>
    %223 = math.tanh %222 : vector<2x16xf32>
    %cst_76 = arith.constant 1.000000e+00 : f32
    %224 = vector.broadcast %cst_76 : f32 to vector<2x16xf32>
    %225 = arith.subf %224, %218 : vector<2x16xf32>
    %226 = arith.mulf %225, %223 : vector<2x16xf32>
    %227 = arith.mulf %218, %156 : vector<2x16xf32>
    %228 = arith.addf %226, %227 : vector<2x16xf32>
    %cst_77 = arith.constant dense<0.000000e+00> : vector<2x16xf32>
    %229 = tpu.matmul %228, %12, %cst_77 {dimension_numbers = #tpu.dot_dimension_numbers<[1], [0], [0], [1], [0, 0, 1, 1], [], []>} : vector<2x16xf32>, vector<16x16xf32>, vector<2x16xf32> -> vector<2x16xf32>
    %c4 = arith.constant 4 : index
    %c0_78 = arith.constant 0 : index
    %230 = vector.load %arg32[%c4, %c0_78] : memref<16x16xf32, #tpu.memory_space<vmem>>, vector<2x16xf32>
    tpu.vector_store %arg32[%c4, %c0_78], %229 {strides = array<i32>} : memref<16x16xf32, #tpu.memory_space<vmem>>, vector<2x16xf32>,
    %cst_79 = arith.constant dense<0.000000e+00> : vector<2x96xf32>
    %231 = tpu.matmul %192, %6, %cst_79 {dimension_numbers = #tpu.dot_dimension_numbers<[1], [0], [0], [1], [0, 0, 1, 1], [], []>} : vector<2x32xf32>, vector<32x96xf32>, vector<2x96xf32> -> vector<2x96xf32>
    %232 = vector.broadcast %7 : vector<1x96xf32> to vector<2x96xf32>
    %233 = arith.addf %231, %232 : vector<2x96xf32>
    %234 = vector.extract_strided_slice %5 {offsets = [6, 0], sizes = [2, 96], strides = [1, 1]} : vector<16x96xf32> to vector<2x96xf32>
    %235 = vector.extract_strided_slice %234 {offsets = [0, 0], sizes = [2, 32], strides = [1, 1]} : vector<2x96xf32> to vector<2x32xf32>
    %236 = vector.extract_strided_slice %233 {offsets = [0, 0], sizes = [2, 32], strides = [1, 1]} : vector<2x96xf32> to vector<2x32xf32>
    %237 = arith.addf %235, %236 : vector<2x32xf32>
    %cst_80 = arith.constant 5.000000e-01 : f32
    %238 = vector.broadcast %cst_80 : f32 to vector<2x32xf32>
    %239 = arith.mulf %238, %237 : vector<2x32xf32>
    %240 = math.tanh %239 : vector<2x32xf32>
    %cst_81 = arith.constant 1.000000e+00 : f32
    %241 = vector.broadcast %cst_81 : f32 to vector<2x32xf32>
    %242 = arith.addf %240, %241 : vector<2x32xf32>
    %cst_82 = arith.constant 5.000000e-01 : f32
    %243 = vector.broadcast %cst_82 : f32 to vector<2x32xf32>
    %244 = arith.mulf %243, %242 : vector<2x32xf32>
    %245 = vector.extract_strided_slice %234 {offsets = [0, 32], sizes = [2, 32], strides = [1, 1]} : vector<2x96xf32> to vector<2x32xf32>
    %246 = vector.extract_strided_slice %233 {offsets = [0, 32], sizes = [2, 32], strides = [1, 1]} : vector<2x96xf32> to vector<2x32xf32>
    %247 = arith.addf %245, %246 : vector<2x32xf32>
    %cst_83 = arith.constant 5.000000e-01 : f32
    %248 = vector.broadcast %cst_83 : f32 to vector<2x32xf32>
    %249 = arith.mulf %248, %247 : vector<2x32xf32>
    %250 = math.tanh %249 : vector<2x32xf32>
    %cst_84 = arith.constant 1.000000e+00 : f32
    %251 = vector.broadcast %cst_84 : f32 to vector<2x32xf32>
    %252 = arith.addf %250, %251 : vector<2x32xf32>
    %cst_85 = arith.constant 5.000000e-01 : f32
    %253 = vector.broadcast %cst_85 : f32 to vector<2x32xf32>
    %254 = arith.mulf %253, %252 : vector<2x32xf32>
    %255 = vector.extract_strided_slice %234 {offsets = [0, 64], sizes = [2, 32], strides = [1, 1]} : vector<2x96xf32> to vector<2x32xf32>
    %256 = vector.extract_strided_slice %233 {offsets = [0, 64], sizes = [2, 32], strides = [1, 1]} : vector<2x96xf32> to vector<2x32xf32>
    %257 = arith.mulf %244, %256 : vector<2x32xf32>
    %258 = arith.addf %255, %257 : vector<2x32xf32>
    %259 = math.tanh %258 : vector<2x32xf32>
    %cst_86 = arith.constant 1.000000e+00 : f32
    %260 = vector.broadcast %cst_86 : f32 to vector<2x32xf32>
    %261 = arith.subf %260, %254 : vector<2x32xf32>
    %262 = arith.mulf %261, %259 : vector<2x32xf32>
    %263 = arith.mulf %254, %192 : vector<2x32xf32>
    %264 = arith.addf %262, %263 : vector<2x32xf32>
    %cst_87 = arith.constant dense<0.000000e+00> : vector<2x48xf32>
    %265 = tpu.matmul %264, %8, %cst_87 {dimension_numbers = #tpu.dot_dimension_numbers<[1], [0], [0], [1], [0, 0, 1, 1], [], []>} : vector<2x32xf32>, vector<32x48xf32>, vector<2x48xf32> -> vector<2x48xf32>
    %266 = vector.broadcast %9 : vector<1x48xf32> to vector<2x48xf32>
    %267 = arith.addf %265, %266 : vector<2x48xf32>
    %cst_88 = arith.constant dense<0.000000e+00> : vector<2x48xf32>
    %268 = tpu.matmul %228, %10, %cst_88 {dimension_numbers = #tpu.dot_dimension_numbers<[1], [0], [0], [1], [0, 0, 1, 1], [], []>} : vector<2x16xf32>, vector<16x48xf32>, vector<2x48xf32> -> vector<2x48xf32>
    %269 = vector.broadcast %11 : vector<1x48xf32> to vector<2x48xf32>
    %270 = arith.addf %268, %269 : vector<2x48xf32>
    %271 = vector.extract_strided_slice %267 {offsets = [0, 0], sizes = [2, 16], strides = [1, 1]} : vector<2x48xf32> to vector<2x16xf32>
    %272 = vector.extract_strided_slice %270 {offsets = [0, 0], sizes = [2, 16], strides = [1, 1]} : vector<2x48xf32> to vector<2x16xf32>
    %273 = arith.addf %271, %272 : vector<2x16xf32>
    %cst_89 = arith.constant 5.000000e-01 : f32
    %274 = vector.broadcast %cst_89 : f32 to vector<2x16xf32>
    %275 = arith.mulf %274, %273 : vector<2x16xf32>
    %276 = math.tanh %275 : vector<2x16xf32>
    %cst_90 = arith.constant 1.000000e+00 : f32
    %277 = vector.broadcast %cst_90 : f32 to vector<2x16xf32>
    %278 = arith.addf %276, %277 : vector<2x16xf32>
    %cst_91 = arith.constant 5.000000e-01 : f32
    %279 = vector.broadcast %cst_91 : f32 to vector<2x16xf32>
    %280 = arith.mulf %279, %278 : vector<2x16xf32>
    %281 = vector.extract_strided_slice %267 {offsets = [0, 16], sizes = [2, 16], strides = [1, 1]} : vector<2x48xf32> to vector<2x16xf32>
    %282 = vector.extract_strided_slice %270 {offsets = [0, 16], sizes = [2, 16], strides = [1, 1]} : vector<2x48xf32> to vector<2x16xf32>
    %283 = arith.addf %281, %282 : vector<2x16xf32>
    %cst_92 = arith.constant 5.000000e-01 : f32
    %284 = vector.broadcast %cst_92 : f32 to vector<2x16xf32>
    %285 = arith.mulf %284, %283 : vector<2x16xf32>
    %286 = math.tanh %285 : vector<2x16xf32>
    %cst_93 = arith.constant 1.000000e+00 : f32
    %287 = vector.broadcast %cst_93 : f32 to vector<2x16xf32>
    %288 = arith.addf %286, %287 : vector<2x16xf32>
    %cst_94 = arith.constant 5.000000e-01 : f32
    %289 = vector.broadcast %cst_94 : f32 to vector<2x16xf32>
    %290 = arith.mulf %289, %288 : vector<2x16xf32>
    %291 = vector.extract_strided_slice %267 {offsets = [0, 32], sizes = [2, 16], strides = [1, 1]} : vector<2x48xf32> to vector<2x16xf32>
    %292 = vector.extract_strided_slice %270 {offsets = [0, 32], sizes = [2, 16], strides = [1, 1]} : vector<2x48xf32> to vector<2x16xf32>
    %293 = arith.mulf %280, %292 : vector<2x16xf32>
    %294 = arith.addf %291, %293 : vector<2x16xf32>
    %295 = math.tanh %294 : vector<2x16xf32>
    %cst_95 = arith.constant 1.000000e+00 : f32
    %296 = vector.broadcast %cst_95 : f32 to vector<2x16xf32>
    %297 = arith.subf %296, %290 : vector<2x16xf32>
    %298 = arith.mulf %297, %295 : vector<2x16xf32>
    %299 = arith.mulf %290, %228 : vector<2x16xf32>
    %300 = arith.addf %298, %299 : vector<2x16xf32>
    %cst_96 = arith.constant dense<0.000000e+00> : vector<2x16xf32>
    %301 = tpu.matmul %300, %12, %cst_96 {dimension_numbers = #tpu.dot_dimension_numbers<[1], [0], [0], [1], [0, 0, 1, 1], [], []>} : vector<2x16xf32>, vector<16x16xf32>, vector<2x16xf32> -> vector<2x16xf32>
    %c6 = arith.constant 6 : index
    %c0_97 = arith.constant 0 : index
    %302 = vector.load %arg32[%c6, %c0_97] : memref<16x16xf32, #tpu.memory_space<vmem>>, vector<2x16xf32>
    tpu.vector_store %arg32[%c6, %c0_97], %301 {strides = array<i32>} : memref<16x16xf32, #tpu.memory_space<vmem>>, vector<2x16xf32>,
    %cst_98 = arith.constant dense<0.000000e+00> : vector<2x96xf32>
    %303 = tpu.matmul %264, %6, %cst_98 {dimension_numbers = #tpu.dot_dimension_numbers<[1], [0], [0], [1], [0, 0, 1, 1], [], []>} : vector<2x32xf32>, vector<32x96xf32>, vector<2x96xf32> -> vector<2x96xf32>
    %304 = vector.broadcast %7 : vector<1x96xf32> to vector<2x96xf32>
    %305 = arith.addf %303, %304 : vector<2x96xf32>
    %306 = vector.extract_strided_slice %5 {offsets = [8, 0], sizes = [2, 96], strides = [1, 1]} : vector<16x96xf32> to vector<2x96xf32>
    %307 = vector.extract_strided_slice %306 {offsets = [0, 0], sizes = [2, 32], strides = [1, 1]} : vector<2x96xf32> to vector<2x32xf32>
    %308 = vector.extract_strided_slice %305 {offsets = [0, 0], sizes = [2, 32], strides = [1, 1]} : vector<2x96xf32> to vector<2x32xf32>
    %309 = arith.addf %307, %308 : vector<2x32xf32>
    %cst_99 = arith.constant 5.000000e-01 : f32
    %310 = vector.broadcast %cst_99 : f32 to vector<2x32xf32>
    %311 = arith.mulf %310, %309 : vector<2x32xf32>
    %312 = math.tanh %311 : vector<2x32xf32>
    %cst_100 = arith.constant 1.000000e+00 : f32
    %313 = vector.broadcast %cst_100 : f32 to vector<2x32xf32>
    %314 = arith.addf %312, %313 : vector<2x32xf32>
    %cst_101 = arith.constant 5.000000e-01 : f32
    %315 = vector.broadcast %cst_101 : f32 to vector<2x32xf32>
    %316 = arith.mulf %315, %314 : vector<2x32xf32>
    %317 = vector.extract_strided_slice %306 {offsets = [0, 32], sizes = [2, 32], strides = [1, 1]} : vector<2x96xf32> to vector<2x32xf32>
    %318 = vector.extract_strided_slice %305 {offsets = [0, 32], sizes = [2, 32], strides = [1, 1]} : vector<2x96xf32> to vector<2x32xf32>
    %319 = arith.addf %317, %318 : vector<2x32xf32>
    %cst_102 = arith.constant 5.000000e-01 : f32
    %320 = vector.broadcast %cst_102 : f32 to vector<2x32xf32>
    %321 = arith.mulf %320, %319 : vector<2x32xf32>
    %322 = math.tanh %321 : vector<2x32xf32>
    %cst_103 = arith.constant 1.000000e+00 : f32
    %323 = vector.broadcast %cst_103 : f32 to vector<2x32xf32>
    %324 = arith.addf %322, %323 : vector<2x32xf32>
    %cst_104 = arith.constant 5.000000e-01 : f32
    %325 = vector.broadcast %cst_104 : f32 to vector<2x32xf32>
    %326 = arith.mulf %325, %324 : vector<2x32xf32>
    %327 = vector.extract_strided_slice %306 {offsets = [0, 64], sizes = [2, 32], strides = [1, 1]} : vector<2x96xf32> to vector<2x32xf32>
    %328 = vector.extract_strided_slice %305 {offsets = [0, 64], sizes = [2, 32], strides = [1, 1]} : vector<2x96xf32> to vector<2x32xf32>
    %329 = arith.mulf %316, %328 : vector<2x32xf32>
    %330 = arith.addf %327, %329 : vector<2x32xf32>
    %331 = math.tanh %330 : vector<2x32xf32>
    %cst_105 = arith.constant 1.000000e+00 : f32
    %332 = vector.broadcast %cst_105 : f32 to vector<2x32xf32>
    %333 = arith.subf %332, %326 : vector<2x32xf32>
    %334 = arith.mulf %333, %331 : vector<2x32xf32>
    %335 = arith.mulf %326, %264 : vector<2x32xf32>
    %336 = arith.addf %334, %335 : vector<2x32xf32>
    %cst_106 = arith.constant dense<0.000000e+00> : vector<2x48xf32>
    %337 = tpu.matmul %336, %8, %cst_106 {dimension_numbers = #tpu.dot_dimension_numbers<[1], [0], [0], [1], [0, 0, 1, 1], [], []>} : vector<2x32xf32>, vector<32x48xf32>, vector<2x48xf32> -> vector<2x48xf32>
    %338 = vector.broadcast %9 : vector<1x48xf32> to vector<2x48xf32>
    %339 = arith.addf %337, %338 : vector<2x48xf32>
    %cst_107 = arith.constant dense<0.000000e+00> : vector<2x48xf32>
    %340 = tpu.matmul %300, %10, %cst_107 {dimension_numbers = #tpu.dot_dimension_numbers<[1], [0], [0], [1], [0, 0, 1, 1], [], []>} : vector<2x16xf32>, vector<16x48xf32>, vector<2x48xf32> -> vector<2x48xf32>
    %341 = vector.broadcast %11 : vector<1x48xf32> to vector<2x48xf32>
    %342 = arith.addf %340, %341 : vector<2x48xf32>
    %343 = vector.extract_strided_slice %339 {offsets = [0, 0], sizes = [2, 16], strides = [1, 1]} : vector<2x48xf32> to vector<2x16xf32>
    %344 = vector.extract_strided_slice %342 {offsets = [0, 0], sizes = [2, 16], strides = [1, 1]} : vector<2x48xf32> to vector<2x16xf32>
    %345 = arith.addf %343, %344 : vector<2x16xf32>
    %cst_108 = arith.constant 5.000000e-01 : f32
    %346 = vector.broadcast %cst_108 : f32 to vector<2x16xf32>
    %347 = arith.mulf %346, %345 : vector<2x16xf32>
    %348 = math.tanh %347 : vector<2x16xf32>
    %cst_109 = arith.constant 1.000000e+00 : f32
    %349 = vector.broadcast %cst_109 : f32 to vector<2x16xf32>
    %350 = arith.addf %348, %349 : vector<2x16xf32>
    %cst_110 = arith.constant 5.000000e-01 : f32
    %351 = vector.broadcast %cst_110 : f32 to vector<2x16xf32>
    %352 = arith.mulf %351, %350 : vector<2x16xf32>
    %353 = vector.extract_strided_slice %339 {offsets = [0, 16], sizes = [2, 16], strides = [1, 1]} : vector<2x48xf32> to vector<2x16xf32>
    %354 = vector.extract_strided_slice %342 {offsets = [0, 16], sizes = [2, 16], strides = [1, 1]} : vector<2x48xf32> to vector<2x16xf32>
    %355 = arith.addf %353, %354 : vector<2x16xf32>
    %cst_111 = arith.constant 5.000000e-01 : f32
    %356 = vector.broadcast %cst_111 : f32 to vector<2x16xf32>
    %357 = arith.mulf %356, %355 : vector<2x16xf32>
    %358 = math.tanh %357 : vector<2x16xf32>
    %cst_112 = arith.constant 1.000000e+00 : f32
    %359 = vector.broadcast %cst_112 : f32 to vector<2x16xf32>
    %360 = arith.addf %358, %359 : vector<2x16xf32>
    %cst_113 = arith.constant 5.000000e-01 : f32
    %361 = vector.broadcast %cst_113 : f32 to vector<2x16xf32>
    %362 = arith.mulf %361, %360 : vector<2x16xf32>
    %363 = vector.extract_strided_slice %339 {offsets = [0, 32], sizes = [2, 16], strides = [1, 1]} : vector<2x48xf32> to vector<2x16xf32>
    %364 = vector.extract_strided_slice %342 {offsets = [0, 32], sizes = [2, 16], strides = [1, 1]} : vector<2x48xf32> to vector<2x16xf32>
    %365 = arith.mulf %352, %364 : vector<2x16xf32>
    %366 = arith.addf %363, %365 : vector<2x16xf32>
    %367 = math.tanh %366 : vector<2x16xf32>
    %cst_114 = arith.constant 1.000000e+00 : f32
    %368 = vector.broadcast %cst_114 : f32 to vector<2x16xf32>
    %369 = arith.subf %368, %362 : vector<2x16xf32>
    %370 = arith.mulf %369, %367 : vector<2x16xf32>
    %371 = arith.mulf %362, %300 : vector<2x16xf32>
    %372 = arith.addf %370, %371 : vector<2x16xf32>
    %cst_115 = arith.constant dense<0.000000e+00> : vector<2x16xf32>
    %373 = tpu.matmul %372, %12, %cst_115 {dimension_numbers = #tpu.dot_dimension_numbers<[1], [0], [0], [1], [0, 0, 1, 1], [], []>} : vector<2x16xf32>, vector<16x16xf32>, vector<2x16xf32> -> vector<2x16xf32>
    %c8 = arith.constant 8 : index
    %c0_116 = arith.constant 0 : index
    %374 = vector.load %arg32[%c8, %c0_116] : memref<16x16xf32, #tpu.memory_space<vmem>>, vector<2x16xf32>
    tpu.vector_store %arg32[%c8, %c0_116], %373 {strides = array<i32>} : memref<16x16xf32, #tpu.memory_space<vmem>>, vector<2x16xf32>,
    %cst_117 = arith.constant dense<0.000000e+00> : vector<2x96xf32>
    %375 = tpu.matmul %336, %6, %cst_117 {dimension_numbers = #tpu.dot_dimension_numbers<[1], [0], [0], [1], [0, 0, 1, 1], [], []>} : vector<2x32xf32>, vector<32x96xf32>, vector<2x96xf32> -> vector<2x96xf32>
    %376 = vector.broadcast %7 : vector<1x96xf32> to vector<2x96xf32>
    %377 = arith.addf %375, %376 : vector<2x96xf32>
    %378 = vector.extract_strided_slice %5 {offsets = [10, 0], sizes = [2, 96], strides = [1, 1]} : vector<16x96xf32> to vector<2x96xf32>
    %379 = vector.extract_strided_slice %378 {offsets = [0, 0], sizes = [2, 32], strides = [1, 1]} : vector<2x96xf32> to vector<2x32xf32>
    %380 = vector.extract_strided_slice %377 {offsets = [0, 0], sizes = [2, 32], strides = [1, 1]} : vector<2x96xf32> to vector<2x32xf32>
    %381 = arith.addf %379, %380 : vector<2x32xf32>
    %cst_118 = arith.constant 5.000000e-01 : f32
    %382 = vector.broadcast %cst_118 : f32 to vector<2x32xf32>
    %383 = arith.mulf %382, %381 : vector<2x32xf32>
    %384 = math.tanh %383 : vector<2x32xf32>
    %cst_119 = arith.constant 1.000000e+00 : f32
    %385 = vector.broadcast %cst_119 : f32 to vector<2x32xf32>
    %386 = arith.addf %384, %385 : vector<2x32xf32>
    %cst_120 = arith.constant 5.000000e-01 : f32
    %387 = vector.broadcast %cst_120 : f32 to vector<2x32xf32>
    %388 = arith.mulf %387, %386 : vector<2x32xf32>
    %389 = vector.extract_strided_slice %378 {offsets = [0, 32], sizes = [2, 32], strides = [1, 1]} : vector<2x96xf32> to vector<2x32xf32>
    %390 = vector.extract_strided_slice %377 {offsets = [0, 32], sizes = [2, 32], strides = [1, 1]} : vector<2x96xf32> to vector<2x32xf32>
    %391 = arith.addf %389, %390 : vector<2x32xf32>
    %cst_121 = arith.constant 5.000000e-01 : f32
    %392 = vector.broadcast %cst_121 : f32 to vector<2x32xf32>
    %393 = arith.mulf %392, %391 : vector<2x32xf32>
    %394 = math.tanh %393 : vector<2x32xf32>
    %cst_122 = arith.constant 1.000000e+00 : f32
    %395 = vector.broadcast %cst_122 : f32 to vector<2x32xf32>
    %396 = arith.addf %394, %395 : vector<2x32xf32>
    %cst_123 = arith.constant 5.000000e-01 : f32
    %397 = vector.broadcast %cst_123 : f32 to vector<2x32xf32>
    %398 = arith.mulf %397, %396 : vector<2x32xf32>
    %399 = vector.extract_strided_slice %378 {offsets = [0, 64], sizes = [2, 32], strides = [1, 1]} : vector<2x96xf32> to vector<2x32xf32>
    %400 = vector.extract_strided_slice %377 {offsets = [0, 64], sizes = [2, 32], strides = [1, 1]} : vector<2x96xf32> to vector<2x32xf32>
    %401 = arith.mulf %388, %400 : vector<2x32xf32>
    %402 = arith.addf %399, %401 : vector<2x32xf32>
    %403 = math.tanh %402 : vector<2x32xf32>
    %cst_124 = arith.constant 1.000000e+00 : f32
    %404 = vector.broadcast %cst_124 : f32 to vector<2x32xf32>
    %405 = arith.subf %404, %398 : vector<2x32xf32>
    %406 = arith.mulf %405, %403 : vector<2x32xf32>
    %407 = arith.mulf %398, %336 : vector<2x32xf32>
    %408 = arith.addf %406, %407 : vector<2x32xf32>
    %cst_125 = arith.constant dense<0.000000e+00> : vector<2x48xf32>
    %409 = tpu.matmul %408, %8, %cst_125 {dimension_numbers = #tpu.dot_dimension_numbers<[1], [0], [0], [1], [0, 0, 1, 1], [], []>} : vector<2x32xf32>, vector<32x48xf32>, vector<2x48xf32> -> vector<2x48xf32>
    %410 = vector.broadcast %9 : vector<1x48xf32> to vector<2x48xf32>
    %411 = arith.addf %409, %410 : vector<2x48xf32>
    %cst_126 = arith.constant dense<0.000000e+00> : vector<2x48xf32>
    %412 = tpu.matmul %372, %10, %cst_126 {dimension_numbers = #tpu.dot_dimension_numbers<[1], [0], [0], [1], [0, 0, 1, 1], [], []>} : vector<2x16xf32>, vector<16x48xf32>, vector<2x48xf32> -> vector<2x48xf32>
    %413 = vector.broadcast %11 : vector<1x48xf32> to vector<2x48xf32>
    %414 = arith.addf %412, %413 : vector<2x48xf32>
    %415 = vector.extract_strided_slice %411 {offsets = [0, 0], sizes = [2, 16], strides = [1, 1]} : vector<2x48xf32> to vector<2x16xf32>
    %416 = vector.extract_strided_slice %414 {offsets = [0, 0], sizes = [2, 16], strides = [1, 1]} : vector<2x48xf32> to vector<2x16xf32>
    %417 = arith.addf %415, %416 : vector<2x16xf32>
    %cst_127 = arith.constant 5.000000e-01 : f32
    %418 = vector.broadcast %cst_127 : f32 to vector<2x16xf32>
    %419 = arith.mulf %418, %417 : vector<2x16xf32>
    %420 = math.tanh %419 : vector<2x16xf32>
    %cst_128 = arith.constant 1.000000e+00 : f32
    %421 = vector.broadcast %cst_128 : f32 to vector<2x16xf32>
    %422 = arith.addf %420, %421 : vector<2x16xf32>
    %cst_129 = arith.constant 5.000000e-01 : f32
    %423 = vector.broadcast %cst_129 : f32 to vector<2x16xf32>
    %424 = arith.mulf %423, %422 : vector<2x16xf32>
    %425 = vector.extract_strided_slice %411 {offsets = [0, 16], sizes = [2, 16], strides = [1, 1]} : vector<2x48xf32> to vector<2x16xf32>
    %426 = vector.extract_strided_slice %414 {offsets = [0, 16], sizes = [2, 16], strides = [1, 1]} : vector<2x48xf32> to vector<2x16xf32>
    %427 = arith.addf %425, %426 : vector<2x16xf32>
    %cst_130 = arith.constant 5.000000e-01 : f32
    %428 = vector.broadcast %cst_130 : f32 to vector<2x16xf32>
    %429 = arith.mulf %428, %427 : vector<2x16xf32>
    %430 = math.tanh %429 : vector<2x16xf32>
    %cst_131 = arith.constant 1.000000e+00 : f32
    %431 = vector.broadcast %cst_131 : f32 to vector<2x16xf32>
    %432 = arith.addf %430, %431 : vector<2x16xf32>
    %cst_132 = arith.constant 5.000000e-01 : f32
    %433 = vector.broadcast %cst_132 : f32 to vector<2x16xf32>
    %434 = arith.mulf %433, %432 : vector<2x16xf32>
    %435 = vector.extract_strided_slice %411 {offsets = [0, 32], sizes = [2, 16], strides = [1, 1]} : vector<2x48xf32> to vector<2x16xf32>
    %436 = vector.extract_strided_slice %414 {offsets = [0, 32], sizes = [2, 16], strides = [1, 1]} : vector<2x48xf32> to vector<2x16xf32>
    %437 = arith.mulf %424, %436 : vector<2x16xf32>
    %438 = arith.addf %435, %437 : vector<2x16xf32>
    %439 = math.tanh %438 : vector<2x16xf32>
    %cst_133 = arith.constant 1.000000e+00 : f32
    %440 = vector.broadcast %cst_133 : f32 to vector<2x16xf32>
    %441 = arith.subf %440, %434 : vector<2x16xf32>
    %442 = arith.mulf %441, %439 : vector<2x16xf32>
    %443 = arith.mulf %434, %372 : vector<2x16xf32>
    %444 = arith.addf %442, %443 : vector<2x16xf32>
    %cst_134 = arith.constant dense<0.000000e+00> : vector<2x16xf32>
    %445 = tpu.matmul %444, %12, %cst_134 {dimension_numbers = #tpu.dot_dimension_numbers<[1], [0], [0], [1], [0, 0, 1, 1], [], []>} : vector<2x16xf32>, vector<16x16xf32>, vector<2x16xf32> -> vector<2x16xf32>
    %c10 = arith.constant 10 : index
    %c0_135 = arith.constant 0 : index
    %446 = vector.load %arg32[%c10, %c0_135] : memref<16x16xf32, #tpu.memory_space<vmem>>, vector<2x16xf32>
    tpu.vector_store %arg32[%c10, %c0_135], %445 {strides = array<i32>} : memref<16x16xf32, #tpu.memory_space<vmem>>, vector<2x16xf32>,
    %cst_136 = arith.constant dense<0.000000e+00> : vector<2x96xf32>
    %447 = tpu.matmul %408, %6, %cst_136 {dimension_numbers = #tpu.dot_dimension_numbers<[1], [0], [0], [1], [0, 0, 1, 1], [], []>} : vector<2x32xf32>, vector<32x96xf32>, vector<2x96xf32> -> vector<2x96xf32>
    %448 = vector.broadcast %7 : vector<1x96xf32> to vector<2x96xf32>
    %449 = arith.addf %447, %448 : vector<2x96xf32>
    %450 = vector.extract_strided_slice %5 {offsets = [12, 0], sizes = [2, 96], strides = [1, 1]} : vector<16x96xf32> to vector<2x96xf32>
    %451 = vector.extract_strided_slice %450 {offsets = [0, 0], sizes = [2, 32], strides = [1, 1]} : vector<2x96xf32> to vector<2x32xf32>
    %452 = vector.extract_strided_slice %449 {offsets = [0, 0], sizes = [2, 32], strides = [1, 1]} : vector<2x96xf32> to vector<2x32xf32>
    %453 = arith.addf %451, %452 : vector<2x32xf32>
    %cst_137 = arith.constant 5.000000e-01 : f32
    %454 = vector.broadcast %cst_137 : f32 to vector<2x32xf32>
    %455 = arith.mulf %454, %453 : vector<2x32xf32>
    %456 = math.tanh %455 : vector<2x32xf32>
    %cst_138 = arith.constant 1.000000e+00 : f32
    %457 = vector.broadcast %cst_138 : f32 to vector<2x32xf32>
    %458 = arith.addf %456, %457 : vector<2x32xf32>
    %cst_139 = arith.constant 5.000000e-01 : f32
    %459 = vector.broadcast %cst_139 : f32 to vector<2x32xf32>
    %460 = arith.mulf %459, %458 : vector<2x32xf32>
    %461 = vector.extract_strided_slice %450 {offsets = [0, 32], sizes = [2, 32], strides = [1, 1]} : vector<2x96xf32> to vector<2x32xf32>
    %462 = vector.extract_strided_slice %449 {offsets = [0, 32], sizes = [2, 32], strides = [1, 1]} : vector<2x96xf32> to vector<2x32xf32>
    %463 = arith.addf %461, %462 : vector<2x32xf32>
    %cst_140 = arith.constant 5.000000e-01 : f32
    %464 = vector.broadcast %cst_140 : f32 to vector<2x32xf32>
    %465 = arith.mulf %464, %463 : vector<2x32xf32>
    %466 = math.tanh %465 : vector<2x32xf32>
    %cst_141 = arith.constant 1.000000e+00 : f32
    %467 = vector.broadcast %cst_141 : f32 to vector<2x32xf32>
    %468 = arith.addf %466, %467 : vector<2x32xf32>
    %cst_142 = arith.constant 5.000000e-01 : f32
    %469 = vector.broadcast %cst_142 : f32 to vector<2x32xf32>
    %470 = arith.mulf %469, %468 : vector<2x32xf32>
    %471 = vector.extract_strided_slice %450 {offsets = [0, 64], sizes = [2, 32], strides = [1, 1]} : vector<2x96xf32> to vector<2x32xf32>
    %472 = vector.extract_strided_slice %449 {offsets = [0, 64], sizes = [2, 32], strides = [1, 1]} : vector<2x96xf32> to vector<2x32xf32>
    %473 = arith.mulf %460, %472 : vector<2x32xf32>
    %474 = arith.addf %471, %473 : vector<2x32xf32>
    %475 = math.tanh %474 : vector<2x32xf32>
    %cst_143 = arith.constant 1.000000e+00 : f32
    %476 = vector.broadcast %cst_143 : f32 to vector<2x32xf32>
    %477 = arith.subf %476, %470 : vector<2x32xf32>
    %478 = arith.mulf %477, %475 : vector<2x32xf32>
    %479 = arith.mulf %470, %408 : vector<2x32xf32>
    %480 = arith.addf %478, %479 : vector<2x32xf32>
    %cst_144 = arith.constant dense<0.000000e+00> : vector<2x48xf32>
    %481 = tpu.matmul %480, %8, %cst_144 {dimension_numbers = #tpu.dot_dimension_numbers<[1], [0], [0], [1], [0, 0, 1, 1], [], []>} : vector<2x32xf32>, vector<32x48xf32>, vector<2x48xf32> -> vector<2x48xf32>
    %482 = vector.broadcast %9 : vector<1x48xf32> to vector<2x48xf32>
    %483 = arith.addf %481, %482 : vector<2x48xf32>
    %cst_145 = arith.constant dense<0.000000e+00> : vector<2x48xf32>
    %484 = tpu.matmul %444, %10, %cst_145 {dimension_numbers = #tpu.dot_dimension_numbers<[1], [0], [0], [1], [0, 0, 1, 1], [], []>} : vector<2x16xf32>, vector<16x48xf32>, vector<2x48xf32> -> vector<2x48xf32>
    %485 = vector.broadcast %11 : vector<1x48xf32> to vector<2x48xf32>
    %486 = arith.addf %484, %485 : vector<2x48xf32>
    %487 = vector.extract_strided_slice %483 {offsets = [0, 0], sizes = [2, 16], strides = [1, 1]} : vector<2x48xf32> to vector<2x16xf32>
    %488 = vector.extract_strided_slice %486 {offsets = [0, 0], sizes = [2, 16], strides = [1, 1]} : vector<2x48xf32> to vector<2x16xf32>
    %489 = arith.addf %487, %488 : vector<2x16xf32>
    %cst_146 = arith.constant 5.000000e-01 : f32
    %490 = vector.broadcast %cst_146 : f32 to vector<2x16xf32>
    %491 = arith.mulf %490, %489 : vector<2x16xf32>
    %492 = math.tanh %491 : vector<2x16xf32>
    %cst_147 = arith.constant 1.000000e+00 : f32
    %493 = vector.broadcast %cst_147 : f32 to vector<2x16xf32>
    %494 = arith.addf %492, %493 : vector<2x16xf32>
    %cst_148 = arith.constant 5.000000e-01 : f32
    %495 = vector.broadcast %cst_148 : f32 to vector<2x16xf32>
    %496 = arith.mulf %495, %494 : vector<2x16xf32>
    %497 = vector.extract_strided_slice %483 {offsets = [0, 16], sizes = [2, 16], strides = [1, 1]} : vector<2x48xf32> to vector<2x16xf32>
    %498 = vector.extract_strided_slice %486 {offsets = [0, 16], sizes = [2, 16], strides = [1, 1]} : vector<2x48xf32> to vector<2x16xf32>
    %499 = arith.addf %497, %498 : vector<2x16xf32>
    %cst_149 = arith.constant 5.000000e-01 : f32
    %500 = vector.broadcast %cst_149 : f32 to vector<2x16xf32>
    %501 = arith.mulf %500, %499 : vector<2x16xf32>
    %502 = math.tanh %501 : vector<2x16xf32>
    %cst_150 = arith.constant 1.000000e+00 : f32
    %503 = vector.broadcast %cst_150 : f32 to vector<2x16xf32>
    %504 = arith.addf %502, %503 : vector<2x16xf32>
    %cst_151 = arith.constant 5.000000e-01 : f32
    %505 = vector.broadcast %cst_151 : f32 to vector<2x16xf32>
    %506 = arith.mulf %505, %504 : vector<2x16xf32>
    %507 = vector.extract_strided_slice %483 {offsets = [0, 32], sizes = [2, 16], strides = [1, 1]} : vector<2x48xf32> to vector<2x16xf32>
    %508 = vector.extract_strided_slice %486 {offsets = [0, 32], sizes = [2, 16], strides = [1, 1]} : vector<2x48xf32> to vector<2x16xf32>
    %509 = arith.mulf %496, %508 : vector<2x16xf32>
    %510 = arith.addf %507, %509 : vector<2x16xf32>
    %511 = math.tanh %510 : vector<2x16xf32>
    %cst_152 = arith.constant 1.000000e+00 : f32
    %512 = vector.broadcast %cst_152 : f32 to vector<2x16xf32>
    %513 = arith.subf %512, %506 : vector<2x16xf32>
    %514 = arith.mulf %513, %511 : vector<2x16xf32>
    %515 = arith.mulf %506, %444 : vector<2x16xf32>
    %516 = arith.addf %514, %515 : vector<2x16xf32>
    %cst_153 = arith.constant dense<0.000000e+00> : vector<2x16xf32>
    %517 = tpu.matmul %516, %12, %cst_153 {dimension_numbers = #tpu.dot_dimension_numbers<[1], [0], [0], [1], [0, 0, 1, 1], [], []>} : vector<2x16xf32>, vector<16x16xf32>, vector<2x16xf32> -> vector<2x16xf32>
    %c12 = arith.constant 12 : index
    %c0_154 = arith.constant 0 : index
    %518 = vector.load %arg32[%c12, %c0_154] : memref<16x16xf32, #tpu.memory_space<vmem>>, vector<2x16xf32>
    tpu.vector_store %arg32[%c12, %c0_154], %517 {strides = array<i32>} : memref<16x16xf32, #tpu.memory_space<vmem>>, vector<2x16xf32>,
    %cst_155 = arith.constant dense<0.000000e+00> : vector<2x96xf32>
    %519 = tpu.matmul %480, %6, %cst_155 {dimension_numbers = #tpu.dot_dimension_numbers<[1], [0], [0], [1], [0, 0, 1, 1], [], []>} : vector<2x32xf32>, vector<32x96xf32>, vector<2x96xf32> -> vector<2x96xf32>
    %520 = vector.broadcast %7 : vector<1x96xf32> to vector<2x96xf32>
    %521 = arith.addf %519, %520 : vector<2x96xf32>
    %522 = vector.extract_strided_slice %5 {offsets = [14, 0], sizes = [2, 96], strides = [1, 1]} : vector<16x96xf32> to vector<2x96xf32>
    %523 = vector.extract_strided_slice %522 {offsets = [0, 0], sizes = [2, 32], strides = [1, 1]} : vector<2x96xf32> to vector<2x32xf32>
    %524 = vector.extract_strided_slice %521 {offsets = [0, 0], sizes = [2, 32], strides = [1, 1]} : vector<2x96xf32> to vector<2x32xf32>
    %525 = arith.addf %523, %524 : vector<2x32xf32>
    %cst_156 = arith.constant 5.000000e-01 : f32
    %526 = vector.broadcast %cst_156 : f32 to vector<2x32xf32>
    %527 = arith.mulf %526, %525 : vector<2x32xf32>
    %528 = math.tanh %527 : vector<2x32xf32>
    %cst_157 = arith.constant 1.000000e+00 : f32
    %529 = vector.broadcast %cst_157 : f32 to vector<2x32xf32>
    %530 = arith.addf %528, %529 : vector<2x32xf32>
    %cst_158 = arith.constant 5.000000e-01 : f32
    %531 = vector.broadcast %cst_158 : f32 to vector<2x32xf32>
    %532 = arith.mulf %531, %530 : vector<2x32xf32>
    %533 = vector.extract_strided_slice %522 {offsets = [0, 32], sizes = [2, 32], strides = [1, 1]} : vector<2x96xf32> to vector<2x32xf32>
    %534 = vector.extract_strided_slice %521 {offsets = [0, 32], sizes = [2, 32], strides = [1, 1]} : vector<2x96xf32> to vector<2x32xf32>
    %535 = arith.addf %533, %534 : vector<2x32xf32>
    %cst_159 = arith.constant 5.000000e-01 : f32
    %536 = vector.broadcast %cst_159 : f32 to vector<2x32xf32>
    %537 = arith.mulf %536, %535 : vector<2x32xf32>
    %538 = math.tanh %537 : vector<2x32xf32>
    %cst_160 = arith.constant 1.000000e+00 : f32
    %539 = vector.broadcast %cst_160 : f32 to vector<2x32xf32>
    %540 = arith.addf %538, %539 : vector<2x32xf32>
    %cst_161 = arith.constant 5.000000e-01 : f32
    %541 = vector.broadcast %cst_161 : f32 to vector<2x32xf32>
    %542 = arith.mulf %541, %540 : vector<2x32xf32>
    %543 = vector.extract_strided_slice %522 {offsets = [0, 64], sizes = [2, 32], strides = [1, 1]} : vector<2x96xf32> to vector<2x32xf32>
    %544 = vector.extract_strided_slice %521 {offsets = [0, 64], sizes = [2, 32], strides = [1, 1]} : vector<2x96xf32> to vector<2x32xf32>
    %545 = arith.mulf %532, %544 : vector<2x32xf32>
    %546 = arith.addf %543, %545 : vector<2x32xf32>
    %547 = math.tanh %546 : vector<2x32xf32>
    %cst_162 = arith.constant 1.000000e+00 : f32
    %548 = vector.broadcast %cst_162 : f32 to vector<2x32xf32>
    %549 = arith.subf %548, %542 : vector<2x32xf32>
    %550 = arith.mulf %549, %547 : vector<2x32xf32>
    %551 = arith.mulf %542, %480 : vector<2x32xf32>
    %552 = arith.addf %550, %551 : vector<2x32xf32>
    %cst_163 = arith.constant dense<0.000000e+00> : vector<2x48xf32>
    %553 = tpu.matmul %552, %8, %cst_163 {dimension_numbers = #tpu.dot_dimension_numbers<[1], [0], [0], [1], [0, 0, 1, 1], [], []>} : vector<2x32xf32>, vector<32x48xf32>, vector<2x48xf32> -> vector<2x48xf32>
    %554 = vector.broadcast %9 : vector<1x48xf32> to vector<2x48xf32>
    %555 = arith.addf %553, %554 : vector<2x48xf32>
    %cst_164 = arith.constant dense<0.000000e+00> : vector<2x48xf32>
    %556 = tpu.matmul %516, %10, %cst_164 {dimension_numbers = #tpu.dot_dimension_numbers<[1], [0], [0], [1], [0, 0, 1, 1], [], []>} : vector<2x16xf32>, vector<16x48xf32>, vector<2x48xf32> -> vector<2x48xf32>
    %557 = vector.broadcast %11 : vector<1x48xf32> to vector<2x48xf32>
    %558 = arith.addf %556, %557 : vector<2x48xf32>
    %559 = vector.extract_strided_slice %555 {offsets = [0, 0], sizes = [2, 16], strides = [1, 1]} : vector<2x48xf32> to vector<2x16xf32>
    %560 = vector.extract_strided_slice %558 {offsets = [0, 0], sizes = [2, 16], strides = [1, 1]} : vector<2x48xf32> to vector<2x16xf32>
    %561 = arith.addf %559, %560 : vector<2x16xf32>
    %cst_165 = arith.constant 5.000000e-01 : f32
    %562 = vector.broadcast %cst_165 : f32 to vector<2x16xf32>
    %563 = arith.mulf %562, %561 : vector<2x16xf32>
    %564 = math.tanh %563 : vector<2x16xf32>
    %cst_166 = arith.constant 1.000000e+00 : f32
    %565 = vector.broadcast %cst_166 : f32 to vector<2x16xf32>
    %566 = arith.addf %564, %565 : vector<2x16xf32>
    %cst_167 = arith.constant 5.000000e-01 : f32
    %567 = vector.broadcast %cst_167 : f32 to vector<2x16xf32>
    %568 = arith.mulf %567, %566 : vector<2x16xf32>
    %569 = vector.extract_strided_slice %555 {offsets = [0, 16], sizes = [2, 16], strides = [1, 1]} : vector<2x48xf32> to vector<2x16xf32>
    %570 = vector.extract_strided_slice %558 {offsets = [0, 16], sizes = [2, 16], strides = [1, 1]} : vector<2x48xf32> to vector<2x16xf32>
    %571 = arith.addf %569, %570 : vector<2x16xf32>
    %cst_168 = arith.constant 5.000000e-01 : f32
    %572 = vector.broadcast %cst_168 : f32 to vector<2x16xf32>
    %573 = arith.mulf %572, %571 : vector<2x16xf32>
    %574 = math.tanh %573 : vector<2x16xf32>
    %cst_169 = arith.constant 1.000000e+00 : f32
    %575 = vector.broadcast %cst_169 : f32 to vector<2x16xf32>
    %576 = arith.addf %574, %575 : vector<2x16xf32>
    %cst_170 = arith.constant 5.000000e-01 : f32
    %577 = vector.broadcast %cst_170 : f32 to vector<2x16xf32>
    %578 = arith.mulf %577, %576 : vector<2x16xf32>
    %579 = vector.extract_strided_slice %555 {offsets = [0, 32], sizes = [2, 16], strides = [1, 1]} : vector<2x48xf32> to vector<2x16xf32>
    %580 = vector.extract_strided_slice %558 {offsets = [0, 32], sizes = [2, 16], strides = [1, 1]} : vector<2x48xf32> to vector<2x16xf32>
    %581 = arith.mulf %568, %580 : vector<2x16xf32>
    %582 = arith.addf %579, %581 : vector<2x16xf32>
    %583 = math.tanh %582 : vector<2x16xf32>
    %cst_171 = arith.constant 1.000000e+00 : f32
    %584 = vector.broadcast %cst_171 : f32 to vector<2x16xf32>
    %585 = arith.subf %584, %578 : vector<2x16xf32>
    %586 = arith.mulf %585, %583 : vector<2x16xf32>
    %587 = arith.mulf %578, %516 : vector<2x16xf32>
    %588 = arith.addf %586, %587 : vector<2x16xf32>
    %cst_172 = arith.constant dense<0.000000e+00> : vector<2x16xf32>
    %589 = tpu.matmul %588, %12, %cst_172 {dimension_numbers = #tpu.dot_dimension_numbers<[1], [0], [0], [1], [0, 0, 1, 1], [], []>} : vector<2x16xf32>, vector<16x16xf32>, vector<2x16xf32> -> vector<2x16xf32>
    %c14 = arith.constant 14 : index
    %c0_173 = arith.constant 0 : index
    %590 = vector.load %arg32[%c14, %c0_173] : memref<16x16xf32, #tpu.memory_space<vmem>>, vector<2x16xf32>
    tpu.vector_store %arg32[%c14, %c0_173], %589 {strides = array<i32>} : memref<16x16xf32, #tpu.memory_space<vmem>>, vector<2x16xf32>,
    %c0_174 = arith.constant 0 : index
    %c0_175 = arith.constant 0 : index
    %591 = vector.load %arg32[%c0_174, %c0_175] : memref<16x16xf32, #tpu.memory_space<vmem>>, vector<16x16xf32>
    %c0_176 = arith.constant 0 : index
    %c0_177 = arith.constant 0 : index
    %592 = vector.load %arg2[%c0_176, %c0_177] : memref<16x16xf32, #tpu.memory_space<vmem>>, vector<16x16xf32>
    %c0_178 = arith.constant 0 : index
    %c0_179 = arith.constant 0 : index
    %593 = vector.load %arg15[%c0_178, %c0_179] : memref<16x16xf32, #tpu.memory_space<vmem>>, vector<16x16xf32>
    %cst_180 = arith.constant dense<0.000000e+00> : vector<16x16xf32>
    %594 = tpu.matmul %592, %593, %cst_180 {dimension_numbers = #tpu.dot_dimension_numbers<[1], [0], [0], [1], [0, 0, 1, 1], [], []>} : vector<16x16xf32>, vector<16x16xf32>, vector<16x16xf32> -> vector<16x16xf32>
    %c0_181 = arith.constant 0 : index
    %c0_182 = arith.constant 0 : index
    %595 = vector.load %arg16[%c0_181, %c0_182] : memref<1x16xf32, #tpu.memory_space<vmem>>, vector<1x16xf32>
    %596 = vector.broadcast %595 : vector<1x16xf32> to vector<16x16xf32>
    %597 = arith.addf %594, %596 : vector<16x16xf32>
    %cst_183 = arith.constant 0.000000e+00 : f32
    %598 = vector.broadcast %cst_183 : f32 to vector<16x16xf32>
    %599 = arith.maximumf %597, %598 : vector<16x16xf32>
    %600 = arith.addf %599, %591 : vector<16x16xf32>
    %c0_184 = arith.constant 0 : index
    %c0_185 = arith.constant 0 : index
    %601 = vector.load %arg17[%c0_184, %c0_185] : memref<16x16xf32, #tpu.memory_space<vmem>>, vector<16x16xf32>
    %cst_186 = arith.constant dense<0.000000e+00> : vector<16x16xf32>
    %602 = tpu.matmul %600, %601, %cst_186 {dimension_numbers = #tpu.dot_dimension_numbers<[1], [0], [0], [1], [0, 0, 1, 1], [], []>} : vector<16x16xf32>, vector<16x16xf32>, vector<16x16xf32> -> vector<16x16xf32>
    %c0_187 = arith.constant 0 : index
    %c0_188 = arith.constant 0 : index
    %603 = vector.load %arg18[%c0_187, %c0_188] : memref<1x16xf32, #tpu.memory_space<vmem>>, vector<1x16xf32>
    %604 = vector.broadcast %603 : vector<1x16xf32> to vector<16x16xf32>
    %605 = arith.addf %602, %604 : vector<16x16xf32>
    %cst_189 = arith.constant 0.000000e+00 : f32
    %606 = vector.broadcast %cst_189 : f32 to vector<16x16xf32>
    %607 = arith.maximumf %605, %606 : vector<16x16xf32>
    %c0_190 = arith.constant 0 : index
    %c0_191 = arith.constant 0 : index
    %608 = vector.load %arg3[%c0_190, %c0_191] : memref<16x16xf32, #tpu.memory_space<vmem>>, vector<16x16xf32>
    %c0_192 = arith.constant 0 : index
    %c0_193 = arith.constant 0 : index
    %609 = vector.load %arg19[%c0_192, %c0_193] : memref<16x16xf32, #tpu.memory_space<vmem>>, vector<16x16xf32>
    %cst_194 = arith.constant dense<0.000000e+00> : vector<16x16xf32>
    %610 = tpu.matmul %608, %609, %cst_194 {dimension_numbers = #tpu.dot_dimension_numbers<[1], [0], [0], [1], [0, 0, 1, 1], [], []>} : vector<16x16xf32>, vector<16x16xf32>, vector<16x16xf32> -> vector<16x16xf32>
    %c0_195 = arith.constant 0 : index
    %c0_196 = arith.constant 0 : index
    %611 = vector.load %arg20[%c0_195, %c0_196] : memref<1x16xf32, #tpu.memory_space<vmem>>, vector<1x16xf32>
    %612 = vector.broadcast %611 : vector<1x16xf32> to vector<16x16xf32>
    %613 = arith.addf %610, %612 : vector<16x16xf32>
    %cst_197 = arith.constant 0.000000e+00 : f32
    %614 = vector.broadcast %cst_197 : f32 to vector<16x16xf32>
    %615 = arith.maximumf %613, %614 : vector<16x16xf32>
    %616 = arith.addf %615, %607 : vector<16x16xf32>
    %c0_198 = arith.constant 0 : index
    %c0_199 = arith.constant 0 : index
    %617 = vector.load %arg21[%c0_198, %c0_199] : memref<16x32xf32, #tpu.memory_space<vmem>>, vector<16x32xf32>
    %cst_200 = arith.constant dense<0.000000e+00> : vector<16x32xf32>
    %618 = tpu.matmul %616, %617, %cst_200 {dimension_numbers = #tpu.dot_dimension_numbers<[1], [0], [0], [1], [0, 0, 1, 1], [], []>} : vector<16x16xf32>, vector<16x32xf32>, vector<16x32xf32> -> vector<16x32xf32>
    %c0_201 = arith.constant 0 : index
    %c0_202 = arith.constant 0 : index
    %619 = vector.load %arg22[%c0_201, %c0_202] : memref<1x32xf32, #tpu.memory_space<vmem>>, vector<1x32xf32>
    %620 = vector.broadcast %619 : vector<1x32xf32> to vector<16x32xf32>
    %621 = arith.addf %618, %620 : vector<16x32xf32>
    %cst_203 = arith.constant 0.000000e+00 : f32
    %622 = vector.broadcast %cst_203 : f32 to vector<16x32xf32>
    %623 = arith.maximumf %621, %622 : vector<16x32xf32>
    %c0_204 = arith.constant 0 : index
    %c0_205 = arith.constant 0 : index
    %624 = vector.load %arg4[%c0_204, %c0_205] : memref<16x32xf32, #tpu.memory_space<vmem>>, vector<16x32xf32>
    %c0_206 = arith.constant 0 : index
    %c0_207 = arith.constant 0 : index
    %625 = vector.load %arg23[%c0_206, %c0_207] : memref<32x32xf32, #tpu.memory_space<vmem>>, vector<32x32xf32>
    %cst_208 = arith.constant dense<0.000000e+00> : vector<16x32xf32>
    %626 = tpu.matmul %624, %625, %cst_208 {dimension_numbers = #tpu.dot_dimension_numbers<[1], [0], [0], [1], [0, 0, 1, 1], [], []>} : vector<16x32xf32>, vector<32x32xf32>, vector<16x32xf32> -> vector<16x32xf32>
    %c0_209 = arith.constant 0 : index
    %c0_210 = arith.constant 0 : index
    %627 = vector.load %arg24[%c0_209, %c0_210] : memref<1x32xf32, #tpu.memory_space<vmem>>, vector<1x32xf32>
    %628 = vector.broadcast %627 : vector<1x32xf32> to vector<16x32xf32>
    %629 = arith.addf %626, %628 : vector<16x32xf32>
    %cst_211 = arith.constant 0.000000e+00 : f32
    %630 = vector.broadcast %cst_211 : f32 to vector<16x32xf32>
    %631 = arith.maximumf %629, %630 : vector<16x32xf32>
    %632 = arith.addf %631, %623 : vector<16x32xf32>
    %c0_212 = arith.constant 0 : index
    %c0_213 = arith.constant 0 : index
    %633 = vector.load %arg25[%c0_212, %c0_213] : memref<32x64xf32, #tpu.memory_space<vmem>>, vector<32x64xf32>
    %cst_214 = arith.constant dense<0.000000e+00> : vector<16x64xf32>
    %634 = tpu.matmul %632, %633, %cst_214 {dimension_numbers = #tpu.dot_dimension_numbers<[1], [0], [0], [1], [0, 0, 1, 1], [], []>} : vector<16x32xf32>, vector<32x64xf32>, vector<16x64xf32> -> vector<16x64xf32>
    %c0_215 = arith.constant 0 : index
    %c0_216 = arith.constant 0 : index
    %635 = vector.load %arg26[%c0_215, %c0_216] : memref<1x64xf32, #tpu.memory_space<vmem>>, vector<1x64xf32>
    %636 = vector.broadcast %635 : vector<1x64xf32> to vector<16x64xf32>
    %637 = arith.addf %634, %636 : vector<16x64xf32>
    %cst_217 = arith.constant 0.000000e+00 : f32
    %638 = vector.broadcast %cst_217 : f32 to vector<16x64xf32>
    %639 = arith.maximumf %637, %638 : vector<16x64xf32>
    %c0_218 = arith.constant 0 : index
    %c0_219 = arith.constant 0 : index
    %640 = vector.load %arg5[%c0_218, %c0_219] : memref<16x64xf32, #tpu.memory_space<vmem>>, vector<16x64xf32>
    %c0_220 = arith.constant 0 : index
    %c0_221 = arith.constant 0 : index
    %641 = vector.load %arg27[%c0_220, %c0_221] : memref<64x64xf32, #tpu.memory_space<vmem>>, vector<64x64xf32>
    %cst_222 = arith.constant dense<0.000000e+00> : vector<16x64xf32>
    %642 = tpu.matmul %640, %641, %cst_222 {dimension_numbers = #tpu.dot_dimension_numbers<[1], [0], [0], [1], [0, 0, 1, 1], [], []>} : vector<16x64xf32>, vector<64x64xf32>, vector<16x64xf32> -> vector<16x64xf32>
    %c0_223 = arith.constant 0 : index
    %c0_224 = arith.constant 0 : index
    %643 = vector.load %arg28[%c0_223, %c0_224] : memref<1x64xf32, #tpu.memory_space<vmem>>, vector<1x64xf32>
    %644 = vector.broadcast %643 : vector<1x64xf32> to vector<16x64xf32>
    %645 = arith.addf %642, %644 : vector<16x64xf32>
    %cst_225 = arith.constant 0.000000e+00 : f32
    %646 = vector.broadcast %cst_225 : f32 to vector<16x64xf32>
    %647 = arith.maximumf %645, %646 : vector<16x64xf32>
    %648 = arith.addf %647, %639 : vector<16x64xf32>
    %c0_226 = arith.constant 0 : index
    %c0_227 = arith.constant 0 : index
    %649 = vector.load %arg29[%c0_226, %c0_227] : memref<64x16xf32, #tpu.memory_space<vmem>>, vector<64x16xf32>
    %cst_228 = arith.constant dense<0.000000e+00> : vector<16x16xf32>
    %650 = tpu.matmul %648, %649, %cst_228 {dimension_numbers = #tpu.dot_dimension_numbers<[1], [0], [0], [1], [0, 0, 1, 1], [], []>} : vector<16x64xf32>, vector<64x16xf32>, vector<16x16xf32> -> vector<16x16xf32>
    %c0_229 = arith.constant 0 : index
    %c0_230 = arith.constant 0 : index
    %651 = vector.load %arg30[%c0_229, %c0_230] : memref<1x16xf32, #tpu.memory_space<vmem>>, vector<1x16xf32>
    %652 = vector.broadcast %651 : vector<1x16xf32> to vector<16x16xf32>
    %653 = arith.addf %650, %652 : vector<16x16xf32>
    %cst_231 = arith.constant 5.000000e-01 : f32
    %654 = vector.broadcast %cst_231 : f32 to vector<16x16xf32>
    %655 = arith.mulf %654, %653 : vector<16x16xf32>
    %656 = math.tanh %655 : vector<16x16xf32>
    %cst_232 = arith.constant 1.000000e+00 : f32
    %657 = vector.broadcast %cst_232 : f32 to vector<16x16xf32>
    %658 = arith.addf %656, %657 : vector<16x16xf32>
    %cst_233 = arith.constant 5.000000e-01 : f32
    %659 = vector.broadcast %cst_233 : f32 to vector<16x16xf32>
    %660 = arith.mulf %659, %658 : vector<16x16xf32>
    %c0_234 = arith.constant 0 : index
    %c0_235 = arith.constant 0 : index
    %661 = vector.load %arg31[%c0_234, %c0_235] : memref<16x16xf32, #tpu.memory_space<vmem>>, vector<16x16xf32>
    tpu.vector_store %arg31[%c0_234, %c0_235], %660 {strides = array<i32>} : memref<16x16xf32, #tpu.memory_space<vmem>>, vector<16x16xf32>,
    return
  }
  func.func @transform_0(%arg0: i32) -> (i32, i32) {
    %c0_i32 = arith.constant 0 : i32
    %c0_i32_0 = arith.constant 0 : i32
    %c0_i32_1 = arith.constant 0 : i32
    return %c0_i32, %c0_i32_0 : i32, i32
  }
  func.func @transform_1(%arg0: i32) -> (i32, i32) {
    %c0_i32 = arith.constant 0 : i32
    %c0_i32_0 = arith.constant 0 : i32
    %c0_i32_1 = arith.constant 0 : i32
    return %c0_i32, %c0_i32_0 : i32, i32
  }
  func.func @transform_2(%arg0: i32) -> (i32, i32) {
    %c0_i32 = arith.constant 0 : i32
    %c0_i32_0 = arith.constant 0 : i32
    %c0_i32_1 = arith.constant 0 : i32
    return %c0_i32, %c0_i32_0 : i32, i32
  }
  func.func @transform_3(%arg0: i32) -> (i32, i32) {
    %c0_i32 = arith.constant 0 : i32
    %c0_i32_0 = arith.constant 0 : i32
    %c0_i32_1 = arith.constant 0 : i32
    return %c0_i32, %c0_i32_0 : i32, i32
  }
  func.func @transform_4(%arg0: i32) -> (i32, i32) {
    %c0_i32 = arith.constant 0 : i32
    %c0_i32_0 = arith.constant 0 : i32
    %c0_i32_1 = arith.constant 0 : i32
    return %c0_i32, %c0_i32_0 : i32, i32
  }
  func.func @transform_5(%arg0: i32) -> (i32, i32) {
    %c0_i32 = arith.constant 0 : i32
    %c0_i32_0 = arith.constant 0 : i32
    %c0_i32_1 = arith.constant 0 : i32
    return %c0_i32, %c0_i32_0 : i32, i32
  }
  func.func @transform_6(%arg0: i32) -> (i32, i32) {
    %c0_i32 = arith.constant 0 : i32
    %c0_i32_0 = arith.constant 0 : i32
    %c0_i32_1 = arith.constant 0 : i32
    return %c0_i32, %c0_i32_0 : i32, i32
  }
  func.func @transform_7(%arg0: i32) -> (i32, i32) {
    %c0_i32 = arith.constant 0 : i32
    %c0_i32_0 = arith.constant 0 : i32
    %c0_i32_1 = arith.constant 0 : i32
    return %c0_i32, %c0_i32_0 : i32, i32
  }
  func.func @transform_8(%arg0: i32) -> (i32, i32) {
    %c0_i32 = arith.constant 0 : i32
    %c0_i32_0 = arith.constant 0 : i32
    %c0_i32_1 = arith.constant 0 : i32
    return %c0_i32, %c0_i32_0 : i32, i32
  }
  func.func @transform_9(%arg0: i32) -> (i32, i32) {
    %c0_i32 = arith.constant 0 : i32
    %c0_i32_0 = arith.constant 0 : i32
    %c0_i32_1 = arith.constant 0 : i32
    return %c0_i32, %c0_i32_0 : i32, i32
  }
  func.func @transform_10(%arg0: i32) -> (i32, i32) {
    %c0_i32 = arith.constant 0 : i32
    %c0_i32_0 = arith.constant 0 : i32
    %c0_i32_1 = arith.constant 0 : i32
    return %c0_i32, %c0_i32_0 : i32, i32
  }
  func.func @transform_11(%arg0: i32) -> (i32, i32) {
    %c0_i32 = arith.constant 0 : i32
    %c0_i32_0 = arith.constant 0 : i32
    %c0_i32_1 = arith.constant 0 : i32
    return %c0_i32, %c0_i32_0 : i32, i32
  }
  func.func @transform_12(%arg0: i32) -> (i32, i32) {
    %c0_i32 = arith.constant 0 : i32
    %c0_i32_0 = arith.constant 0 : i32
    %c0_i32_1 = arith.constant 0 : i32
    return %c0_i32, %c0_i32_0 : i32, i32
  }
  func.func @transform_13(%arg0: i32) -> (i32, i32) {
    %c0_i32 = arith.constant 0 : i32
    %c0_i32_0 = arith.constant 0 : i32
    %c0_i32_1 = arith.constant 0 : i32
    return %c0_i32, %c0_i32_0 : i32, i32
  }
  func.func @transform_14(%arg0: i32) -> (i32, i32) {
    %c0_i32 = arith.constant 0 : i32
    %c0_i32_0 = arith.constant 0 : i32
    %c0_i32_1 = arith.constant 0 : i32
    return %c0_i32, %c0_i32_0 : i32, i32
  }
  func.func @transform_15(%arg0: i32) -> (i32, i32) {
    %c0_i32 = arith.constant 0 : i32
    %c0_i32_0 = arith.constant 0 : i32
    %c0_i32_1 = arith.constant 0 : i32
    return %c0_i32, %c0_i32_0 : i32, i32
  }
  func.func @transform_16(%arg0: i32) -> (i32, i32) {
    %c0_i32 = arith.constant 0 : i32
    %c0_i32_0 = arith.constant 0 : i32
    %c0_i32_1 = arith.constant 0 : i32
    return %c0_i32, %c0_i32_0 : i32, i32
  }
  func.func @transform_17(%arg0: i32) -> (i32, i32) {
    %c0_i32 = arith.constant 0 : i32
    %c0_i32_0 = arith.constant 0 : i32
    %c0_i32_1 = arith.constant 0 : i32
    return %c0_i32, %c0_i32_0 : i32, i32
  }
  func.func @transform_18(%arg0: i32) -> (i32, i32) {
    %c0_i32 = arith.constant 0 : i32
    %c0_i32_0 = arith.constant 0 : i32
    %c0_i32_1 = arith.constant 0 : i32
    return %c0_i32, %c0_i32_0 : i32, i32
  }
  func.func @transform_19(%arg0: i32) -> (i32, i32) {
    %c0_i32 = arith.constant 0 : i32
    %c0_i32_0 = arith.constant 0 : i32
    %c0_i32_1 = arith.constant 0 : i32
    return %c0_i32, %c0_i32_0 : i32, i32
  }
  func.func @transform_20(%arg0: i32) -> (i32, i32) {
    %c0_i32 = arith.constant 0 : i32
    %c0_i32_0 = arith.constant 0 : i32
    %c0_i32_1 = arith.constant 0 : i32
    return %c0_i32, %c0_i32_0 : i32, i32
  }
  func.func @transform_21(%arg0: i32) -> (i32, i32) {
    %c0_i32 = arith.constant 0 : i32
    %c0_i32_0 = arith.constant 0 : i32
    %c0_i32_1 = arith.constant 0 : i32
    return %c0_i32, %c0_i32_0 : i32, i32
  }
  func.func @transform_22(%arg0: i32) -> (i32, i32) {
    %c0_i32 = arith.constant 0 : i32
    %c0_i32_0 = arith.constant 0 : i32
    %c0_i32_1 = arith.constant 0 : i32
    return %c0_i32, %c0_i32_0 : i32, i32
  }
  func.func @transform_23(%arg0: i32) -> (i32, i32) {
    %c0_i32 = arith.constant 0 : i32
    %c0_i32_0 = arith.constant 0 : i32
    %c0_i32_1 = arith.constant 0 : i32
    return %c0_i32, %c0_i32_0 : i32, i32
  }
  func.func @transform_24(%arg0: i32) -> (i32, i32) {
    %c0_i32 = arith.constant 0 : i32
    %c0_i32_0 = arith.constant 0 : i32
    %c0_i32_1 = arith.constant 0 : i32
    return %c0_i32, %c0_i32_0 : i32, i32
  }
  func.func @transform_25(%arg0: i32) -> (i32, i32) {
    %c0_i32 = arith.constant 0 : i32
    %c0_i32_0 = arith.constant 0 : i32
    %c0_i32_1 = arith.constant 0 : i32
    return %c0_i32, %c0_i32_0 : i32, i32
  }
  func.func @transform_26(%arg0: i32) -> (i32, i32) {
    %c0_i32 = arith.constant 0 : i32
    %c0_i32_0 = arith.constant 0 : i32
    %c0_i32_1 = arith.constant 0 : i32
    return %c0_i32, %c0_i32_0 : i32, i32
  }
  func.func @transform_27(%arg0: i32) -> (i32, i32) {
    %c0_i32 = arith.constant 0 : i32
    %c0_i32_0 = arith.constant 0 : i32
    %c0_i32_1 = arith.constant 0 : i32
    return %c0_i32, %c0_i32_0 : i32, i32
  }
  func.func @transform_28(%arg0: i32) -> (i32, i32) {
    %c0_i32 = arith.constant 0 : i32
    %c0_i32_0 = arith.constant 0 : i32
    %c0_i32_1 = arith.constant 0 : i32
    return %c0_i32, %c0_i32_0 : i32, i32
  }
  func.func @transform_29(%arg0: i32) -> (i32, i32) {
    %c0_i32 = arith.constant 0 : i32
    %c0_i32_0 = arith.constant 0 : i32
    %c0_i32_1 = arith.constant 0 : i32
    return %c0_i32, %c0_i32_0 : i32, i32
  }
  func.func @transform_30(%arg0: i32) -> (i32, i32) {
    %c0_i32 = arith.constant 0 : i32
    %c0_i32_0 = arith.constant 0 : i32
    %c0_i32_1 = arith.constant 0 : i32
    return %c0_i32, %c0_i32_0 : i32, i32
  }
}

</mosaic_0001>

<bundles_post_ra>
// kernel: erb_decoder_forward.1
= control target key start
LH: loop header
LB: loop body
LE: loop exit
PB: predicated region body
PF: predicated region fallthrough
CT: control target
= control target key end

     0   :  { %v4770_v0 = vmov 0.0|0.0   ;;  %s4771_s3 = smov 5   ;;  %s4772_s7 = smov 6   ;;  %vm4773_vm0 = vmmov 0   ;;  %v4774_v1 = vmov 0.0   ;;  %vm139_vm1 = vcmask 261120   ;;  %s5339_s0 = inlined_call_operand.smem [shape: u32[31], index: -1, kind: input, shape index: {}] }
   0x1   :  { %4454 = vmatprep.subr.bf16.mxu1 %v4770_v0  ;;  %s3791_s6 = sld [smem:[%s5339_s0 + %s4771_s3]]   ;;  %4078 = vmatprep.mubr.msk.f32.mxu1 %vm4773_vm0, %v4774_v1  ;;  %s4775_s14 = smov 8   ;;  %vm426_vm2 = vcmask 130048   ;;  %vm598_vm3 = vcmask 123904   ;;  %vm3591_vm4 = vcmask 523264  }
   0x2   :  { %s3792_s10 = sld [smem:[%s5339_s0 + %s4772_s7]]   ;;  %s4776_s18 = smov 7  }
   0x3   :  { %s1_s13 = sld [smem:[%s5339_s0]]   ;;  %s4777_s22 = smov 64  }
   0x4   :  { %s4843_s17 = sld [smem:[%s5339_s0 + %s4775_s14]]   ;;  %s4778_s23 = smov 10  }
   0x5   :  { %s3793_s21 = sld [smem:[%s5339_s0 + %s4776_s18]]   ;;  %s4779_s27 = smov 9  }
   0x6   :  { %s3796_s26 = sld [smem:[%s5339_s0 + %s4778_s23]]   ;;  %s4780_s1 = smov 96  }
   0x7   :  { %v128_v2 = vld [vmem:[%s3791_s6] sm:$0xff]  ;;  %v129_v3 = vld [vmem:[%s3791_s6 + $0x8] sm:$0xff]  ;;  %v130_v7 = vld [vmem:[%s3791_s6 + $0x10] sm:$0xff]  ;;  %s3795_s30 = sld [smem:[%s5339_s0 + %s4779_s27]]   ;;  %s4781_s2 = smov 12  }
   0x8   :  { %v221_v4 = vld [vmem:[%s3792_s10] sm:$0xff]  ;;  %v4446_v5 = vpack.c.bf16 %v129_v3, %v128_v2  ;;  %v222_v6 = vld [vmem:[%s3792_s10 + $0x8] sm:$0xff]  ;;  %v131_v8 = vld [vmem:[%s3791_s6 + $0x18] sm:$0xff]  ;;  %s4889_s5 = sld [smem:[%s5339_s0 + %s4781_s2]]   ;;  %s4782_s6 = smov 11  }
   0x9   :  { %v4824_v9 = vpack.c.bf16 %v222_v6, %v221_v4  ;;  %v4450_v10 = vpack.c.bf16 %v131_v8, %v130_v7  ;;  %v223_v11 = vld [vmem:[%s3792_s10 + $0x10] sm:$0xff]  ;;  %v224_v12 = vld [vmem:[%s3792_s10 + $0x18] sm:$0xff]  ;;  %v126_v13 = vld [vmem:[%s1_s13] sm:$0xff]  ;;  %s4911_s9 = sld [smem:[%s5339_s0 + %s4782_s6]]   ;;  %s4783_s10 = smov 32  }
   0xa   :  { %4447 = vmatprep.subr.bf16.mxu0 %v4446_v5  ;;  %4067 = vmatprep.mubr.msk.f32.mxu0 %vm139_vm1, %v126_v13  ;;  %v4828_v14 = vpack.c.bf16 %v224_v12, %v223_v11  ;;  %v127_v15 = vld [vmem:[%s1_s13 + $0x8] sm:$0xff]  ;;  %v4849_v16 = vld [vmem:[%s4843_s17] ss:$0 sm:$0xff]  ;;  %s4784_s11 = smov 112   ;;  %s4785_s12 = smov 13  }
   0xb   :  { %4456 = vmatpush3.bf16.msra.mxu1 %v4824_v9  ;;  %4449 = vmatpush3.bf16.msra.mxu0 %v4446_v5  ;;  %v3817_v19 = vld [vmem:[%s3793_s21] ss:$0 sm:$0xff]  ;;  %s3799_s15 = sld [smem:[%s5339_s0 + %s4785_s12]]   ;;  %s4786_s16 = smov 14  }
   0xc   :  { %4457 = vmatprep.subr.bf16.mxu1 %v4770_v0  ;;  %4451 = vmatprep.subr.bf16.mxu0 %v4450_v10  ;;  %v231_v34 = vld [vmem:[%s3796_s26] sm:$0xff]  ;;  %v232_v35 = vld [vmem:[%s3796_s26 + $0x8] sm:$0xff]  ;;  %s3800_s19 = sld [smem:[%s5339_s0 + %s4786_s16]]   ;;  %s4787_s20 = smov 1  }
   0xd   :  { %v226_v36 = vld [vmem:[%s3795_s30] sm:$0xff]  ;;  %v4866_v38 = vpack.c.bf16 %v232_v35, %v231_v34  ;;  %v227_v39 = vld [vmem:[%s3795_s30 + $0x8] sm:$0xff]  ;;  %v228_v40 = vld [vmem:[%s3795_s30 + $0x10] sm:$0xff]  ;;  %s3787_s23 = sld [smem:[%s5339_s0 + %s4787_s20]]   ;;  %s4788_s24 = smov 15  }
   0xe   :  { %v229_v41 = vld [vmem:[%s3795_s30 + $0x18] sm:$0xff]  ;;  %v4869_v42 = vpack.c.bf16 %v227_v39, %v226_v36  ;;  %v4892_v49 = vld [vmem:[%s4889_s5] ss:$0 sm:$0xff]  ;;  %s3801_s27 = sld [smem:[%s5339_s0 + %s4788_s24]]   ;;  %s4789_s28 = smov 18  }
   0xf   :  { %4459 = vmatpush3.bf16.msra.mxu1 %v4828_v14  ;;  %4453 = vmatpush3.bf16.msra.mxu0 %v4450_v10  ;;  %v4873_v43 = vpack.c.bf16 %v229_v41, %v228_v40  ;;  %v4914_v54 = vld [vmem:[%s4911_s9] ss:$0 sm:$0xff]  ;;  %s4790_s2 = smov 16   ;;  %s4791_s6 = smov 2  }
  0x10   :  { %4466 = vmatprep.subr.bf16.mxu1 %v4770_v0  ;;  %4460 = vmatprep.subr.bf16.mxu0 %v4770_v0  ;;  %s4793_s14 = smov 20   ;;  %s4794_s18 = smov 3  }
  0x11   :  { %s3789_s21 = sld [smem:[%s5339_s0 + %s4794_s18]]   ;;  %s4796_s26 = smov 19  }
  0x12   :  { %4079 = vmatmul.mubr.f32.vlgmr.msra.gmra.mrb[0].mxu1 %v4774_v1  ;;  %4068 = vmatmul.mubr.msk.f32.vlgmr.msra.gmra.mrb[0].mxu0 %vm139_vm1, %v127_v15  ;;  %s3805_s29 = sld [smem:[%s5339_s0 + %s4796_s26]]   ;;  %s4797_s30 = smov 17  }
  0x13   :  { %4096 = vmatprep.mubr.msk.f32.mxu1 %vm4773_vm0, %v4774_v1  ;;  %4089 = vmatprep.mubr.msk.f32.mxu0 %vm4773_vm0, %v4774_v1  ;;  %s3803_s3 = sld [smem:[%s5339_s0 + %s4797_s30]]   ;;  %s4798_s4 = smov 24  }
  0x14   :  { %4468 = vmatpush3.bf16.msra.mxu1 %v4866_v38  ;;  %4462 = vmatpush3.bf16.msra.mxu0 %v4869_v42  ;;  %s3810_s7 = sld [smem:[%s5339_s0 + %s4798_s4]]   ;;  %s4799_s8 = smov 4  }
  0x15   :  { %4469 = vmatprep.subr.bf16.mxu1 %v4770_v0  ;;  %4463 = vmatprep.subr.bf16.mxu0 %v4770_v0  ;;  %s4800_s12 = smov 28   ;;  %s4801_s16 = smov 23  }
  0x16   :  { %s4802_s20 = smov 21   ;;  %s4803_s24 = smov 27  }
  0x17   :  { %4097 = vmatmul.mubr.f32.vlgmr.msra.gmra.mrb[2].mxu1 %v4774_v1 }
  0x18   :  { %4103 = vmatprep.mubr.msk.f32.mxu1 %vm4773_vm0, %v4774_v1  ;;  %4465 = vmatpush3.bf16.msra.mxu0 %v4873_v43 }
  0x19   :  { %4472 = vmatprep.subr.bf16.mxu0 %v4770_v0 }
  0xe5   :  { %v311_v17 = vpop.f32.mrb[0].mxu1  ;;  %v4069_v18 = vpop.f32.mrb[0].mxu0 }
  0xe6   :  { %v312_v20 = vadd.f32 %v4849_v16, %v311_v17  ;;  %v4852_v21 = vadd.f32 %v4069_v18, %v3817_v19  ;;  %v4080_v22 = vpop.f32.mrb[1].mxu1  ;;  %v212_v23 = vpop.f32.mrb[1].mxu0 }
  0xe7   :  { %v4855_v24 = vadd.f32 %v3817_v19, %v212_v23  ;;  %v234_v23 = vld [vmem:[%s3799_s15] sm:$0xff] }
  0xe8   :  { %321 = vrot.lane.b32.xlu0 %v312_v20, %s4777_s22 }
  0xe9   :  { %v315_v25 = vadd.f32 %v312_v20, %v4855_v24 }
  0xea   :  { %v495_v50 = vpop.f32.mrb[2].mxu1 }
  0xeb   :  { %v316_v26 = vmul.f32 0.5, %v315_v25  ;;  %v496_v51 = vadd.f32 %v4892_v49, %v495_v50  ;;  %v4098_v52 = vpop.f32.mrb[3].mxu1  ;;  %v235_v25 = vld [vmem:[%s3799_s15 + $0x8] sm:$0xff]  ;;  %s5305_s15 = sld [smem:[%s5339_s0 + %s4800_s12]]  }
  0xed   :  { %4699 = vtanh.f32 %v316_v26  ;;  %v4927_v26 = vpack.c.bf16 %v235_v25, %v234_v23 }
  0xef   :  { %4471 = vmatpush3.bf16.msra.mxu1 %v4927_v26 }
  0xf0   :  { %4478 = vmatprep.subr.bf16.mxu1 %v4770_v0 }
  0xf7   :  { %v4700_v27 = vpop.eup %4699 }
  0xf8   :  { %v318_v28 = vadd.f32 1.0, %v4700_v27 }
  0xfa   :  { %v319_v29 = vmul.f32 0.5, %v318_v28 }
  0xfc   :  { %v331_v44 = vsub.f32 1.0, %v319_v29  ;;  %v337_v46 = vmul.f32 0.0, %v319_v29 }
 0x15a   :  { %v322_v30 = vpop.permute.xlu0 %321 }
 0x15b   :  { %v324_v31 = vmul.f32 %v322_v30, %v319_v29 }
 0x15d   :  { %326 = vrot.lane.b32.xlu0 %v324_v31, %s4777_s22 }
 0x161   :  { %505 = vrot.lane.b32.xlu0 %v496_v51, %s4780_s1 }
 0x1cf   :  { %v327_v32 = vpop.permute.xlu0 %326 }
 0x1d0   :  { %v329_v33 = vadd.f32 %v327_v32, %v4855_v24 }
 0x1d2   :  { %4701 = vtanh.f32 %v329_v33 }
 0x1d3   :  { %v506_v4 = vpop.permute.xlu0 %505 }
 0x1dc   :  { %v4702_v37 = vpop.eup %4701 }
 0x1dd   :  { %333 = vrot.lane.b32.xlu1 %v4702_v37, %s4780_s1 }
 0x24f   :  { %v334_v45 = vpop.permute.xlu1 %333 }
 0x250   :  { %v336_v47 = vmul.f32 %v334_v45, %v331_v44 }
 0x252   :  { %v4882_v48 = vadd.f32 %v337_v46, %v336_v47 }
 0x254   :  { %346 = vrot.lane.b32.xlu1 %v4882_v48, %s4780_s1  ;;  %v694_v33 = vrot.slane %v4882_v48, 6 }
 0x2c6   :  { %v347_v53 = vpop.permute.xlu1 %346 }
 0x2c7   :  { %4090 = vmatmul.mubr.msk.f32.vlgmr.msra.gmra.mrb[2].mxu0 %vm139_vm1, %v347_v53 }
 0x2c8   :  { %4474 = vmatpush3.bf16.msra.mxu0 %v4824_v9  ;;  %4114 = vmatprep.mubr.msk.f32.mxu0 %vm4773_vm0, %v4774_v1 }
 0x2c9   :  { %4475 = vmatprep.subr.bf16.mxu0 %v4770_v0 }
 0x2cc   :  { %4477 = vmatpush3.bf16.msra.mxu0 %v4828_v14 }
 0x2cd   :  { %4484 = vmatprep.subr.bf16.mxu0 %v4770_v0 }
 0x2cf   :  { %4115 = vmatmul.mubr.msk.f32.vlgmr.msra.gmra.mrb[4].mxu0 %vm139_vm1, %v347_v53 }
 0x2d0   :  { %4486 = vmatpush3.bf16.msra.mxu0 %v4866_v38  ;;  %4132 = vmatprep.mubr.msk.f32.mxu0 %vm4773_vm0, %v4774_v1 }
 0x2d1   :  { %4490 = vmatprep.subr.bf16.mxu0 %v4770_v0 }
 0x39a   :  { %v416_v55 = vpop.f32.mrb[2].mxu0 }
 0x39b   :  { %v417_v56 = vadd.f32 %v4914_v54, %v416_v55  ;;  %v4091_v57 = vpop.f32.mrb[3].mxu0 }
 0x39d   :  { %v499_v58 = vadd.f32 %v496_v51, %v417_v56 }
 0x39f   :  { %v500_v59 = vmul.f32 0.5, %v499_v58 }
 0x3a1   :  { %4703 = vtanh.f32 %v500_v59 }
 0x3a2   :  { %v666_v60 = vpop.f32.mrb[4].mxu0 }
 0x3a3   :  { %v667_v61 = vadd.f32 %v4849_v16, %v666_v60  ;;  %v4116_v62 = vpop.f32.mrb[5].mxu0 }
 0x3a5   :  { %v671_v63 = vrot.slane %v667_v61, 6 }
 0x3a7   :  { %678 = vrot.lane.b32.xlu1 %v671_v63, %s4777_s22  ;;  %v673_v7 = vadd.f32 %v671_v63, %v4855_v24 }
 0x3a9   :  { %v674_v8 = vmul.f32 0.5, %v673_v7 }
 0x3ab   :  { %v4704_v2 = vpop.eup %4703  ;;  %4705 = vtanh.f32 %v674_v8 }
 0x3ac   :  { %v502_v3 = vadd.f32 1.0, %v4704_v2 }
 0x3ae   :  { %v503_v5 = vmul.f32 0.5, %v502_v3 }
 0x3b0   :  { %v508_v6 = vmul.f32 %v506_v4, %v503_v5  ;;  %v515_v28 = vsub.f32 1.0, %v503_v5  ;;  %v521_v30 = vmul.f32 0.0, %v503_v5 }
 0x3b2   :  { %510 = vrot.lane.b32.xlu0 %v508_v6, %s4783_s10 }
 0x3b5   :  { %v4706_v10 = vpop.eup %4705 }
 0x3b6   :  { %v676_v11 = vadd.f32 1.0, %v4706_v10 }
 0x3b8   :  { %v677_v12 = vmul.f32 0.5, %v676_v11 }
 0x3ba   :  { %v688_v34 = vsub.f32 1.0, %v677_v12  ;;  %v696_v37 = vmul.f32 %v694_v33, %v677_v12 }
 0x419   :  { %v679_v13 = vpop.permute.xlu1 %678 }
 0x41a   :  { %v681_v15 = vmul.f32 %v679_v13, %v677_v12 }
 0x41c   :  { %683 = vrot.lane.b32.xlu1 %v681_v15, %s4777_s22 }
 0x424   :  { %v511_v17 = vpop.permute.xlu0 %510 }
 0x425   :  { %v513_v18 = vadd.f32 %v511_v17, %v417_v56 }
 0x427   :  { %4707 = vtanh.f32 %v513_v18 }
 0x431   :  { %v4708_v19 = vpop.eup %4707 }
 0x432   :  { %517 = vrot.lane.b32.xlu0 %v4708_v19, %s4784_s11 }
 0x48e   :  { %v684_v20 = vpop.permute.xlu1 %683 }
 0x48f   :  { %v686_v22 = vadd.f32 %v684_v20, %v4855_v24 }
 0x491   :  { %4709 = vtanh.f32 %v686_v22 }
 0x49b   :  { %v4710_v27 = vpop.eup %4709 }
 0x49c   :  { %690 = vrot.lane.b32.xlu1 %v4710_v27, %s4780_s1 }
 0x4a4   :  { %v518_v29 = vpop.permute.xlu0 %517 }
 0x4a5   :  { %v520_v31 = vmul.f32 %v518_v29, %v515_v28 }
 0x4a7   :  { %v4932_v32 = vadd.f32 %v521_v30, %v520_v31 }
 0x4a9   :  { %524 = vrot.lane.b32.xlu0 %v4932_v32, %s4784_s11 }
 0x50e   :  { %v691_v35 = vpop.permute.xlu1 %690 }
 0x50f   :  { %v693_v36 = vmul.f32 %v691_v35, %v688_v34 }
 0x511   :  { %v4937_v39 = vadd.f32 %v696_v37, %v693_v36 }
 0x513   :  { %v699_v40 = vrot.slane %v4937_v39, 2  ;;  %v1038_v28 = vrot.slane %v4937_v39, 6 }
 0x515   :  { %700 = vrot.lane.b32.xlu1 %v699_v40, %s4780_s1 }
 0x51b   :  { %v525_v41 = vpop.permute.xlu0 %524 }
 0x51c   :  { %4104 = vmatmul.mubr.msk.f32.vlgmr.msra.gmra.mrb[4].mxu1 %vm426_vm2, %v525_v41  ;;  %4133 = vmatmul.mubr.msk.f32.vlgmr.msra.gmra.mrb[6].mxu0 %vm426_vm2, %v525_v41 }
 0x51d   :  { %4480 = vmatpush3.bf16.msra.mxu1 %v4869_v42  ;;  %4492 = vmatpush3.bf16.msra.mxu0 %v4824_v9 }
 0x51e   :  { %4481 = vmatprep.subr.bf16.mxu1 %v4770_v0  ;;  %4493 = vmatprep.subr.bf16.mxu0 %v4770_v0 }
 0x51f   :  { %4125 = vmatprep.mubr.msk.f32.mxu1 %vm4773_vm0, %v4774_v1  ;;  %4150 = vmatprep.mubr.msk.f32.mxu0 %vm4773_vm0, %v4774_v1 }
 0x521   :  { %4483 = vmatpush3.bf16.msra.mxu1 %v4873_v43  ;;  %4495 = vmatpush3.bf16.msra.mxu0 %v4828_v14 }
 0x522   :  { %4487 = vmatprep.subr.bf16.mxu1 %v4770_v0  ;;  %4502 = vmatprep.subr.bf16.mxu0 %v4770_v0 }
 0x587   :  { %v701_v44 = vpop.permute.xlu1 %700 }
 0x588   :  { %4126 = vmatmul.mubr.msk.f32.vlgmr.msra.gmra.mrb[6].mxu1 %vm139_vm1, %v701_v44  ;;  %4151 = vmatmul.mubr.msk.f32.vlgmr.msra.gmra.mrb[8].mxu0 %vm139_vm1, %v701_v44 }
 0x589   :  { %4489 = vmatpush3.bf16.msra.mxu1 %v4927_v26  ;;  %4504 = vmatpush3.bf16.msra.mxu0 %v4866_v38 }
 0x58a   :  { %4139 = vmatprep.mubr.msk.f32.mxu1 %vm4773_vm0, %v4774_v1  ;;  %4168 = vmatprep.mubr.msk.f32.mxu0 %vm4773_vm0, %v4774_v1 }
 0x58b   :  { %4496 = vmatprep.subr.bf16.mxu1 %v4770_v0  ;;  %4508 = vmatprep.subr.bf16.mxu0 %v4770_v0 }
 0x5ef   :  { %v594_v45 = vpop.f32.mrb[4].mxu1  ;;  %v840_v46 = vpop.f32.mrb[6].mxu0 }
 0x5f0   :  { %599 = vst.msk [vmem:[#allocation2] sm:$0x3] %vm598_vm3, %v594_v45  ;;  %v841_v47 = vadd.f32 %v4892_v49, %v840_v46  ;;  %v4105_v48 = vpop.f32.mrb[5].mxu1  ;;  %v4134_v50 = vpop.f32.mrb[7].mxu0 }
 0x5f2   :  { %850 = vrot.lane.b32.xlu0 %v841_v47, %s4780_s1 }
 0x65b   :  { %v770_v51 = vpop.f32.mrb[6].mxu1  ;;  %v1010_v52 = vpop.f32.mrb[8].mxu0 }
 0x65c   :  { %v771_v53 = vadd.f32 %v4914_v54, %v770_v51  ;;  %v1011_v55 = vadd.f32 %v4849_v16, %v1010_v52  ;;  %v4127_v56 = vpop.f32.mrb[7].mxu1  ;;  %v4152_v57 = vpop.f32.mrb[9].mxu0 }
 0x65e   :  { %v844_v58 = vadd.f32 %v841_v47, %v771_v53  ;;  %v1015_v59 = vrot.slane %v1011_v55, 4 }
 0x660   :  { %v845_v60 = vmul.f32 0.5, %v844_v58  ;;  %1022 = vrot.lane.b32.xlu1 %v1015_v59, %s4777_s22  ;;  %v1017_v4 = vadd.f32 %v1015_v59, %v4855_v24 }
 0x662   :  { %4711 = vtanh.f32 %v845_v60  ;;  %v1018_v5 = vmul.f32 0.5, %v1017_v4 }
 0x664   :  { %v851_v2 = vpop.permute.xlu0 %850  ;;  %4713 = vtanh.f32 %v1018_v5 }
 0x66c   :  { %v4712_v61 = vpop.eup %4711 }
 0x66d   :  { %v847_v62 = vadd.f32 1.0, %v4712_v61 }
 0x66e   :  { %v4714_v6 = vpop.eup %4713 }
 0x66f   :  { %v848_v63 = vmul.f32 0.5, %v847_v62  ;;  %v1020_v7 = vadd.f32 1.0, %v4714_v6 }
 0x671   :  { %v853_v3 = vmul.f32 %v851_v2, %v848_v63  ;;  %v1021_v8 = vmul.f32 0.5, %v1020_v7  ;;  %v860_v20 = vsub.f32 1.0, %v848_v63  ;;  %v866_v23 = vmul.f32 %v848_v63, %v4932_v32 }
 0x673   :  { %855 = vrot.lane.b32.xlu0 %v853_v3, %s4783_s10  ;;  %v1032_v29 = vsub.f32 1.0, %v1021_v8  ;;  %v1040_v31 = vmul.f32 %v1038_v28, %v1021_v8 }
 0x6d2   :  { %v1023_v10 = vpop.permute.xlu1 %1022 }
 0x6d3   :  { %v1025_v11 = vmul.f32 %v1023_v10, %v1021_v8 }
 0x6d5   :  { %1027 = vrot.lane.b32.xlu1 %v1025_v11, %s4777_s22 }
 0x6e5   :  { %v856_v12 = vpop.permute.xlu0 %855 }
 0x6e6   :  { %v858_v13 = vadd.f32 %v856_v12, %v771_v53 }
 0x6e8   :  { %4715 = vtanh.f32 %v858_v13 }
 0x6f2   :  { %v4716_v15 = vpop.eup %4715 }
 0x6f3   :  { %862 = vrot.lane.b32.xlu0 %v4716_v15, %s4784_s11 }
 0x747   :  { %v1028_v17 = vpop.permute.xlu1 %1027 }
 0x748   :  { %v1030_v18 = vadd.f32 %v1028_v17, %v4855_v24 }
 0x74a   :  { %4717 = vtanh.f32 %v1030_v18 }
 0x754   :  { %v4718_v19 = vpop.eup %4717 }
 0x755   :  { %1034 = vrot.lane.b32.xlu1 %v4718_v19, %s4780_s1 }
 0x765   :  { %v863_v22 = vpop.permute.xlu0 %862 }
 0x766   :  { %v865_v25 = vmul.f32 %v863_v22, %v860_v20 }
 0x768   :  { %v4978_v27 = vadd.f32 %v866_v23, %v865_v25 }
 0x76a   :  { %869 = vrot.lane.b32.xlu0 %v4978_v27, %s4784_s11 }
 0x7c7   :  { %v1035_v30 = vpop.permute.xlu1 %1034 }
 0x7c8   :  { %v1037_v33 = vmul.f32 %v1035_v30, %v1032_v29 }
 0x7ca   :  { %v4983_v34 = vadd.f32 %v1040_v31, %v1037_v33 }
 0x7cc   :  { %v1043_v35 = vrot.slane %v4983_v34, 4  ;;  %v1382_v20 = vrot.slane %v4983_v34, 6 }
 0x7ce   :  { %1044 = vrot.lane.b32.xlu1 %v1043_v35, %s4780_s1 }
 0x7dc   :  { %v870_v36 = vpop.permute.xlu0 %869 }
 0x7dd   :  { %4140 = vmatmul.mubr.msk.f32.vlgmr.msra.gmra.mrb[8].mxu1 %vm426_vm2, %v870_v36  ;;  %4169 = vmatmul.mubr.msk.f32.vlgmr.msra.gmra.mrb[10].mxu0 %vm426_vm2, %v870_v36 }
 0x7de   :  { %4498 = vmatpush3.bf16.msra.mxu1 %v4869_v42  ;;  %4510 = vmatpush3.bf16.msra.mxu0 %v4824_v9 }
 0x7df   :  { %4499 = vmatprep.subr.bf16.mxu1 %v4770_v0  ;;  %4511 = vmatprep.subr.bf16.mxu0 %v4770_v0 }
 0x7e0   :  { %4161 = vmatprep.mubr.msk.f32.mxu1 %vm4773_vm0, %v4774_v1  ;;  %4186 = vmatprep.mubr.msk.f32.mxu0 %vm4773_vm0, %v4774_v1 }
 0x7e2   :  { %4501 = vmatpush3.bf16.msra.mxu1 %v4873_v43  ;;  %4513 = vmatpush3.bf16.msra.mxu0 %v4828_v14 }
 0x7e3   :  { %4505 = vmatprep.subr.bf16.mxu1 %v4770_v0  ;;  %4520 = vmatprep.subr.bf16.mxu0 %v4770_v0 }
 0x840   :  { %v1045_v32 = vpop.permute.xlu1 %1044 }
 0x841   :  { %4162 = vmatmul.mubr.msk.f32.vlgmr.msra.gmra.mrb[10].mxu1 %vm139_vm1, %v1045_v32  ;;  %4187 = vmatmul.mubr.msk.f32.vlgmr.msra.gmra.mrb[12].mxu0 %vm139_vm1, %v1045_v32 }
 0x842   :  { %4507 = vmatpush3.bf16.msra.mxu1 %v4927_v26  ;;  %4522 = vmatpush3.bf16.msra.mxu0 %v4866_v38 }
 0x843   :  { %4175 = vmatprep.mubr.msk.f32.mxu1 %vm4773_vm0, %v4774_v1  ;;  %4204 = vmatprep.mubr.msk.f32.mxu0 %vm4773_vm0, %v4774_v1 }
 0x844   :  { %4514 = vmatprep.subr.bf16.mxu1 %v4770_v0  ;;  %4526 = vmatprep.subr.bf16.mxu0 %v4770_v0 }
 0x8b0   :  { %v939_v37 = vpop.f32.mrb[8].mxu1  ;;  %v1184_v39 = vpop.f32.mrb[10].mxu0 }
 0x8b1   :  { %943 = vst.msk [vmem:[#allocation2 + $0x2] sm:$0x3] %vm598_vm3, %v939_v37  ;;  %v1185_v40 = vadd.f32 %v4892_v49, %v1184_v39  ;;  %v4141_v41 = vpop.f32.mrb[9].mxu1  ;;  %v4170_v44 = vpop.f32.mrb[11].mxu0 }
 0x8b3   :  { %1194 = vrot.lane.b32.xlu0 %v1185_v40, %s4780_s1 }
 0x914   :  { %v1114_v45 = vpop.f32.mrb[10].mxu1  ;;  %v1354_v46 = vpop.f32.mrb[12].mxu0 }
 0x915   :  { %v1115_v47 = vadd.f32 %v4914_v54, %v1114_v45  ;;  %v1355_v48 = vadd.f32 %v4849_v16, %v1354_v46  ;;  %v4163_v50 = vpop.f32.mrb[11].mxu1  ;;  %v4188_v51 = vpop.f32.mrb[13].mxu0 }
 0x917   :  { %v1188_v52 = vadd.f32 %v1185_v40, %v1115_v47  ;;  %v1359_v53 = vrot.slane %v1355_v48, 2 }
 0x919   :  { %v1189_v55 = vmul.f32 0.5, %v1188_v52  ;;  %1366 = vrot.lane.b32.xlu1 %v1359_v53, %s4777_s22  ;;  %v1361_v61 = vadd.f32 %v1359_v53, %v4855_v24 }
 0x91b   :  { %4719 = vtanh.f32 %v1189_v55  ;;  %v1362_v62 = vmul.f32 0.5, %v1361_v61 }
 0x91d   :  { %4721 = vtanh.f32 %v1362_v62 }
 0x925   :  { %v4720_v56 = vpop.eup %4719  ;;  %v1195_v59 = vpop.permute.xlu0 %1194 }
 0x926   :  { %v1191_v57 = vadd.f32 1.0, %v4720_v56 }
 0x927   :  { %v4722_v63 = vpop.eup %4721 }
 0x928   :  { %v1192_v58 = vmul.f32 0.5, %v1191_v57  ;;  %v1364_v2 = vadd.f32 1.0, %v4722_v63 }
 0x92a   :  { %v1197_v60 = vmul.f32 %v1195_v59, %v1192_v58  ;;  %v1365_v3 = vmul.f32 0.5, %v1364_v2  ;;  %v1204_v13 = vsub.f32 1.0, %v1192_v58  ;;  %v1210_v17 = vmul.f32 %v1192_v58, %v4978_v27 }
 0x92c   :  { %1199 = vrot.lane.b32.xlu0 %v1197_v60, %s4783_s10  ;;  %v1376_v22 = vsub.f32 1.0, %v1365_v3  ;;  %v1384_v25 = vmul.f32 %v1382_v20, %v1365_v3 }
 0x98b   :  { %v1367_v4 = vpop.permute.xlu1 %1366 }
 0x98c   :  { %v1369_v5 = vmul.f32 %v1367_v4, %v1365_v3 }
 0x98e   :  { %1371 = vrot.lane.b32.xlu1 %v1369_v5, %s4777_s22 }
 0x99e   :  { %v1200_v6 = vpop.permute.xlu0 %1199 }
 0x99f   :  { %v1202_v7 = vadd.f32 %v1200_v6, %v1115_v47 }
 0x9a1   :  { %4723 = vtanh.f32 %v1202_v7 }
 0x9ab   :  { %v4724_v8 = vpop.eup %4723 }
 0x9ac   :  { %1206 = vrot.lane.b32.xlu0 %v4724_v8, %s4784_s11 }
 0xa00   :  { %v1372_v10 = vpop.permute.xlu1 %1371 }
 0xa01   :  { %v1374_v11 = vadd.f32 %v1372_v10, %v4855_v24 }
 0xa03   :  { %4725 = vtanh.f32 %v1374_v11 }
 0xa0d   :  { %v4726_v12 = vpop.eup %4725 }
 0xa0e   :  { %1378 = vrot.lane.b32.xlu1 %v4726_v12, %s4780_s1 }
 0xa1e   :  { %v1207_v15 = vpop.permute.xlu0 %1206 }
 0xa1f   :  { %v1209_v18 = vmul.f32 %v1207_v15, %v1204_v13 }
 0xa21   :  { %v5024_v19 = vadd.f32 %v1210_v17, %v1209_v18 }
 0xa23   :  { %1213 = vrot.lane.b32.xlu0 %v5024_v19, %s4784_s11 }
 0xa80   :  { %v1379_v23 = vpop.permute.xlu1 %1378 }
 0xa81   :  { %v1381_v24 = vmul.f32 %v1379_v23, %v1376_v22 }
 0xa83   :  { %v5029_v28 = vadd.f32 %v1384_v25, %v1381_v24 }
 0xa85   :  { %v1387_v29 = vrot.slane %v5029_v28, 6 }
 0xa87   :  { %1388 = vrot.lane.b32.xlu1 %v1387_v29, %s4780_s1 }
 0xa95   :  { %v1214_v27 = vpop.permute.xlu0 %1213 }
 0xa96   :  { %4176 = vmatmul.mubr.msk.f32.vlgmr.msra.gmra.mrb[12].mxu1 %vm426_vm2, %v1214_v27  ;;  %4205 = vmatmul.mubr.msk.f32.vlgmr.msra.gmra.mrb[14].mxu0 %vm426_vm2, %v1214_v27 }
 0xa97   :  { %4516 = vmatpush3.bf16.msra.mxu1 %v4869_v42  ;;  %4528 = vmatpush3.bf16.msra.mxu0 %v4824_v9 }
 0xa98   :  { %4517 = vmatprep.subr.bf16.mxu1 %v4770_v0  ;;  %4529 = vmatprep.subr.bf16.mxu0 %v4770_v0 }
 0xa99   :  { %4197 = vmatprep.mubr.msk.f32.mxu1 %vm4773_vm0, %v4774_v1  ;;  %4222 = vmatprep.mubr.msk.f32.mxu0 %vm4773_vm0, %v4774_v1 }
 0xa9b   :  { %4519 = vmatpush3.bf16.msra.mxu1 %v4873_v43  ;;  %4531 = vmatpush3.bf16.msra.mxu0 %v4828_v14 }
 0xa9c   :  { %4523 = vmatprep.subr.bf16.mxu1 %v4770_v0  ;;  %4538 = vmatprep.subr.bf16.mxu0 %v4770_v0 }
 0xaf9   :  { %v1389_v30 = vpop.permute.xlu1 %1388 }
 0xafa   :  { %4198 = vmatmul.mubr.msk.f32.vlgmr.msra.gmra.mrb[14].mxu1 %vm139_vm1, %v1389_v30  ;;  %4223 = vmatmul.mubr.msk.f32.vlgmr.msra.gmra.mrb[16].mxu0 %vm139_vm1, %v1389_v30 }
 0xafb   :  { %4525 = vmatpush3.bf16.msra.mxu1 %v4927_v26  ;;  %4540 = vmatpush3.bf16.msra.mxu0 %v4866_v38 }
 0xafc   :  { %4211 = vmatprep.mubr.msk.f32.mxu1 %vm4773_vm0, %v4774_v1  ;;  %4240 = vmatprep.mubr.msk.f32.mxu0 %vm4773_vm0, %v4774_v1 }
 0xafd   :  { %4532 = vmatprep.subr.bf16.mxu1 %v4770_v0  ;;  %4544 = vmatprep.subr.bf16.mxu0 %v4770_v0 }
 0xb69   :  { %v1283_v31 = vpop.f32.mrb[12].mxu1  ;;  %v1528_v33 = vpop.f32.mrb[14].mxu0 }
 0xb6a   :  { %1287 = vst.msk [vmem:[#allocation2 + $0x4] sm:$0x3] %vm598_vm3, %v1283_v31  ;;  %v1529_v34 = vadd.f32 %v4892_v49, %v1528_v33  ;;  %v4177_v35 = vpop.f32.mrb[13].mxu1  ;;  %v4206_v36 = vpop.f32.mrb[15].mxu0 }
 0xb6c   :  { %1538 = vrot.lane.b32.xlu0 %v1529_v34, %s4780_s1 }
 0xbcd   :  { %v1458_v32 = vpop.f32.mrb[14].mxu1  ;;  %v1698_v37 = vpop.f32.mrb[16].mxu0 }
 0xbce   :  { %v1459_v39 = vadd.f32 %v4914_v54, %v1458_v32  ;;  %v1699_v40 = vadd.f32 %v4849_v16, %v1698_v37  ;;  %v4199_v41 = vpop.f32.mrb[15].mxu1  ;;  %v4224_v44 = vpop.f32.mrb[17].mxu0 }
 0xbd0   :  { %v1532_v45 = vadd.f32 %v1529_v34, %v1459_v39  ;;  %1708 = vrot.lane.b32.xlu1 %v1699_v40, %s4777_s22  ;;  %v1702_v53 = vadd.f32 %v1699_v40, %v4852_v21 }
 0xbd2   :  { %v1533_v46 = vmul.f32 0.5, %v1532_v45  ;;  %v1703_v55 = vmul.f32 0.5, %v1702_v53 }
 0xbd4   :  { %4727 = vtanh.f32 %v1533_v46 }
 0xbd5   :  { %4729 = vtanh.f32 %v1703_v55 }
 0xbde   :  { %v4728_v47 = vpop.eup %4727  ;;  %v1539_v51 = vpop.permute.xlu0 %1538 }
 0xbdf   :  { %v1535_v48 = vadd.f32 1.0, %v4728_v47  ;;  %v4730_v56 = vpop.eup %4729 }
 0xbe0   :  { %v1705_v57 = vadd.f32 1.0, %v4730_v56 }
 0xbe1   :  { %v1536_v50 = vmul.f32 0.5, %v1535_v48 }
 0xbe2   :  { %v1706_v58 = vmul.f32 0.5, %v1705_v57 }
 0xbe3   :  { %v1541_v52 = vmul.f32 %v1539_v51, %v1536_v50  ;;  %v1548_v5 = vsub.f32 1.0, %v1536_v50  ;;  %v1554_v7 = vmul.f32 %v1536_v50, %v5024_v19 }
 0xbe4   :  { %v1718_v11 = vsub.f32 1.0, %v1706_v58  ;;  %v1725_v13 = vmul.f32 %v1706_v58, %v1387_v29 }
 0xbe5   :  { %1543 = vrot.lane.b32.xlu0 %v1541_v52, %s4783_s10 }
 0xc42   :  { %v1709_v59 = vpop.permute.xlu1 %1708 }
 0xc43   :  { %v1711_v60 = vmul.f32 %v1709_v59, %v1706_v58 }
 0xc45   :  { %1713 = vrot.lane.b32.xlu1 %v1711_v60, %s4777_s22 }
 0xc57   :  { %v1544_v61 = vpop.permute.xlu0 %1543 }
 0xc58   :  { %v1546_v62 = vadd.f32 %v1544_v61, %v1459_v39 }
 0xc5a   :  { %4731 = vtanh.f32 %v1546_v62 }
 0xc64   :  { %v4732_v63 = vpop.eup %4731 }
 0xc65   :  { %1550 = vrot.lane.b32.xlu0 %v4732_v63, %s4784_s11 }
 0xcb7   :  { %v1714_v2 = vpop.permute.xlu1 %1713 }
 0xcb8   :  { %v1716_v3 = vadd.f32 %v1714_v2, %v4852_v21 }
 0xcba   :  { %4733 = vtanh.f32 %v1716_v3 }
 0xcc4   :  { %v4734_v4 = vpop.eup %4733 }
 0xcc5   :  { %1720 = vrot.lane.b32.xlu1 %v4734_v4, %s4780_s1 }
 0xcd7   :  { %v1551_v6 = vpop.permute.xlu0 %1550 }
 0xcd8   :  { %v1553_v8 = vmul.f32 %v1551_v6, %v1548_v5 }
 0xcda   :  { %v5072_v10 = vadd.f32 %v1554_v7, %v1553_v8 }
 0xcdc   :  { %1557 = vrot.lane.b32.xlu0 %v5072_v10, %s4784_s11 }
 0xd37   :  { %v1721_v12 = vpop.permute.xlu1 %1720 }
 0xd38   :  { %v1723_v15 = vmul.f32 %v1721_v12, %v1718_v11 }
 0xd3a   :  { %v5078_v17 = vadd.f32 %v1725_v13, %v1723_v15 }
 0xd3c   :  { %1728 = vrot.lane.b32.xlu1 %v5078_v17, %s4780_s1  ;;  %v2066_v2 = vrot.slane %v5078_v17, 6 }
 0xd4e   :  { %v1558_v18 = vpop.permute.xlu0 %1557 }
 0xd4f   :  { %4212 = vmatmul.mubr.msk.f32.vlgmr.msra.gmra.mrb[16].mxu1 %vm426_vm2, %v1558_v18  ;;  %4241 = vmatmul.mubr.msk.f32.vlgmr.msra.gmra.mrb[18].mxu0 %vm426_vm2, %v1558_v18 }
 0xd50   :  { %4534 = vmatpush3.bf16.msra.mxu1 %v4869_v42  ;;  %4546 = vmatpush3.bf16.msra.mxu0 %v4824_v9 }
 0xd51   :  { %4535 = vmatprep.subr.bf16.mxu1 %v4770_v0  ;;  %4547 = vmatprep.subr.bf16.mxu0 %v4770_v0 }
 0xd52   :  { %4233 = vmatprep.mubr.msk.f32.mxu1 %vm4773_vm0, %v4774_v1  ;;  %4258 = vmatprep.mubr.msk.f32.mxu0 %vm4773_vm0, %v4774_v1 }
 0xd54   :  { %4537 = vmatpush3.bf16.msra.mxu1 %v4873_v43  ;;  %4549 = vmatpush3.bf16.msra.mxu0 %v4828_v14 }
 0xd55   :  { %4541 = vmatprep.subr.bf16.mxu1 %v4770_v0  ;;  %4556 = vmatprep.subr.bf16.mxu0 %v4770_v0 }
 0xdae   :  { %v1729_v19 = vpop.permute.xlu1 %1728 }
 0xdaf   :  { %4234 = vmatmul.mubr.msk.f32.vlgmr.msra.gmra.mrb[18].mxu1 %vm139_vm1, %v1729_v19  ;;  %4259 = vmatmul.mubr.msk.f32.vlgmr.msra.gmra.mrb[20].mxu0 %vm139_vm1, %v1729_v19 }
 0xdb0   :  { %4543 = vmatpush3.bf16.msra.mxu1 %v4927_v26  ;;  %4558 = vmatpush3.bf16.msra.mxu0 %v4866_v38 }
 0xdb1   :  { %4247 = vmatprep.mubr.msk.f32.mxu1 %vm4773_vm0, %v4774_v1  ;;  %4276 = vmatprep.mubr.msk.f32.mxu0 %vm4773_vm0, %v4774_v1 }
 0xdb2   :  { %4550 = vmatprep.subr.bf16.mxu1 %v4770_v0  ;;  %4562 = vmatprep.subr.bf16.mxu0 %v4770_v0 }
 0xe22   :  { %v1627_v20 = vpop.f32.mrb[16].mxu1  ;;  %v1868_v22 = vpop.f32.mrb[18].mxu0 }
 0xe23   :  { %1631 = vst.msk [vmem:[#allocation2 + $0x6] sm:$0x3] %vm598_vm3, %v1627_v20  ;;  %v1869_v23 = vadd.f32 %v4892_v49, %v1868_v22  ;;  %v4213_v25 = vpop.f32.mrb[17].mxu1  ;;  %v4242_v24 = vpop.f32.mrb[19].mxu0 }
 0xe25   :  { %1878 = vrot.lane.b32.xlu0 %v1869_v23, %s4780_s1 }
 0xe82   :  { %v1798_v28 = vpop.f32.mrb[18].mxu1  ;;  %v2038_v29 = vpop.f32.mrb[20].mxu0 }
 0xe83   :  { %v1799_v27 = vadd.f32 %v4914_v54, %v1798_v28  ;;  %v2039_v30 = vadd.f32 %v4849_v16, %v2038_v29  ;;  %v4235_v31 = vpop.f32.mrb[19].mxu1  ;;  %v4260_v33 = vpop.f32.mrb[21].mxu0 }
 0xe85   :  { %v1872_v34 = vadd.f32 %v1869_v23, %v1799_v27  ;;  %v2043_v35 = vrot.slane %v2039_v30, 6 }
 0xe87   :  { %v1873_v36 = vmul.f32 0.5, %v1872_v34  ;;  %2050 = vrot.lane.b32.xlu1 %v2043_v35, %s4777_s22  ;;  %v2045_v44 = vadd.f32 %v2043_v35, %v4852_v21 }
 0xe89   :  { %4735 = vtanh.f32 %v1873_v36  ;;  %v2046_v45 = vmul.f32 0.5, %v2045_v44 }
 0xe8b   :  { %4737 = vtanh.f32 %v2046_v45 }
 0xe93   :  { %v4736_v32 = vpop.eup %4735 }
 0xe94   :  { %v1875_v37 = vadd.f32 1.0, %v4736_v32 }
 0xe95   :  { %v4738_v46 = vpop.eup %4737 }
 0xe96   :  { %v1876_v39 = vmul.f32 0.5, %v1875_v37  ;;  %v2048_v47 = vadd.f32 1.0, %v4738_v46 }
 0xe97   :  { %v1879_v40 = vpop.permute.xlu0 %1878 }
 0xe98   :  { %v1881_v41 = vmul.f32 %v1879_v40, %v1876_v39  ;;  %v2049_v48 = vmul.f32 0.5, %v2048_v47  ;;  %v1888_v59 = vsub.f32 1.0, %v1876_v39  ;;  %v1894_v61 = vmul.f32 %v1876_v39, %v5072_v10 }
 0xe9a   :  { %1883 = vrot.lane.b32.xlu0 %v1881_v41, %s4783_s10  ;;  %v2060_v3 = vsub.f32 1.0, %v2049_v48  ;;  %v2068_v5 = vmul.f32 %v2066_v2, %v2049_v48 }
 0xef9   :  { %v2051_v50 = vpop.permute.xlu1 %2050 }
 0xefa   :  { %v2053_v51 = vmul.f32 %v2051_v50, %v2049_v48 }
 0xefc   :  { %2055 = vrot.lane.b32.xlu1 %v2053_v51, %s4777_s22 }
 0xf0c   :  { %v1884_v52 = vpop.permute.xlu0 %1883 }
 0xf0d   :  { %v1886_v53 = vadd.f32 %v1884_v52, %v1799_v27 }
 0xf0f   :  { %4739 = vtanh.f32 %v1886_v53 }
 0xf19   :  { %v4740_v55 = vpop.eup %4739 }
 0xf1a   :  { %1890 = vrot.lane.b32.xlu0 %v4740_v55, %s4784_s11 }
 0xf6e   :  { %v2056_v56 = vpop.permute.xlu1 %2055 }
 0xf6f   :  { %v2058_v57 = vadd.f32 %v2056_v56, %v4852_v21 }
 0xf71   :  { %4741 = vtanh.f32 %v2058_v57 }
 0xf7b   :  { %v4742_v58 = vpop.eup %4741 }
 0xf7c   :  { %2062 = vrot.lane.b32.xlu1 %v4742_v58, %s4780_s1 }
 0xf8c   :  { %v1891_v60 = vpop.permute.xlu0 %1890 }
 0xf8d   :  { %v1893_v62 = vmul.f32 %v1891_v60, %v1888_v59 }
 0xf8f   :  { %v5119_v63 = vadd.f32 %v1894_v61, %v1893_v62 }
 0xf91   :  { %1897 = vrot.lane.b32.xlu0 %v5119_v63, %s4784_s11 }
 0xfee   :  { %v2063_v4 = vpop.permute.xlu1 %2062 }
 0xfef   :  { %v2065_v6 = vmul.f32 %v2063_v4, %v2060_v3 }
 0xff1   :  { %v5124_v7 = vadd.f32 %v2068_v5, %v2065_v6 }
 0xff3   :  { %v2071_v8 = vrot.slane %v5124_v7, 2  ;;  %v2410_v57 = vrot.slane %v5124_v7, 6 }
 0xff5   :  { %2072 = vrot.lane.b32.xlu1 %v2071_v8, %s4780_s1 }
0x1003   :  { %v1898_v11 = vpop.permute.xlu0 %1897 }
0x1004   :  { %4248 = vmatmul.mubr.msk.f32.vlgmr.msra.gmra.mrb[20].mxu1 %vm426_vm2, %v1898_v11  ;;  %4277 = vmatmul.mubr.msk.f32.vlgmr.msra.gmra.mrb[22].mxu0 %vm426_vm2, %v1898_v11  ;;  %v4767_v11 = vld [vmem:[%s4843_s17] ss:$0 sm:$0xff]  ;;  %s3806_s17 = sld [smem:[%s5339_s0 + %s4793_s14]]  }
0x1005   :  { %4552 = vmatpush3.bf16.msra.mxu1 %v4869_v42  ;;  %4564 = vmatpush3.bf16.msra.mxu0 %v4824_v9 }
0x1006   :  { %4553 = vmatprep.subr.bf16.mxu1 %v4770_v0  ;;  %4565 = vmatprep.subr.bf16.mxu0 %v4770_v0 }
0x1007   :  { %4269 = vmatprep.mubr.msk.f32.mxu1 %vm4773_vm0, %v4774_v1  ;;  %4294 = vmatprep.mubr.msk.f32.mxu0 %vm4773_vm0, %v4774_v1 }
0x1009   :  { %4555 = vmatpush3.bf16.msra.mxu1 %v4873_v43  ;;  %4567 = vmatpush3.bf16.msra.mxu0 %v4828_v14 }
0x100a   :  { %4559 = vmatprep.subr.bf16.mxu1 %v4770_v0  ;;  %4574 = vmatprep.subr.bf16.mxu0 %v4770_v0 }
0x1067   :  { %v2073_v10 = vpop.permute.xlu1 %2072 }
0x1068   :  { %4270 = vmatmul.mubr.msk.f32.vlgmr.msra.gmra.mrb[22].mxu1 %vm139_vm1, %v2073_v10  ;;  %4295 = vmatmul.mubr.msk.f32.vlgmr.msra.gmra.mrb[24].mxu0 %vm139_vm1, %v2073_v10 }
0x1069   :  { %4561 = vmatpush3.bf16.msra.mxu1 %v4927_v26  ;;  %4576 = vmatpush3.bf16.msra.mxu0 %v4866_v38 }
0x106a   :  { %4283 = vmatprep.mubr.msk.f32.mxu1 %vm4773_vm0, %v4774_v1  ;;  %4312 = vmatprep.mubr.msk.f32.mxu0 %vm4773_vm0, %v4774_v1 }
0x106b   :  { %4568 = vmatprep.subr.bf16.mxu1 %v4770_v0  ;;  %4580 = vmatprep.subr.bf16.mxu0 %v4770_v0 }
0x10d7   :  { %v1967_v12 = vpop.f32.mrb[20].mxu1  ;;  %v2212_v13 = vpop.f32.mrb[22].mxu0 }
0x10d8   :  { %1971 = vst.msk [vmem:[#allocation2 + $0x8] sm:$0x3] %vm598_vm3, %v1967_v12  ;;  %v2213_v15 = vadd.f32 %v4892_v49, %v2212_v13  ;;  %v4249_v17 = vpop.f32.mrb[21].mxu1  ;;  %v4278_v18 = vpop.f32.mrb[23].mxu0 }
0x10da   :  { %2222 = vrot.lane.b32.xlu0 %v2213_v15, %s4780_s1 }
0x113b   :  { %v2142_v19 = vpop.f32.mrb[22].mxu1  ;;  %v2382_v20 = vpop.f32.mrb[24].mxu0 }
0x113c   :  { %v2143_v22 = vadd.f32 %v4914_v54, %v2142_v19  ;;  %v2383_v23 = vadd.f32 %v4849_v16, %v2382_v20  ;;  %v4271_v25 = vpop.f32.mrb[23].mxu1  ;;  %v4296_v24 = vpop.f32.mrb[25].mxu0 }
0x113e   :  { %v2216_v28 = vadd.f32 %v2213_v15, %v2143_v22  ;;  %v2387_v29 = vrot.slane %v2383_v23, 4 }
0x1140   :  { %v2217_v27 = vmul.f32 0.5, %v2216_v28  ;;  %2394 = vrot.lane.b32.xlu1 %v2387_v29, %s4777_s22  ;;  %v2389_v36 = vadd.f32 %v2387_v29, %v4852_v21 }
0x1142   :  { %4743 = vtanh.f32 %v2217_v27  ;;  %v2390_v32 = vmul.f32 0.5, %v2389_v36 }
0x1144   :  { %4745 = vtanh.f32 %v2390_v32 }
0x114c   :  { %v4744_v30 = vpop.eup %4743  ;;  %v2223_v34 = vpop.permute.xlu0 %2222 }
0x114d   :  { %v2219_v31 = vadd.f32 1.0, %v4744_v30 }
0x114e   :  { %v4746_v16 = vpop.eup %4745 }
0x114f   :  { %v2220_v33 = vmul.f32 0.5, %v2219_v31  ;;  %v2392_v37 = vadd.f32 1.0, %v4746_v16  ;;  %v3008_v16 = vld [vmem:[%s3800_s19] sm:$0xff] }
0x1151   :  { %v2225_v35 = vmul.f32 %v2223_v34, %v2220_v33  ;;  %v2393_v39 = vmul.f32 0.5, %v2392_v37  ;;  %v2232_v51 = vsub.f32 1.0, %v2220_v33  ;;  %v2238_v53 = vmul.f32 %v2220_v33, %v5119_v63  ;;  %v3009_v37 = vld [vmem:[%s3800_s19 + $0x8] sm:$0xff]  ;;  %s3809_s19 = sld [smem:[%s5339_s0 + %s4801_s16]]  }
0x1153   :  { %2227 = vrot.lane.b32.xlu0 %v2225_v35, %s4783_s10  ;;  %v2404_v58 = vsub.f32 1.0, %v2393_v39  ;;  %v2412_v60 = vmul.f32 %v2410_v57, %v2393_v39  ;;  %v3007_v57 = vld [vmem:[%s3787_s23 + $0x8] sm:$0xff] }
0x11b2   :  { %v2395_v40 = vpop.permute.xlu1 %2394 }
0x11b3   :  { %v2397_v41 = vmul.f32 %v2395_v40, %v2393_v39  ;;  %v4598_v39 = vpack.c.bf16 %v3009_v37, %v3008_v16 }
0x11b5   :  { %2399 = vrot.lane.b32.xlu1 %v2397_v41, %s4777_s22 }
0x11c5   :  { %v2228_v44 = vpop.permute.xlu0 %2227 }
0x11c6   :  { %v2230_v45 = vadd.f32 %v2228_v44, %v2143_v22 }
0x11c8   :  { %4747 = vtanh.f32 %v2230_v45 }
0x11d2   :  { %v4748_v46 = vpop.eup %4747 }
0x11d3   :  { %2234 = vrot.lane.b32.xlu0 %v4748_v46, %s4784_s11 }
0x1227   :  { %v2400_v47 = vpop.permute.xlu1 %2399 }
0x1228   :  { %v2402_v48 = vadd.f32 %v2400_v47, %v4852_v21 }
0x122a   :  { %4749 = vtanh.f32 %v2402_v48 }
0x1234   :  { %v4750_v50 = vpop.eup %4749 }
0x1235   :  { %2406 = vrot.lane.b32.xlu1 %v4750_v50, %s4780_s1 }
0x1245   :  { %v2235_v52 = vpop.permute.xlu0 %2234 }
0x1246   :  { %v2237_v55 = vmul.f32 %v2235_v52, %v2232_v51 }
0x1248   :  { %v5165_v56 = vadd.f32 %v2238_v53, %v2237_v55  ;;  %v3006_v55 = vld [vmem:[%s3787_s23] sm:$0xff]  ;;  %s3807_s23 = sld [smem:[%s5339_s0 + %s4802_s20]]  }
0x124a   :  { %2241 = vrot.lane.b32.xlu0 %v5165_v56, %s4784_s11 }
0x12a7   :  { %v2407_v59 = vpop.permute.xlu1 %2406 }
0x12a8   :  { %v2409_v61 = vmul.f32 %v2407_v59, %v2404_v58 }
0x12aa   :  { %v5170_v62 = vadd.f32 %v2412_v60, %v2409_v61 }
0x12ac   :  { %v2415_v2 = vrot.slane %v5170_v62, 4 }
0x12ae   :  { %2416 = vrot.lane.b32.xlu1 %v2415_v2, %s4780_s1 }
0x12bc   :  { %v2242_v3 = vpop.permute.xlu0 %2241 }
0x12bd   :  { %4284 = vmatmul.mubr.msk.f32.vlgmr.msra.gmra.mrb[24].mxu1 %vm426_vm2, %v2242_v3  ;;  %4313 = vmatmul.mubr.msk.f32.vlgmr.msra.gmra.mrb[26].mxu0 %vm426_vm2, %v2242_v3 }
0x12be   :  { %4570 = vmatpush3.bf16.msra.mxu1 %v4869_v42  ;;  %4582 = vmatpush3.bf16.msra.mxu0 %v4824_v9 }
0x12bf   :  { %4571 = vmatprep.subr.bf16.mxu1 %v4770_v0  ;;  %4583 = vmatprep.subr.bf16.mxu0 %v4770_v0 }
0x12c0   :  { %4305 = vmatprep.mubr.msk.f32.mxu1 %vm4773_vm0, %v4774_v1  ;;  %4330 = vmatprep.mubr.msk.f32.mxu0 %vm4773_vm0, %v4774_v1 }
0x12c2   :  { %4573 = vmatpush3.bf16.msra.mxu1 %v4873_v43  ;;  %4585 = vmatpush3.bf16.msra.mxu0 %v4828_v14 }
0x12c3   :  { %4577 = vmatprep.subr.bf16.mxu1 %v4770_v0  ;;  %4592 = vmatprep.subr.bf16.mxu0 %v4770_v0 }
0x1320   :  { %v2417_v63 = vpop.permute.xlu1 %2416 }
0x1321   :  { %4306 = vmatmul.mubr.msk.f32.vlgmr.msra.gmra.mrb[26].mxu1 %vm139_vm1, %v2417_v63  ;;  %4331 = vmatmul.mubr.msk.f32.vlgmr.msra.gmra.mrb[28].mxu0 %vm139_vm1, %v2417_v63  ;;  %v4769_v63 = vld [vmem:[%s4911_s9] ss:$0 sm:$0xff]  ;;  %s3788_s9 = sld [smem:[%s5339_s0 + %s4791_s6]]   ;;  %s4806_s6 = smov 30  }
0x1322   :  { %4579 = vmatpush3.bf16.msra.mxu1 %v4927_v26  ;;  %4594 = vmatpush3.bf16.msra.mxu0 %v4866_v38 }
0x1323   :  { %4319 = vmatprep.mubr.msk.f32.mxu1 %vm4773_vm0, %v4774_v1  ;;  %4348 = vmatprep.mubr.msk.f32.mxu0 %vm4773_vm0, %v4774_v1 }
0x1324   :  { %4586 = vmatprep.subr.bf16.mxu1 %v4770_v0  ;;  %4599 = vmatprep.subr.bf16.mxu0 %v4598_v39 }
0x1390   :  { %v2311_v9 = vpop.f32.mrb[24].mxu1  ;;  %v2556_v14 = vpop.f32.mrb[26].mxu0 }
0x1391   :  { %2315 = vst.msk [vmem:[#allocation2 + $0xa] sm:$0x3] %vm598_vm3, %v2311_v9  ;;  %v2557_v4 = vadd.f32 %v4892_v49, %v2556_v14  ;;  %v4285_v5 = vpop.f32.mrb[25].mxu1  ;;  %v4314_v6 = vpop.f32.mrb[27].mxu0 }
0x1393   :  { %2566 = vrot.lane.b32.xlu0 %v2557_v4, %s4780_s1 }
0x13f4   :  { %v2486_v7 = vpop.f32.mrb[26].mxu1  ;;  %v2726_v38 = vpop.f32.mrb[28].mxu0 }
0x13f5   :  { %v2487_v8 = vadd.f32 %v4914_v54, %v2486_v7  ;;  %v2727_v10 = vadd.f32 %v4767_v11, %v2726_v38  ;;  %v4307_v12 = vpop.f32.mrb[27].mxu1  ;;  %v4332_v13 = vpop.f32.mrb[29].mxu0 }
0x13f7   :  { %v2560_v15 = vadd.f32 %v2557_v4, %v2487_v8  ;;  %v2731_v17 = vrot.slane %v2727_v10, 2 }
0x13f9   :  { %v2561_v18 = vmul.f32 0.5, %v2560_v15  ;;  %2738 = vrot.lane.b32.xlu1 %v2731_v17, %s4777_s22  ;;  %v2733_v25 = vadd.f32 %v2731_v17, %v4852_v21 }
0x13fb   :  { %4751 = vtanh.f32 %v2561_v18  ;;  %v2734_v54 = vmul.f32 0.5, %v2733_v25 }
0x13fd   :  { %4753 = vtanh.f32 %v2734_v54 }
0x1405   :  { %v4752_v19 = vpop.eup %4751  ;;  %v2567_v22 = vpop.permute.xlu0 %2566 }
0x1406   :  { %v2563_v49 = vadd.f32 1.0, %v4752_v19 }
0x1407   :  { %v4754_v24 = vpop.eup %4753 }
0x1408   :  { %v2564_v20 = vmul.f32 0.5, %v2563_v49  ;;  %v2736_v28 = vadd.f32 1.0, %v4754_v24 }
0x140a   :  { %v2569_v23 = vmul.f32 %v2567_v22, %v2564_v20  ;;  %v2737_v29 = vmul.f32 0.5, %v2736_v28  ;;  %v2576_v40 = vsub.f32 1.0, %v2564_v20  ;;  %v2582_v44 = vmul.f32 %v2564_v20, %v5165_v56 }
0x140c   :  { %2571 = vrot.lane.b32.xlu0 %v2569_v23, %s4783_s10  ;;  %v2748_v47 = vsub.f32 1.0, %v2737_v29  ;;  %v3004_v23 = vld [vmem:[#allocation2] sm:$0xff] }
0x146b   :  { %v2739_v27 = vpop.permute.xlu1 %2738 }
0x146c   :  { %v2741_v30 = vmul.f32 %v2739_v27, %v2737_v29 }
0x146e   :  { %2743 = vrot.lane.b32.xlu1 %v2741_v30, %s4777_s22  ;;  %s4795_s22 = smov 26  }
0x146f   :  { %s5276_s25 = sld [smem:[%s5339_s0 + %s4795_s22]]  }
0x147e   :  { %v2572_v31 = vpop.permute.xlu0 %2571 }
0x147f   :  { %v2574_v33 = vadd.f32 %v2572_v31, %v2487_v8 }
0x1481   :  { %4755 = vtanh.f32 %v2574_v33  ;;  %v3194_v33 = vld [vmem:[%s3788_s9] sm:$0xff] }
0x148b   :  { %v4756_v34 = vpop.eup %4755 }
0x148c   :  { %2578 = vrot.lane.b32.xlu0 %v4756_v34, %s4784_s11  ;;  %v3195_v34 = vld [vmem:[%s3788_s9 + $0x8] sm:$0xff]  ;;  %s3816_s9 = sld [smem:[%s5339_s0 + %s4806_s6]]  }
0x14e0   :  { %v2744_v35 = vpop.permute.xlu1 %2743 }
0x14e1   :  { %v2746_v36 = vadd.f32 %v2744_v35, %v4852_v21  ;;  %v2754_v21 = vrot.slane %v5170_v62, 6  ;;  %v3853_v62 = vld [vmem:[%s3801_s27] ss:$0 sm:$0xff]  ;;  %s3813_s27 = sld [smem:[%s5339_s0 + %s4803_s24]]  }
0x14e3   :  { %4757 = vtanh.f32 %v2746_v36  ;;  %v2756_v50 = vmul.f32 %v2754_v21, %v2737_v29 }
0x14ed   :  { %v4758_v32 = vpop.eup %4757 }
0x14ee   :  { %2750 = vrot.lane.b32.xlu1 %v4758_v32, %s4780_s1 }
0x14fe   :  { %v2579_v41 = vpop.permute.xlu0 %2578 }
0x14ff   :  { %v2581_v45 = vmul.f32 %v2579_v41, %v2576_v40 }
0x1501   :  { %v5213_v46 = vadd.f32 %v2582_v44, %v2581_v45 }
0x1503   :  { %2585 = vrot.lane.b32.xlu0 %v5213_v46, %s4784_s11 }
0x1560   :  { %v2751_v48 = vpop.permute.xlu1 %2750 }
0x1561   :  { %v2753_v51 = vmul.f32 %v2751_v48, %v2748_v47  ;;  %v3290_v47 = vld [vmem:[%s3806_s17] sm:$0xff]  ;;  %v3291_v48 = vld [vmem:[%s3806_s17 + $0x8] sm:$0xff] }
0x1563   :  { %v2757_v52 = vadd.f32 %v2756_v50, %v2753_v51  ;;  %v4610_v51 = vpack.c.bf16 %v3291_v48, %v3290_v47 }
0x1565   :  { %v2759_v53 = vrot.slane %v2757_v52, 6  ;;  %v3382_v52 = vld [vmem:[%s3789_s21] sm:$0xff] }
0x1567   :  { %2760 = vrot.lane.b32.xlu1 %v2759_v53, %s4780_s1  ;;  %v3383_v53 = vld [vmem:[%s3789_s21 + $0x8] sm:$0xff] }
0x1575   :  { %v2586_v56 = vpop.permute.xlu0 %2585 }
0x1576   :  { %4320 = vmatmul.mubr.msk.f32.vlgmr.msra.gmra.mrb[28].mxu1 %vm426_vm2, %v2586_v56  ;;  %4349 = vmatmul.mubr.msk.f32.vlgmr.msra.gmra.mrb[30].mxu0 %vm426_vm2, %v2586_v56  ;;  %v3577_v56 = vld [vmem:[%s5276_s25 + $0x8] sm:$0xff] }
0x1577   :  { %4601 = vmatpush3.bf16.msra.mxu0 %v4598_v39  ;;  %4362 = vmatprep.mubr.msk.f32.mxu0 %vm426_vm2, %v3006_v55  ;;  %v3576_v55 = vld [vmem:[%s5276_s25] sm:$0xff] }
0x1578   :  { %4588 = vmatpush3.bf16.msra.mxu1 %v4869_v42  ;;  %4341 = vmatprep.mubr.msk.f32.mxu1 %vm4773_vm0, %v4774_v1 }
0x1579   :  { %4589 = vmatprep.subr.bf16.mxu1 %v4770_v0 }
0x157a   :  { %4363 = vmatmul.mubr.msk.f32.vlgmr.msra.gmra.mrb[32].mxu0 %vm426_vm2, %v3007_v57  ;;  %v3578_v57 = vld [vmem:[%s5276_s25 + $0x10] sm:$0xff] }
0x157b   :  { %4376 = vmatprep.mubr.msk.f32.mxu0 %vm426_vm2, %v3194_v33 }
0x157c   :  { %4591 = vmatpush3.bf16.msra.mxu1 %v4873_v43  ;;  %v4768_v43 = vld [vmem:[%s4889_s5] ss:$0 sm:$0xff]  ;;  %s3802_s5 = sld [smem:[%s5339_s0 + %s4790_s2]]   ;;  %s4805_s2 = smov 29  }
0x157d   :  { %4595 = vmatprep.subr.bf16.mxu1 %v4770_v0 }
0x1582   :  { %v3102_v29 = vld [vmem:[%s3802_s5] sm:$0xff]  ;;  %v3103_v27 = vld [vmem:[%s3802_s5 + $0x8] sm:$0xff]  ;;  %s3815_s5 = sld [smem:[%s5339_s0 + %s4805_s2]]  }
0x1583   :  { %v4602_v31 = vpack.c.bf16 %v3103_v27, %v3102_v29  ;;  %v3862_v27 = vld [vmem:[%s3807_s23] ss:$0 sm:$0xff] }
0x15d9   :  { %v2761_v58 = vpop.permute.xlu1 %2760 }
0x15da   :  { %4342 = vmatmul.mubr.msk.f32.vlgmr.msra.gmra.mrb[30].mxu1 %vm139_vm1, %v2761_v58  ;;  %v4630_v58 = vpack.c.bf16 %v3577_v56, %v3576_v55  ;;  %v3871_v55 = vld [vmem:[%s3813_s27] ss:$0 sm:$0xff] }
0x15db   :  { %4597 = vmatpush3.bf16.msra.mxu1 %v4927_v26  ;;  %4355 = vmatprep.mubr.msk.f32.mxu1 %vm4773_vm0, %v4774_v1 }
0x15dc   :  { %4603 = vmatprep.subr.bf16.mxu1 %v4602_v31 }
0x1649   :  { %v2655_v42 = vpop.f32.mrb[28].mxu1  ;;  %v2900_v59 = vpop.f32.mrb[30].mxu0 }
0x164a   :  { %2659 = vst.msk [vmem:[#allocation2 + $0xc] sm:$0x3] %vm598_vm3, %v2655_v42  ;;  %v2901_v0 = vadd.f32 %v4768_v43, %v2900_v59  ;;  %v4321_v60 = vpop.f32.mrb[29].mxu1  ;;  %v4350_v61 = vpop.f32.mrb[31].mxu0  ;;  %v3579_v42 = vld [vmem:[%s5276_s25 + $0x18] sm:$0xff] }
0x164b   :  { %v4634_v59 = vpack.c.bf16 %v3579_v42, %v3578_v57  ;;  %v3859_v43 = vld [vmem:[%s3805_s29] ss:$0 sm:$0xff] }
0x164c   :  { %2910 = vrot.lane.b32.xlu0 %v2901_v0, %s4780_s1  ;;  %s3804_s1 = sld [smem:[%s5339_s0 + %s4789_s28]]   ;;  %v3856_v60 = vld [vmem:[%s3803_s3] ss:$0 sm:$0xff]  ;;  %s4804_s28 = smov 25  }
0x164d   :  { %v4364_v26 = vpop.f32.mrb[32].mxu0 }
0x164e   :  { %v3095_v2 = vadd.f32 %v4364_v26, %v3853_v62  ;;  %v3089_v1 = vpop.f32.mrb[33].mxu0 }
0x164f   :  { %v3090_v20 = vadd.f32 %v3853_v62, %v3089_v1 }
0x1650   :  { %v3099_v32 = vmax.f32 %v3095_v2, 0.0 }
0x1651   :  { %v3098_v22 = vmax.f32 %v3090_v20, 0.0 }
0x1652   :  { %v3196_v24 = vld [vmem:[%s3804_s1] sm:$0xff]  ;;  %v3197_v28 = vld [vmem:[%s3804_s1 + $0x8] sm:$0xff]  ;;  %s3811_s1 = sld [smem:[%s5339_s0 + %s4804_s28]]  }
0x1653   :  { %v3100_v25 = vadd.f32 %v3098_v22, %v3004_v23  ;;  %v4606_v30 = vpack.c.bf16 %v3197_v28, %v3196_v24  ;;  %v3865_v28 = vld [vmem:[%s3809_s19] ss:$0 sm:$0xff] }
0x1655   :  { %4607 = vmatprep.subr.bf16.mxu0 %v4606_v30 }
0x1656   :  { %4609 = vmatpush3.bf16.msra.mxu0 %v4606_v30 }
0x1658   :  { %v3868_v57 = vld [vmem:[%s3811_s1] ss:$0 sm:$0xff] }
0x1659   :  { %4377 = vmatmul.mubr.msk.f32.vlgmr.msra.gmra.mrb[34].mxu0 %vm426_vm2, %v3195_v34 }
0x165a   :  { %4394 = vmatprep.mubr.msk.f32.mxu0 %vm139_vm1, %v3382_v52  ;;  %v3684_v52 = vld [vmem:[%s5305_s15 + $0x38] sm:$0xff] }
0x16ad   :  { %v2830_v3 = vpop.f32.mrb[30].mxu1 }
0x16ae   :  { %v2831_v9 = vadd.f32 %v4769_v63, %v2830_v3  ;;  %v4343_v14 = vpop.f32.mrb[31].mxu1 }
0x16b0   :  { %v2904_v4 = vadd.f32 %v2901_v0, %v2831_v9 }
0x16b2   :  { %v2905_v5 = vmul.f32 0.5, %v2904_v4 }
0x16b4   :  { %4759 = vtanh.f32 %v2905_v5 }
0x16be   :  { %v4760_v6 = vpop.eup %4759  ;;  %v2911_v8 = vpop.permute.xlu0 %2910 }
0x16bf   :  { %v2907_v7 = vadd.f32 1.0, %v4760_v6  ;;  %v3580_v6 = vld [vmem:[%s5276_s25 + $0x20] sm:$0xff] }
0x16c1   :  { %v2908_v38 = vmul.f32 0.5, %v2907_v7  ;;  %v3581_v7 = vld [vmem:[%s5276_s25 + $0x28] sm:$0xff] }
0x16c3   :  { %v2913_v11 = vmul.f32 %v2911_v8, %v2908_v38  ;;  %v2920_v15 = vsub.f32 1.0, %v2908_v38  ;;  %v2926_v18 = vmul.f32 %v2908_v38, %v5213_v46  ;;  %v4638_v38 = vpack.c.bf16 %v3581_v7, %v3580_v6  ;;  %v3480_v8 = vld [vmem:[%s3810_s7] sm:$0xff] }
0x16c5   :  { %2915 = vrot.lane.b32.xlu1 %v2913_v11, %s4783_s10  ;;  %s4792_s10 = smov 22   ;;  %v3481_v11 = vld [vmem:[%s3810_s7 + $0x8] sm:$0xff] }
0x16c6   :  { %s3808_s13 = sld [smem:[%s5339_s0 + %s4792_s10]]  }
0x16cc   :  { %v3384_v39 = vld [vmem:[%s3808_s13] sm:$0xff]  ;;  %v3385_v40 = vld [vmem:[%s3808_s13 + $0x8] sm:$0xff]  ;;  %v3386_v46 = vld [vmem:[%s3808_s13 + $0x10] sm:$0xff] }
0x16cd   :  { %v4614_v41 = vpack.c.bf16 %v3385_v40, %v3384_v39  ;;  %v3387_v21 = vld [vmem:[%s3808_s13 + $0x18] sm:$0xff]  ;;  %v3679_v39 = vld [vmem:[%s5305_s15 + $0x10] sm:$0xff] }
0x16ce   :  { %v4618_v50 = vpack.c.bf16 %v3387_v21, %v3386_v46  ;;  %v3680_v40 = vld [vmem:[%s5305_s15 + $0x18] sm:$0xff]  ;;  %v3681_v46 = vld [vmem:[%s5305_s15 + $0x20] sm:$0xff]  ;;  %v3682_v21 = vld [vmem:[%s5305_s15 + $0x28] sm:$0xff] }
0x16cf   :  { %4615 = vmatprep.subr.bf16.mxu0 %v4614_v41  ;;  %v4654_v48 = vpack.c.bf16 %v3682_v21, %v3681_v46 }
0x16d0   :  { %4617 = vmatpush3.bf16.msra.mxu0 %v4614_v41 }
0x16d1   :  { %4619 = vmatprep.subr.bf16.mxu0 %v4618_v50 }
0x16d4   :  { %4621 = vmatpush3.bf16.msra.mxu0 %v4618_v50 }
0x16d5   :  { %4631 = vmatprep.subr.bf16.mxu0 %v4630_v58 }
0x16d7   :  { %4395 = vmatmul.mubr.msk.f32.vlgmr.msra.gmra.mrb[36].mxu0 %vm139_vm1, %v3383_v53 }
0x16d8   :  { %4633 = vmatpush3.bf16.msra.mxu0 %v4630_v58 }
0x16d9   :  { %4635 = vmatprep.subr.bf16.mxu0 %v4634_v59 }
0x16dc   :  { %4637 = vmatpush3.bf16.msra.mxu0 %v4634_v59 }
0x16dd   :  { %4639 = vmatprep.subr.bf16.mxu0 %v4638_v38 }
0x16e0   :  { %4641 = vmatpush3.bf16.msra.mxu0 %v4638_v38 }
0x172c   :  { %v4378_v44 = vpop.f32.mrb[34].mxu0 }
0x172d   :  { %v3277_v45 = vpop.f32.mrb[35].mxu0  ;;  %v3283_v0 = vadd.f32 %v4378_v44, %v3859_v43 }
0x172e   :  { %v3278_v61 = vadd.f32 %v3859_v43, %v3277_v45  ;;  %v4650_v45 = vpack.c.bf16 %v3680_v40, %v3679_v39 }
0x172f   :  { %v3287_v62 = vmax.f32 %v3283_v0, 0.0 }
0x1730   :  { %v3286_v3 = vmax.f32 %v3278_v61, 0.0 }
0x1737   :  { %v2916_v10 = vpop.permute.xlu1 %2915 }
0x1738   :  { %v2918_v12 = vadd.f32 %v2916_v10, %v2831_v9 }
0x173a   :  { %4761 = vtanh.f32 %v2918_v12  ;;  %v4622_v12 = vpack.c.bf16 %v3481_v11, %v3480_v8 }
0x1744   :  { %v4762_v13 = vpop.eup %4761 }
0x1745   :  { %2922 = vrot.lane.b32.xlu0 %v4762_v13, %s4784_s11 }
0x17aa   :  { %v4396_v10 = vpop.f32.mrb[36].mxu0 }
0x17ab   :  { %v3467_v13 = vpop.f32.mrb[37].mxu0  ;;  %v3473_v29 = vadd.f32 %v4396_v10, %v3865_v28 }
0x17ac   :  { %v3468_v30 = vadd.f32 %v3865_v28, %v3467_v13 }
0x17ad   :  { %v3477_v33 = vmax.f32 %v3473_v29, 0.0 }
0x17b7   :  { %v2923_v17 = vpop.permute.xlu0 %2922 }
0x17b8   :  { %v2925_v19 = vmul.f32 %v2923_v17, %v2920_v15  ;;  %v3582_v15 = vld [vmem:[%s5276_s25 + $0x30] sm:$0xff]  ;;  %v3583_v17 = vld [vmem:[%s5276_s25 + $0x38] sm:$0xff] }
0x17ba   :  { %v2927_v49 = vadd.f32 %v2926_v18, %v2925_v19  ;;  %v4642_v18 = vpack.c.bf16 %v3583_v17, %v3582_v15  ;;  %v3482_v19 = vld [vmem:[%s3810_s7 + $0x10] sm:$0xff] }
0x17bc   :  { %2929 = vrot.lane.b32.xlu1 %v2927_v49, %s4784_s11  ;;  %s3790_s11 = sld [smem:[%s5339_s0 + %s4799_s8]]   ;;  %v3483_v49 = vld [vmem:[%s3810_s7 + $0x18] sm:$0xff]  ;;  %4643 = vmatprep.subr.bf16.mxu0 %v4642_v18 }
0x17bd   :  { %v4626_v20 = vpack.c.bf16 %v3483_v49, %v3482_v19  ;;  %4645 = vmatpush3.bf16.msra.mxu0 %v4642_v18 }
0x17c2   :  { %v3574_v22 = vld [vmem:[%s3790_s11] sm:$0xff]  ;;  %v3575_v23 = vld [vmem:[%s3790_s11 + $0x8] sm:$0xff] }
0x17c3   :  { %4424 = vmatprep.mubr.msk.f32.mxu0 %vm3591_vm4, %v3574_v22 }
0x17c4   :  { %4425 = vmatmul.mubr.msk.f32.vlgmr.msra.gmra.mrb[38].mxu0 %vm3591_vm4, %v3575_v23 }
0x182e   :  { %v2930_v54 = vpop.permute.xlu1 %2929 }
0x182f   :  { %4356 = vmatmul.mubr.msk.f32.vlgmr.msra.gmra.mrb[32].mxu1 %vm426_vm2, %v2930_v54  ;;  %v3678_v54 = vld [vmem:[%s5305_s15 + $0x8] sm:$0xff] }
0x1830   :  { %4369 = vmatprep.mubr.msk.f32.mxu1 %vm426_vm2, %v3100_v25  ;;  %4605 = vmatpush3.bf16.msra.mxu1 %v4602_v31  ;;  %v3677_v25 = vld [vmem:[%s5305_s15] sm:$0xff] }
0x1831   :  { %4611 = vmatprep.subr.bf16.mxu1 %v4610_v51  ;;  %v4646_v24 = vpack.c.bf16 %v3678_v54, %v3677_v25 }
0x1897   :  { %v4426_v47 = vpop.f32.mrb[38].mxu0 }
0x1898   :  { %v3664_v50 = vpop.f32.mrb[39].mxu0  ;;  %v3670_v56 = vadd.f32 %v4426_v47, %v3871_v55 }
0x1899   :  { %v3665_v58 = vadd.f32 %v3871_v55, %v3664_v50 }
0x189a   :  { %v3674_v59 = vmax.f32 %v3670_v56, 0.0 }
0x1902   :  { %v2999_v35 = vpop.f32.mrb[32].mxu1 }
0x1903   :  { %3003 = vst.msk [vmem:[#allocation2 + $0xe] sm:$0x3] %vm598_vm3, %v2999_v35  ;;  %v4357_v36 = vpop.f32.mrb[33].mxu1 }
0x1904   :  { %v3476_v36 = vmax.f32 %v3468_v30, 0.0 }
0x190a   :  { %v3005_v16 = vld [vmem:[#allocation2 + $0x8] sm:$0xff] }
0x190b   :  { %v3101_v37 = vadd.f32 %v3099_v32, %v3005_v16 }
0x190d   :  { %4370 = vmatmul.mubr.msk.f32.vlgmr.msra.gmra.mrb[34].mxu1 %vm426_vm2, %v3101_v37 }
0x190e   :  { %4613 = vmatpush3.bf16.msra.mxu1 %v4610_v51  ;;  %v3683_v51 = vld [vmem:[%s5305_s15 + $0x30] sm:$0xff] }
0x190f   :  { %4623 = vmatprep.subr.bf16.mxu1 %v4622_v12  ;;  %v4658_v53 = vpack.c.bf16 %v3684_v52, %v3683_v51 }
0x19e0   :  { %v4371_v26 = vpop.f32.mrb[34].mxu1 }
0x19e1   :  { %v3189_v2 = vadd.f32 %v4371_v26, %v3856_v60  ;;  %v3183_v1 = vpop.f32.mrb[35].mxu1 }
0x19e2   :  { %v3184_v63 = vadd.f32 %v3856_v60, %v3183_v1  ;;  %v3673_v60 = vmax.f32 %v3665_v58, 0.0 }
0x19e3   :  { %v3193_v9 = vmax.f32 %v3189_v2, 0.0 }
0x19e4   :  { %v3192_v14 = vmax.f32 %v3184_v63, 0.0 }
0x19e5   :  { %v3289_v4 = vadd.f32 %v3287_v62, %v3193_v9 }
0x19e6   :  { %v3288_v5 = vadd.f32 %v3286_v3, %v3192_v14  ;;  %v3874_v3 = vld [vmem:[%s3815_s5] ss:$0 sm:$0xff] }
0x19e8   :  { %4383 = vmatprep.mubr.msk.f32.mxu1 %vm426_vm2, %v3288_v5 }
0x19e9   :  { %4384 = vmatmul.mubr.msk.f32.vlgmr.msra.gmra.mrb[36].mxu1 %vm426_vm2, %v3289_v4 }
0x19ea   :  { %4625 = vmatpush3.bf16.msra.mxu1 %v4622_v12 }
0x19eb   :  { %4627 = vmatprep.subr.bf16.mxu1 %v4626_v20 }
0x19ee   :  { %4629 = vmatpush3.bf16.msra.mxu1 %v4626_v20 }
0x19ef   :  { %4647 = vmatprep.subr.bf16.mxu1 %v4646_v24 }
0x1abc   :  { %v4385_v31 = vpop.f32.mrb[36].mxu1 }
0x1abd   :  { %v3377_v34 = vadd.f32 %v4385_v31, %v3862_v27  ;;  %v3371_v35 = vpop.f32.mrb[37].mxu1 }
0x1abe   :  { %v3372_v32 = vadd.f32 %v3862_v27, %v3371_v35 }
0x1abf   :  { %v3381_v16 = vmax.f32 %v3377_v34, 0.0 }
0x1ac0   :  { %v3380_v37 = vmax.f32 %v3372_v32, 0.0 }
0x1ac1   :  { %v3479_v41 = vadd.f32 %v3477_v33, %v3381_v16 }
0x1ac2   :  { %v3478_v44 = vadd.f32 %v3476_v36, %v3380_v37 }
0x1ac4   :  { %4405 = vmatprep.mubr.msk.f32.mxu1 %vm139_vm1, %v3478_v44 }
0x1ac5   :  { %4406 = vmatmul.mubr.msk.f32.vlgmr.msra.gmra.mrb[38].mxu1 %vm139_vm1, %v3479_v41 }
0x1ac6   :  { %4649 = vmatpush3.bf16.msra.mxu1 %v4646_v24 }
0x1ac7   :  { %4651 = vmatprep.subr.bf16.mxu1 %v4650_v45 }
0x1aca   :  { %4653 = vmatpush3.bf16.msra.mxu1 %v4650_v45 }
0x1acb   :  { %4655 = vmatprep.subr.bf16.mxu1 %v4654_v48 }
0x1ace   :  { %4657 = vmatpush3.bf16.msra.mxu1 %v4654_v48 }
0x1acf   :  { %4659 = vmatprep.subr.bf16.mxu1 %v4658_v53 }
0x1ad2   :  { %4661 = vmatpush3.bf16.msra.mxu1 %v4658_v53 }
0x1b98   :  { %v4407_v42 = vpop.f32.mrb[38].mxu1 }
0x1b99   :  { %v3569_v43 = vadd.f32 %v4407_v42, %v3868_v57  ;;  %v3563_v0 = vpop.f32.mrb[39].mxu1 }
0x1b9a   :  { %v3564_v61 = vadd.f32 %v3868_v57, %v3563_v0 }
0x1b9b   :  { %v3573_v26 = vmax.f32 %v3569_v43, 0.0 }
0x1b9c   :  { %v3572_v62 = vmax.f32 %v3564_v61, 0.0 }
0x1b9d   :  { %v3676_v2 = vadd.f32 %v3674_v59, %v3573_v26 }
0x1b9e   :  { %v3675_v1 = vadd.f32 %v3673_v60, %v3572_v62 }
0x1ba0   :  { %4443 = vmatprep.mubr.msk.f32.mxu1 %vm3591_vm4, %v3675_v1 }
0x1ba1   :  { %4444 = vmatmul.mubr.msk.f32.vlgmr.msra.gmra.mrb[40].mxu1 %vm3591_vm4, %v3676_v2 }
0x1c74   :  { %v4445_v63 = vpop.f32.mrb[40].mxu1 }
0x1c75   :  { %v3770_v9 = vadd.f32 %v4445_v63, %v3874_v3  ;;  %v3764_v14 = vpop.f32.mrb[41].mxu1 }
0x1c76   :  { %v3765_v4 = vadd.f32 %v3874_v3, %v3764_v14 }
0x1c77   :  { %v3774_v5 = vmul.f32 0.5, %v3770_v9 }
0x1c78   :  { %v3773_v6 = vmul.f32 0.5, %v3765_v4 }
0x1c79   :  { %4763 = vtanh.f32 %v3774_v5 }
0x1c7a   :  { %4765 = vtanh.f32 %v3773_v6 }
0x1c83   :  { %v4764_v7 = vpop.eup %4763 }
0x1c84   :  { %v4766_v38 = vpop.eup %4765  ;;  %v3778_v8 = vadd.f32 1.0, %v4764_v7 }
0x1c85   :  { %v3777_v11 = vadd.f32 1.0, %v4766_v38 }
0x1c86   :  { %v3780_v10 = vmul.f32 0.5, %v3778_v8 }
0x1c87   :  { %v3779_v12 = vmul.f32 0.5, %v3777_v11 }
0x1c88   :  { %3782 = vst.msk [vmem:[%s3816_s9 + $0x8] sm:$0xff] %vm426_vm2, %v3780_v10 }
0x1c89   :  { %3781 = vst.msk [vmem:[%s3816_s9] sm:$0xff] %vm426_vm2, %v3779_v12 }

</bundles_post_ra>
